<compile_context>
chip_gen: v7x
topology: tpu7x:2x2x1
jax: 0.10.0
libtpu: 0.0.40
codegen_flags: <defaults>
</compile_context>

<pallas_src>
import jax
import jax.numpy as jnp
from jax.experimental import pallas as pl
from jax.experimental.pallas import tpu as pltpu

EPS = 1e-5
CHANNELS = (128, 32, 32, 32, 32, 32, 32)   # channel widths of the 7 cat inputs
TOTAL_C = sum(CHANNELS)                    # 320


def _cat_bn_kernel(x0_ref, x1_ref, x2_ref, x3_ref, x4_ref, x5_ref, x6_ref,
                   gamma_ref, beta_ref, out_ref):
    # Each x_ref is (C_i, P) with channels on sublanes, pixels on lanes.
    # gamma/beta are (320, 1); out_ref is (320, P).
    x_refs = (x0_ref, x1_ref, x2_ref, x3_ref, x4_ref, x5_ref, x6_ref)
    off = 0
    for x_ref in x_refs:
        c, p = x_ref.shape
        inv_p = 1.0 / p

        x = x_ref[...]                                      # (c, P)

        # Single-pass per-channel stats (reduce along the lane axis).
        sum_x = jnp.sum(x, axis=1, keepdims=True)           # (c, 1)
        sum_x2 = jnp.sum(x * x, axis=1, keepdims=True)      # (c, 1)
        mean = sum_x * inv_p
        var = jnp.maximum(sum_x2 * inv_p - mean * mean, 0.0)   # biased var

        # Fused per-channel affine: out = x * scale + shift.
        g = gamma_ref[pl.ds(off, c), :]                     # (c, 1)
        b = beta_ref[pl.ds(off, c), :]                      # (c, 1)
        scale = g * jax.lax.rsqrt(var + EPS)
        shift = b - mean * scale

        out_ref[pl.ds(off, c), :] = x * scale + shift       # static channel offset
        off += c


def cat_batchnorm(xs_nchw, gamma, beta):
    """xs_nchw: list of 7 NCHW arrays (N must be 1); gamma/beta: (320,)."""
    n, _, h, w = xs_nchw[0].shape
    assert n == 1, "this fused layout relies on N == 1 (as in the module spec)"
    p = h * w

    # Free reshapes (contiguous NCHW with N=1): (1, C_i, H, W) -> (C_i, H*W).
    xs_2d = [x.astype(jnp.float32).reshape(c_i, p)
             for x, c_i in zip(xs_nchw, CHANNELS)]
    g2d = gamma.astype(jnp.float32).reshape(TOTAL_C, 1)
    b2d = beta.astype(jnp.float32).reshape(TOTAL_C, 1)

    in_specs = [pl.BlockSpec((c_i, p), lambda i: (0, 0)) for c_i in CHANNELS]
    in_specs += [pl.BlockSpec((TOTAL_C, 1), lambda i: (0, 0)),
                 pl.BlockSpec((TOTAL_C, 1), lambda i: (0, 0))]

    out2d = pl.pallas_call(
        _cat_bn_kernel,
        out_shape=jax.ShapeDtypeStruct((TOTAL_C, p), jnp.float32),
        grid=(1,),
        in_specs=in_specs,
        out_specs=pl.BlockSpec((TOTAL_C, p), lambda i: (0, 0)),
        compiler_params=pltpu.CompilerParams(
            dimension_semantics=("arbitrary",)),
    )(*xs_2d, g2d, b2d)

    # Free reshape back to NCHW: (320, 784) -> (1, 320, 28, 28).
    return out2d.reshape(1, TOTAL_C, h, w)


def _reference(xs_nchw, gamma, beta):
    x = jnp.concatenate(xs_nchw, axis=1)
    mean = jnp.mean(x, axis=(0, 2, 3), keepdims=True)
    var = jnp.mean((x - mean) ** 2, axis=(0, 2, 3), keepdims=True)
    xhat = (x - mean) / jnp.sqrt(var + EPS)
    return xhat * gamma.reshape(1, -1, 1, 1) + beta.reshape(1, -1, 1, 1)


if __name__ == "__main__":
    key = jax.random.PRNGKey(0)
    keys = jax.random.split(key, 9)

    # Shapes implied by the module's forward.
    shapes = [(1, c, 28, 28) for c in CHANNELS]
    xs = [jax.random.normal(k, s, dtype=jnp.float32)
          for k, s in zip(keys[:7], shapes)]

    # Deterministic affine parameters for BatchNorm2d(320).
    gamma = 1.0 + 0.1 * jax.random.normal(keys[7], (TOTAL_C,), dtype=jnp.float32)
    beta = 0.1 * jax.random.normal(keys[8], (TOTAL_C,), dtype=jnp.float32)

    out = jax.block_until_ready(cat_batchnorm(xs, gamma, beta))

    ref = _reference(xs, gamma, beta)
    assert out.shape == (1, TOTAL_C, 28, 28)
    err = jnp.max(jnp.abs(out - ref))
    assert err < 1e-4, f"mismatch vs reference: {err}"

    print("KERNEL_OK")
</pallas_src>

<mosaic_0001>
module attributes {stable_mosaic.version = 11 : i64} {
  func.func @_cat_bn_kernel(%arg0: i32, %arg1: memref<128x784xf32, #tpu.memory_space<vmem>>, %arg2: memref<32x784xf32, #tpu.memory_space<vmem>>, %arg3: memref<32x784xf32, #tpu.memory_space<vmem>>, %arg4: memref<32x784xf32, #tpu.memory_space<vmem>>, %arg5: memref<32x784xf32, #tpu.memory_space<vmem>>, %arg6: memref<32x784xf32, #tpu.memory_space<vmem>>, %arg7: memref<32x784xf32, #tpu.memory_space<vmem>>, %arg8: memref<320x1xf32, #tpu.memory_space<vmem>>, %arg9: memref<320x1xf32, #tpu.memory_space<vmem>>, %arg10: memref<320x784xf32, #tpu.memory_space<vmem>>) attributes {dimension_semantics = [#tpu.dimension_semantics<arbitrary>], iteration_bounds = array<i64: 1>, scalar_prefetch = 0 : i64, scratch_operands = 0 : i64, tpu.core_type = #tpu.core_type<tc>, window_params = [{pipeline_mode = #tpu.pipeline_mode<synchronous>, transform_indices = @transform_0, window_bounds = array<i64: 128, 784>}, {pipeline_mode = #tpu.pipeline_mode<synchronous>, transform_indices = @transform_1, window_bounds = array<i64: 32, 784>}, {pipeline_mode = #tpu.pipeline_mode<synchronous>, transform_indices = @transform_2, window_bounds = array<i64: 32, 784>}, {pipeline_mode = #tpu.pipeline_mode<synchronous>, transform_indices = @transform_3, window_bounds = array<i64: 32, 784>}, {pipeline_mode = #tpu.pipeline_mode<synchronous>, transform_indices = @transform_4, window_bounds = array<i64: 32, 784>}, {pipeline_mode = #tpu.pipeline_mode<synchronous>, transform_indices = @transform_5, window_bounds = array<i64: 32, 784>}, {pipeline_mode = #tpu.pipeline_mode<synchronous>, transform_indices = @transform_6, window_bounds = array<i64: 32, 784>}, {pipeline_mode = #tpu.pipeline_mode<synchronous>, transform_indices = @transform_7, window_bounds = array<i64: 320, 1>}, {pipeline_mode = #tpu.pipeline_mode<synchronous>, transform_indices = @transform_8, window_bounds = array<i64: 320, 1>}, {pipeline_mode = #tpu.pipeline_mode<synchronous>, transform_indices = @transform_9, window_bounds = array<i64: 320, 784>}]} {
    %c0 = arith.constant 0 : index
    %c0_0 = arith.constant 0 : index
    %0 = vector.load %arg1[%c0, %c0_0] : memref<128x784xf32, #tpu.memory_space<vmem>>, vector<128x784xf32>
    %cst = arith.constant dense<0.000000e+00> : vector<128xf32>
    %1 = vector.multi_reduction <add>, %0, %cst [1] : vector<128x784xf32> to vector<128xf32>
    %2 = vector.shape_cast %1 : vector<128xf32> to vector<128x1xf32>
    %3 = arith.mulf %0, %0 : vector<128x784xf32>
    %cst_1 = arith.constant dense<0.000000e+00> : vector<128xf32>
    %4 = vector.multi_reduction <add>, %3, %cst_1 [1] : vector<128x784xf32> to vector<128xf32>
    %5 = vector.shape_cast %4 : vector<128xf32> to vector<128x1xf32>
    %cst_2 = arith.constant 0.00127551018 : f32
    %6 = vector.broadcast %cst_2 : f32 to vector<128x1xf32>
    %7 = arith.mulf %2, %6 : vector<128x1xf32>
    %cst_3 = arith.constant 0.00127551018 : f32
    %8 = vector.broadcast %cst_3 : f32 to vector<128x1xf32>
    %9 = arith.mulf %5, %8 : vector<128x1xf32>
    %10 = arith.mulf %7, %7 : vector<128x1xf32>
    %11 = arith.subf %9, %10 : vector<128x1xf32>
    %cst_4 = arith.constant 0.000000e+00 : f32
    %12 = vector.broadcast %cst_4 : f32 to vector<128x1xf32>
    %13 = arith.maximumf %11, %12 : vector<128x1xf32>
    %c0_5 = arith.constant 0 : index
    %c0_6 = arith.constant 0 : index
    %14 = vector.load %arg8[%c0_5, %c0_6] : memref<320x1xf32, #tpu.memory_space<vmem>>, vector<128x1xf32>
    %c0_7 = arith.constant 0 : index
    %c0_8 = arith.constant 0 : index
    %15 = vector.load %arg9[%c0_7, %c0_8] : memref<320x1xf32, #tpu.memory_space<vmem>>, vector<128x1xf32>
    %cst_9 = arith.constant 9.99999974E-6 : f32
    %16 = vector.broadcast %cst_9 : f32 to vector<128x1xf32>
    %17 = arith.addf %13, %16 : vector<128x1xf32>
    %18 = math.rsqrt %17 : vector<128x1xf32>
    %19 = arith.mulf %14, %18 : vector<128x1xf32>
    %20 = arith.mulf %7, %19 : vector<128x1xf32>
    %21 = arith.subf %15, %20 : vector<128x1xf32>
    %22 = vector.broadcast %19 : vector<128x1xf32> to vector<128x784xf32>
    %23 = arith.mulf %0, %22 : vector<128x784xf32>
    %24 = vector.broadcast %21 : vector<128x1xf32> to vector<128x784xf32>
    %25 = arith.addf %23, %24 : vector<128x784xf32>
    %c0_10 = arith.constant 0 : index
    %c0_11 = arith.constant 0 : index
    %26 = vector.load %arg10[%c0_10, %c0_11] : memref<320x784xf32, #tpu.memory_space<vmem>>, vector<128x784xf32>
    tpu.vector_store %arg10[%c0_10, %c0_11], %25 {strides = array<i32>} : memref<320x784xf32, #tpu.memory_space<vmem>>, vector<128x784xf32>,
    %c0_12 = arith.constant 0 : index
    %c0_13 = arith.constant 0 : index
    %27 = vector.load %arg2[%c0_12, %c0_13] : memref<32x784xf32, #tpu.memory_space<vmem>>, vector<32x784xf32>
    %cst_14 = arith.constant dense<0.000000e+00> : vector<32xf32>
    %28 = vector.multi_reduction <add>, %27, %cst_14 [1] : vector<32x784xf32> to vector<32xf32>
    %29 = vector.shape_cast %28 : vector<32xf32> to vector<32x1xf32>
    %30 = arith.mulf %27, %27 : vector<32x784xf32>
    %cst_15 = arith.constant dense<0.000000e+00> : vector<32xf32>
    %31 = vector.multi_reduction <add>, %30, %cst_15 [1] : vector<32x784xf32> to vector<32xf32>
    %32 = vector.shape_cast %31 : vector<32xf32> to vector<32x1xf32>
    %cst_16 = arith.constant 0.00127551018 : f32
    %33 = vector.broadcast %cst_16 : f32 to vector<32x1xf32>
    %34 = arith.mulf %29, %33 : vector<32x1xf32>
    %cst_17 = arith.constant 0.00127551018 : f32
    %35 = vector.broadcast %cst_17 : f32 to vector<32x1xf32>
    %36 = arith.mulf %32, %35 : vector<32x1xf32>
    %37 = arith.mulf %34, %34 : vector<32x1xf32>
    %38 = arith.subf %36, %37 : vector<32x1xf32>
    %cst_18 = arith.constant 0.000000e+00 : f32
    %39 = vector.broadcast %cst_18 : f32 to vector<32x1xf32>
    %40 = arith.maximumf %38, %39 : vector<32x1xf32>
    %c128 = arith.constant 128 : index
    %c0_19 = arith.constant 0 : index
    %41 = vector.load %arg8[%c128, %c0_19] : memref<320x1xf32, #tpu.memory_space<vmem>>, vector<32x1xf32>
    %c128_20 = arith.constant 128 : index
    %c0_21 = arith.constant 0 : index
    %42 = vector.load %arg9[%c128_20, %c0_21] : memref<320x1xf32, #tpu.memory_space<vmem>>, vector<32x1xf32>
    %cst_22 = arith.constant 9.99999974E-6 : f32
    %43 = vector.broadcast %cst_22 : f32 to vector<32x1xf32>
    %44 = arith.addf %40, %43 : vector<32x1xf32>
    %45 = math.rsqrt %44 : vector<32x1xf32>
    %46 = arith.mulf %41, %45 : vector<32x1xf32>
    %47 = arith.mulf %34, %46 : vector<32x1xf32>
    %48 = arith.subf %42, %47 : vector<32x1xf32>
    %49 = vector.broadcast %46 : vector<32x1xf32> to vector<32x784xf32>
    %50 = arith.mulf %27, %49 : vector<32x784xf32>
    %51 = vector.broadcast %48 : vector<32x1xf32> to vector<32x784xf32>
    %52 = arith.addf %50, %51 : vector<32x784xf32>
    %c128_23 = arith.constant 128 : index
    %c0_24 = arith.constant 0 : index
    %53 = vector.load %arg10[%c128_23, %c0_24] : memref<320x784xf32, #tpu.memory_space<vmem>>, vector<32x784xf32>
    tpu.vector_store %arg10[%c128_23, %c0_24], %52 {strides = array<i32>} : memref<320x784xf32, #tpu.memory_space<vmem>>, vector<32x784xf32>,
    %c0_25 = arith.constant 0 : index
    %c0_26 = arith.constant 0 : index
    %54 = vector.load %arg3[%c0_25, %c0_26] : memref<32x784xf32, #tpu.memory_space<vmem>>, vector<32x784xf32>
    %cst_27 = arith.constant dense<0.000000e+00> : vector<32xf32>
    %55 = vector.multi_reduction <add>, %54, %cst_27 [1] : vector<32x784xf32> to vector<32xf32>
    %56 = vector.shape_cast %55 : vector<32xf32> to vector<32x1xf32>
    %57 = arith.mulf %54, %54 : vector<32x784xf32>
    %cst_28 = arith.constant dense<0.000000e+00> : vector<32xf32>
    %58 = vector.multi_reduction <add>, %57, %cst_28 [1] : vector<32x784xf32> to vector<32xf32>
    %59 = vector.shape_cast %58 : vector<32xf32> to vector<32x1xf32>
    %cst_29 = arith.constant 0.00127551018 : f32
    %60 = vector.broadcast %cst_29 : f32 to vector<32x1xf32>
    %61 = arith.mulf %56, %60 : vector<32x1xf32>
    %cst_30 = arith.constant 0.00127551018 : f32
    %62 = vector.broadcast %cst_30 : f32 to vector<32x1xf32>
    %63 = arith.mulf %59, %62 : vector<32x1xf32>
    %64 = arith.mulf %61, %61 : vector<32x1xf32>
    %65 = arith.subf %63, %64 : vector<32x1xf32>
    %cst_31 = arith.constant 0.000000e+00 : f32
    %66 = vector.broadcast %cst_31 : f32 to vector<32x1xf32>
    %67 = arith.maximumf %65, %66 : vector<32x1xf32>
    %c160 = arith.constant 160 : index
    %c0_32 = arith.constant 0 : index
    %68 = vector.load %arg8[%c160, %c0_32] : memref<320x1xf32, #tpu.memory_space<vmem>>, vector<32x1xf32>
    %c160_33 = arith.constant 160 : index
    %c0_34 = arith.constant 0 : index
    %69 = vector.load %arg9[%c160_33, %c0_34] : memref<320x1xf32, #tpu.memory_space<vmem>>, vector<32x1xf32>
    %cst_35 = arith.constant 9.99999974E-6 : f32
    %70 = vector.broadcast %cst_35 : f32 to vector<32x1xf32>
    %71 = arith.addf %67, %70 : vector<32x1xf32>
    %72 = math.rsqrt %71 : vector<32x1xf32>
    %73 = arith.mulf %68, %72 : vector<32x1xf32>
    %74 = arith.mulf %61, %73 : vector<32x1xf32>
    %75 = arith.subf %69, %74 : vector<32x1xf32>
    %76 = vector.broadcast %73 : vector<32x1xf32> to vector<32x784xf32>
    %77 = arith.mulf %54, %76 : vector<32x784xf32>
    %78 = vector.broadcast %75 : vector<32x1xf32> to vector<32x784xf32>
    %79 = arith.addf %77, %78 : vector<32x784xf32>
    %c160_36 = arith.constant 160 : index
    %c0_37 = arith.constant 0 : index
    %80 = vector.load %arg10[%c160_36, %c0_37] : memref<320x784xf32, #tpu.memory_space<vmem>>, vector<32x784xf32>
    tpu.vector_store %arg10[%c160_36, %c0_37], %79 {strides = array<i32>} : memref<320x784xf32, #tpu.memory_space<vmem>>, vector<32x784xf32>,
    %c0_38 = arith.constant 0 : index
    %c0_39 = arith.constant 0 : index
    %81 = vector.load %arg4[%c0_38, %c0_39] : memref<32x784xf32, #tpu.memory_space<vmem>>, vector<32x784xf32>
    %cst_40 = arith.constant dense<0.000000e+00> : vector<32xf32>
    %82 = vector.multi_reduction <add>, %81, %cst_40 [1] : vector<32x784xf32> to vector<32xf32>
    %83 = vector.shape_cast %82 : vector<32xf32> to vector<32x1xf32>
    %84 = arith.mulf %81, %81 : vector<32x784xf32>
    %cst_41 = arith.constant dense<0.000000e+00> : vector<32xf32>
    %85 = vector.multi_reduction <add>, %84, %cst_41 [1] : vector<32x784xf32> to vector<32xf32>
    %86 = vector.shape_cast %85 : vector<32xf32> to vector<32x1xf32>
    %cst_42 = arith.constant 0.00127551018 : f32
    %87 = vector.broadcast %cst_42 : f32 to vector<32x1xf32>
    %88 = arith.mulf %83, %87 : vector<32x1xf32>
    %cst_43 = arith.constant 0.00127551018 : f32
    %89 = vector.broadcast %cst_43 : f32 to vector<32x1xf32>
    %90 = arith.mulf %86, %89 : vector<32x1xf32>
    %91 = arith.mulf %88, %88 : vector<32x1xf32>
    %92 = arith.subf %90, %91 : vector<32x1xf32>
    %cst_44 = arith.constant 0.000000e+00 : f32
    %93 = vector.broadcast %cst_44 : f32 to vector<32x1xf32>
    %94 = arith.maximumf %92, %93 : vector<32x1xf32>
    %c192 = arith.constant 192 : index
    %c0_45 = arith.constant 0 : index
    %95 = vector.load %arg8[%c192, %c0_45] : memref<320x1xf32, #tpu.memory_space<vmem>>, vector<32x1xf32>
    %c192_46 = arith.constant 192 : index
    %c0_47 = arith.constant 0 : index
    %96 = vector.load %arg9[%c192_46, %c0_47] : memref<320x1xf32, #tpu.memory_space<vmem>>, vector<32x1xf32>
    %cst_48 = arith.constant 9.99999974E-6 : f32
    %97 = vector.broadcast %cst_48 : f32 to vector<32x1xf32>
    %98 = arith.addf %94, %97 : vector<32x1xf32>
    %99 = math.rsqrt %98 : vector<32x1xf32>
    %100 = arith.mulf %95, %99 : vector<32x1xf32>
    %101 = arith.mulf %88, %100 : vector<32x1xf32>
    %102 = arith.subf %96, %101 : vector<32x1xf32>
    %103 = vector.broadcast %100 : vector<32x1xf32> to vector<32x784xf32>
    %104 = arith.mulf %81, %103 : vector<32x784xf32>
    %105 = vector.broadcast %102 : vector<32x1xf32> to vector<32x784xf32>
    %106 = arith.addf %104, %105 : vector<32x784xf32>
    %c192_49 = arith.constant 192 : index
    %c0_50 = arith.constant 0 : index
    %107 = vector.load %arg10[%c192_49, %c0_50] : memref<320x784xf32, #tpu.memory_space<vmem>>, vector<32x784xf32>
    tpu.vector_store %arg10[%c192_49, %c0_50], %106 {strides = array<i32>} : memref<320x784xf32, #tpu.memory_space<vmem>>, vector<32x784xf32>,
    %c0_51 = arith.constant 0 : index
    %c0_52 = arith.constant 0 : index
    %108 = vector.load %arg5[%c0_51, %c0_52] : memref<32x784xf32, #tpu.memory_space<vmem>>, vector<32x784xf32>
    %cst_53 = arith.constant dense<0.000000e+00> : vector<32xf32>
    %109 = vector.multi_reduction <add>, %108, %cst_53 [1] : vector<32x784xf32> to vector<32xf32>
    %110 = vector.shape_cast %109 : vector<32xf32> to vector<32x1xf32>
    %111 = arith.mulf %108, %108 : vector<32x784xf32>
    %cst_54 = arith.constant dense<0.000000e+00> : vector<32xf32>
    %112 = vector.multi_reduction <add>, %111, %cst_54 [1] : vector<32x784xf32> to vector<32xf32>
    %113 = vector.shape_cast %112 : vector<32xf32> to vector<32x1xf32>
    %cst_55 = arith.constant 0.00127551018 : f32
    %114 = vector.broadcast %cst_55 : f32 to vector<32x1xf32>
    %115 = arith.mulf %110, %114 : vector<32x1xf32>
    %cst_56 = arith.constant 0.00127551018 : f32
    %116 = vector.broadcast %cst_56 : f32 to vector<32x1xf32>
    %117 = arith.mulf %113, %116 : vector<32x1xf32>
    %118 = arith.mulf %115, %115 : vector<32x1xf32>
    %119 = arith.subf %117, %118 : vector<32x1xf32>
    %cst_57 = arith.constant 0.000000e+00 : f32
    %120 = vector.broadcast %cst_57 : f32 to vector<32x1xf32>
    %121 = arith.maximumf %119, %120 : vector<32x1xf32>
    %c224 = arith.constant 224 : index
    %c0_58 = arith.constant 0 : index
    %122 = vector.load %arg8[%c224, %c0_58] : memref<320x1xf32, #tpu.memory_space<vmem>>, vector<32x1xf32>
    %c224_59 = arith.constant 224 : index
    %c0_60 = arith.constant 0 : index
    %123 = vector.load %arg9[%c224_59, %c0_60] : memref<320x1xf32, #tpu.memory_space<vmem>>, vector<32x1xf32>
    %cst_61 = arith.constant 9.99999974E-6 : f32
    %124 = vector.broadcast %cst_61 : f32 to vector<32x1xf32>
    %125 = arith.addf %121, %124 : vector<32x1xf32>
    %126 = math.rsqrt %125 : vector<32x1xf32>
    %127 = arith.mulf %122, %126 : vector<32x1xf32>
    %128 = arith.mulf %115, %127 : vector<32x1xf32>
    %129 = arith.subf %123, %128 : vector<32x1xf32>
    %130 = vector.broadcast %127 : vector<32x1xf32> to vector<32x784xf32>
    %131 = arith.mulf %108, %130 : vector<32x784xf32>
    %132 = vector.broadcast %129 : vector<32x1xf32> to vector<32x784xf32>
    %133 = arith.addf %131, %132 : vector<32x784xf32>
    %c224_62 = arith.constant 224 : index
    %c0_63 = arith.constant 0 : index
    %134 = vector.load %arg10[%c224_62, %c0_63] : memref<320x784xf32, #tpu.memory_space<vmem>>, vector<32x784xf32>
    tpu.vector_store %arg10[%c224_62, %c0_63], %133 {strides = array<i32>} : memref<320x784xf32, #tpu.memory_space<vmem>>, vector<32x784xf32>,
    %c0_64 = arith.constant 0 : index
    %c0_65 = arith.constant 0 : index
    %135 = vector.load %arg6[%c0_64, %c0_65] : memref<32x784xf32, #tpu.memory_space<vmem>>, vector<32x784xf32>
    %cst_66 = arith.constant dense<0.000000e+00> : vector<32xf32>
    %136 = vector.multi_reduction <add>, %135, %cst_66 [1] : vector<32x784xf32> to vector<32xf32>
    %137 = vector.shape_cast %136 : vector<32xf32> to vector<32x1xf32>
    %138 = arith.mulf %135, %135 : vector<32x784xf32>
    %cst_67 = arith.constant dense<0.000000e+00> : vector<32xf32>
    %139 = vector.multi_reduction <add>, %138, %cst_67 [1] : vector<32x784xf32> to vector<32xf32>
    %140 = vector.shape_cast %139 : vector<32xf32> to vector<32x1xf32>
    %cst_68 = arith.constant 0.00127551018 : f32
    %141 = vector.broadcast %cst_68 : f32 to vector<32x1xf32>
    %142 = arith.mulf %137, %141 : vector<32x1xf32>
    %cst_69 = arith.constant 0.00127551018 : f32
    %143 = vector.broadcast %cst_69 : f32 to vector<32x1xf32>
    %144 = arith.mulf %140, %143 : vector<32x1xf32>
    %145 = arith.mulf %142, %142 : vector<32x1xf32>
    %146 = arith.subf %144, %145 : vector<32x1xf32>
    %cst_70 = arith.constant 0.000000e+00 : f32
    %147 = vector.broadcast %cst_70 : f32 to vector<32x1xf32>
    %148 = arith.maximumf %146, %147 : vector<32x1xf32>
    %c256 = arith.constant 256 : index
    %c0_71 = arith.constant 0 : index
    %149 = vector.load %arg8[%c256, %c0_71] : memref<320x1xf32, #tpu.memory_space<vmem>>, vector<32x1xf32>
    %c256_72 = arith.constant 256 : index
    %c0_73 = arith.constant 0 : index
    %150 = vector.load %arg9[%c256_72, %c0_73] : memref<320x1xf32, #tpu.memory_space<vmem>>, vector<32x1xf32>
    %cst_74 = arith.constant 9.99999974E-6 : f32
    %151 = vector.broadcast %cst_74 : f32 to vector<32x1xf32>
    %152 = arith.addf %148, %151 : vector<32x1xf32>
    %153 = math.rsqrt %152 : vector<32x1xf32>
    %154 = arith.mulf %149, %153 : vector<32x1xf32>
    %155 = arith.mulf %142, %154 : vector<32x1xf32>
    %156 = arith.subf %150, %155 : vector<32x1xf32>
    %157 = vector.broadcast %154 : vector<32x1xf32> to vector<32x784xf32>
    %158 = arith.mulf %135, %157 : vector<32x784xf32>
    %159 = vector.broadcast %156 : vector<32x1xf32> to vector<32x784xf32>
    %160 = arith.addf %158, %159 : vector<32x784xf32>
    %c256_75 = arith.constant 256 : index
    %c0_76 = arith.constant 0 : index
    %161 = vector.load %arg10[%c256_75, %c0_76] : memref<320x784xf32, #tpu.memory_space<vmem>>, vector<32x784xf32>
    tpu.vector_store %arg10[%c256_75, %c0_76], %160 {strides = array<i32>} : memref<320x784xf32, #tpu.memory_space<vmem>>, vector<32x784xf32>,
    %c0_77 = arith.constant 0 : index
    %c0_78 = arith.constant 0 : index
    %162 = vector.load %arg7[%c0_77, %c0_78] : memref<32x784xf32, #tpu.memory_space<vmem>>, vector<32x784xf32>
    %cst_79 = arith.constant dense<0.000000e+00> : vector<32xf32>
    %163 = vector.multi_reduction <add>, %162, %cst_79 [1] : vector<32x784xf32> to vector<32xf32>
    %164 = vector.shape_cast %163 : vector<32xf32> to vector<32x1xf32>
    %165 = arith.mulf %162, %162 : vector<32x784xf32>
    %cst_80 = arith.constant dense<0.000000e+00> : vector<32xf32>
    %166 = vector.multi_reduction <add>, %165, %cst_80 [1] : vector<32x784xf32> to vector<32xf32>
    %167 = vector.shape_cast %166 : vector<32xf32> to vector<32x1xf32>
    %cst_81 = arith.constant 0.00127551018 : f32
    %168 = vector.broadcast %cst_81 : f32 to vector<32x1xf32>
    %169 = arith.mulf %164, %168 : vector<32x1xf32>
    %cst_82 = arith.constant 0.00127551018 : f32
    %170 = vector.broadcast %cst_82 : f32 to vector<32x1xf32>
    %171 = arith.mulf %167, %170 : vector<32x1xf32>
    %172 = arith.mulf %169, %169 : vector<32x1xf32>
    %173 = arith.subf %171, %172 : vector<32x1xf32>
    %cst_83 = arith.constant 0.000000e+00 : f32
    %174 = vector.broadcast %cst_83 : f32 to vector<32x1xf32>
    %175 = arith.maximumf %173, %174 : vector<32x1xf32>
    %c288 = arith.constant 288 : index
    %c0_84 = arith.constant 0 : index
    %176 = vector.load %arg8[%c288, %c0_84] : memref<320x1xf32, #tpu.memory_space<vmem>>, vector<32x1xf32>
    %c288_85 = arith.constant 288 : index
    %c0_86 = arith.constant 0 : index
    %177 = vector.load %arg9[%c288_85, %c0_86] : memref<320x1xf32, #tpu.memory_space<vmem>>, vector<32x1xf32>
    %cst_87 = arith.constant 9.99999974E-6 : f32
    %178 = vector.broadcast %cst_87 : f32 to vector<32x1xf32>
    %179 = arith.addf %175, %178 : vector<32x1xf32>
    %180 = math.rsqrt %179 : vector<32x1xf32>
    %181 = arith.mulf %176, %180 : vector<32x1xf32>
    %182 = arith.mulf %169, %181 : vector<32x1xf32>
    %183 = arith.subf %177, %182 : vector<32x1xf32>
    %184 = vector.broadcast %181 : vector<32x1xf32> to vector<32x784xf32>
    %185 = arith.mulf %162, %184 : vector<32x784xf32>
    %186 = vector.broadcast %183 : vector<32x1xf32> to vector<32x784xf32>
    %187 = arith.addf %185, %186 : vector<32x784xf32>
    %c288_88 = arith.constant 288 : index
    %c0_89 = arith.constant 0 : index
    %188 = vector.load %arg10[%c288_88, %c0_89] : memref<320x784xf32, #tpu.memory_space<vmem>>, vector<32x784xf32>
    tpu.vector_store %arg10[%c288_88, %c0_89], %187 {strides = array<i32>} : memref<320x784xf32, #tpu.memory_space<vmem>>, vector<32x784xf32>,
    return
  }
  func.func @transform_0(%arg0: i32) -> (i32, i32) {
    %c0_i32 = arith.constant 0 : i32
    %c0_i32_0 = arith.constant 0 : i32
    %c0_i32_1 = arith.constant 0 : i32
    return %c0_i32, %c0_i32_0 : i32, i32
  }
  func.func @transform_1(%arg0: i32) -> (i32, i32) {
    %c0_i32 = arith.constant 0 : i32
    %c0_i32_0 = arith.constant 0 : i32
    %c0_i32_1 = arith.constant 0 : i32
    return %c0_i32, %c0_i32_0 : i32, i32
  }
  func.func @transform_2(%arg0: i32) -> (i32, i32) {
    %c0_i32 = arith.constant 0 : i32
    %c0_i32_0 = arith.constant 0 : i32
    %c0_i32_1 = arith.constant 0 : i32
    return %c0_i32, %c0_i32_0 : i32, i32
  }
  func.func @transform_3(%arg0: i32) -> (i32, i32) {
    %c0_i32 = arith.constant 0 : i32
    %c0_i32_0 = arith.constant 0 : i32
    %c0_i32_1 = arith.constant 0 : i32
    return %c0_i32, %c0_i32_0 : i32, i32
  }
  func.func @transform_4(%arg0: i32) -> (i32, i32) {
    %c0_i32 = arith.constant 0 : i32
    %c0_i32_0 = arith.constant 0 : i32
    %c0_i32_1 = arith.constant 0 : i32
    return %c0_i32, %c0_i32_0 : i32, i32
  }
  func.func @transform_5(%arg0: i32) -> (i32, i32) {
    %c0_i32 = arith.constant 0 : i32
    %c0_i32_0 = arith.constant 0 : i32
    %c0_i32_1 = arith.constant 0 : i32
    return %c0_i32, %c0_i32_0 : i32, i32
  }
  func.func @transform_6(%arg0: i32) -> (i32, i32) {
    %c0_i32 = arith.constant 0 : i32
    %c0_i32_0 = arith.constant 0 : i32
    %c0_i32_1 = arith.constant 0 : i32
    return %c0_i32, %c0_i32_0 : i32, i32
  }
  func.func @transform_7(%arg0: i32) -> (i32, i32) {
    %c0_i32 = arith.constant 0 : i32
    %c0_i32_0 = arith.constant 0 : i32
    %c0_i32_1 = arith.constant 0 : i32
    return %c0_i32, %c0_i32_0 : i32, i32
  }
  func.func @transform_8(%arg0: i32) -> (i32, i32) {
    %c0_i32 = arith.constant 0 : i32
    %c0_i32_0 = arith.constant 0 : i32
    %c0_i32_1 = arith.constant 0 : i32
    return %c0_i32, %c0_i32_0 : i32, i32
  }
  func.func @transform_9(%arg0: i32) -> (i32, i32) {
    %c0_i32 = arith.constant 0 : i32
    %c0_i32_0 = arith.constant 0 : i32
    %c0_i32_1 = arith.constant 0 : i32
    return %c0_i32, %c0_i32_0 : i32, i32
  }
}

</mosaic_0001>

<bundles_post_ra>
// kernel: tpu_custom_call.1
= control target key start
LH: loop header
LB: loop body
LE: loop exit
PB: predicated region body
PF: predicated region fallthrough
CT: control target
= control target key end

     0   :  { %vm150_vm0 = vcmask 130048   ;;  %s7674_s0 = inlined_call_operand.vmem [shape: f32[128,784], index: 0, kind: input, shape index: {}]   ;;  %s7675_s1 = inlined_call_operand.vmem [shape: f32[32,784], index: 1, kind: input, shape index: {}]   ;;  %s7676_s2 = inlined_call_operand.vmem [shape: f32[32,784], index: 2, kind: input, shape index: {}]   ;;  %s7677_s3 = inlined_call_operand.vmem [shape: f32[32,784], index: 3, kind: input, shape index: {}]   ;;  %s7678_s4 = inlined_call_operand.vmem [shape: f32[32,784], index: 4, kind: input, shape index: {}]   ;;  %s7679_s5 = inlined_call_operand.vmem [shape: f32[32,784], index: 5, kind: input, shape index: {}]   ;;  %s7680_s6 = inlined_call_operand.vmem [shape: f32[32,784], index: 6, kind: input, shape index: {}]   ;;  %s7681_s7 = inlined_call_operand.vmem [shape: f32[320,1], index: 7, kind: input, shape index: {}]   ;;  %s7682_s8 = inlined_call_operand.vmem [shape: f32[320,1], index: 8, kind: input, shape index: {}]   ;;  %s7683_s9 = inlined_call_operand.hbm [shape: f32[320,784], index: 9, kind: output, shape index: {}]  }
   0x1   :  { %v47_v0 = vld [vmem:[%s7674_s0 + $0x70] sm:$0xff]  ;;  %v48_v1 = vld [vmem:[%s7674_s0 + $0x78] sm:$0xff]  ;;  %v49_v2 = vld [vmem:[%s7674_s0 + $0x80] sm:$0xff] }
   0x2   :  { %v50_v3 = vld [vmem:[%s7674_s0 + $0x88] sm:$0xff]  ;;  %v51_v4 = vld [vmem:[%s7674_s0 + $0x90] sm:$0xff]  ;;  %v52_v5 = vld [vmem:[%s7674_s0 + $0x98] sm:$0xff]  ;;  %v164_v6 = vadd.f32 %v48_v1, %v47_v0  ;;  %v3512_v7 = vmul.f32 %v47_v0, %v47_v0  ;;  %v3525_v11 = vmul.f32 %v48_v1, %v48_v1  ;;  %v3527_v12 = vmul.f32 %v49_v2, %v49_v2 }
   0x3   :  { %v3517_v8 = vld [vmem:[%s7674_s0 + $0xa0] sm:$0xff]  ;;  %v34_v10 = vld [vmem:[%s7674_s0 + $0x8] sm:$0xff]  ;;  %v3529_v13 = vmul.f32 %v50_v3, %v50_v3  ;;  %v3531_v14 = vmul.f32 %v51_v4, %v51_v4  ;;  %v35_v16 = vld [vmem:[%s7674_s0 + $0x10] sm:$0xff]  ;;  %v3539_v20 = vmul.f32 %v52_v5, %v52_v5 }
   0x4   :  { %v33_v9 = vld [vmem:[%s7674_s0] sm:$0xff]  ;;  %v165_v15 = vadd.f32 %v164_v6, %v49_v2  ;;  %v36_v17 = vld [vmem:[%s7674_s0 + $0x18] sm:$0xff]  ;;  %v169_v21 = vsel %vm150_vm0, %v3517_v8, 0.0  ;;  %v39_v23 = vld [vmem:[%s7674_s0 + $0x30] sm:$0xff]  ;;  %v291_v25 = vmul.f32 %v34_v10, %v34_v10  ;;  %v3552_v26 = vmul.f32 %v35_v16, %v35_v16 }
   0x5   :  { %v145_v18 = vadd.f32 %v34_v10, %v33_v9  ;;  %v290_v19 = vmul.f32 %v33_v9, %v33_v9  ;;  %v37_v22 = vld [vmem:[%s7674_s0 + $0x20] sm:$0xff]  ;;  %v54_v24 = vld [vmem:[%s7674_s0 + $0xa8] sm:$0xff]  ;;  %v3554_v27 = vmul.f32 %v36_v17, %v36_v17  ;;  %v151_v31 = vsel %vm150_vm0, %v39_v23, 0.0  ;;  %v55_v32 = vld [vmem:[%s7674_s0 + $0xb0] sm:$0xff] }
   0x6   :  { %v166_v28 = vadd.f32 %v165_v15, %v50_v3  ;;  %v38_v29 = vld [vmem:[%s7674_s0 + $0x28] sm:$0xff]  ;;  %v3566_v33 = vld [vmem:[%s7674_s0 + $0xb8] sm:$0xff]  ;;  %v3568_v34 = vmul.f32 %v37_v22, %v37_v22  ;;  %v3573_v35 = vld [vmem:[%s7674_s0 + $0xc0] sm:$0xff]  ;;  %v173_v37 = vadd.f32 %v55_v32, %v54_v24  ;;  %v3582_v39 = vmul.f32 %v39_v23, %v39_v23 }
   0x7   :  { %v146_v30 = vadd.f32 %v145_v18, %v35_v16  ;;  %v3578_v36 = vld [vmem:[%s7674_s0 + $0xd8] sm:$0xff]  ;;  %v3580_v38 = vmul.f32 %v38_v29, %v38_v29  ;;  %v3584_v40 = vadd.f32 %v291_v25, %v290_v19  ;;  %v41_v45 = vld [vmem:[%s7674_s0 + $0x40] sm:$0xff]  ;;  %v42_v46 = vld [vmem:[%s7674_s0 + $0x48] sm:$0xff]  ;;  %v3597_v47 = vmul.f32 %v54_v24, %v54_v24 }
   0x8   :  { %v167_v41 = vadd.f32 %v166_v28, %v51_v4  ;;  %v178_v43 = vsel %vm150_vm0, %v3578_v36, 0.0  ;;  %v40_v44 = vld [vmem:[%s7674_s0 + $0x38] sm:$0xff]  ;;  %v3602_v48 = vld [vmem:[%s7674_s0 + $0xc8] sm:$0xff]  ;;  %v174_v49 = vadd.f32 %v173_v37, %v3566_v33  ;;  %v43_v50 = vld [vmem:[%s7674_s0 + $0x50] sm:$0xff]  ;;  %v3608_v53 = vmul.f32 %v55_v32, %v55_v32 }
   0x9   :  { %v147_v42 = vadd.f32 %v146_v30, %v36_v17  ;;  %v155_v51 = vadd.f32 %v41_v45, %v40_v44  ;;  %v297_v52 = vmul.f32 %v40_v44, %v40_v44  ;;  %v3613_v56 = vld [vmem:[%s7674_s0 + $0xd0] sm:$0xff]  ;;  %v46_v57 = vld [vmem:[%s7674_s0 + $0x68] sm:$0xff]  ;;  %v3621_v58 = vld [vmem:[%s7674_s0 + $0x118] sm:$0xff]  ;;  %v298_v60 = vmul.f32 %v41_v45, %v41_v45 }
   0xa   :  { %v168_v54 = vadd.f32 %v167_v41, %v52_v5  ;;  %v3626_v59 = vld [vmem:[%s7674_s0 + $0x120] sm:$0xff]  ;;  %v299_v61 = vmul.f32 %v42_v46, %v42_v46  ;;  %v175_v62 = vadd.f32 %v174_v49, %v3573_v35  ;;  %v44_v63 = vld [vmem:[%s7674_s0 + $0x58] sm:$0xff]  ;;  %v3638_v2 = vld [vmem:[%s7674_s0 + $0x128] sm:$0xff]  ;;  %v300_v4 = vmul.f32 %v43_v50, %v43_v50 }
   0xb   :  { %v148_v55 = vadd.f32 %v147_v42, %v37_v22  ;;  %v45_v0 = vld [vmem:[%s7674_s0 + $0x60] sm:$0xff]  ;;  %v156_v1 = vadd.f32 %v155_v51, %v42_v46  ;;  %v191_v3 = vadd.f32 %v3626_v59, %v3621_v58  ;;  %v160_v9 = vsel %vm150_vm0, %v46_v57, 0.0  ;;  %v3646_v10 = vld [vmem:[%s7674_s0 + $0x130] sm:$0xff]  ;;  %v3651_v15 = vld [vmem:[%s7674_s0 + $0x148] sm:$0xff] }
   0xc   :  { %v170_v5 = vadd.f32 %v169_v21, %v168_v54  ;;  %v3656_v16 = vld [vmem:[%s7674_s0 + $0xe0] sm:$0xff]  ;;  %v3658_v17 = vmul.f32 %v44_v63, %v44_v63  ;;  %v176_v18 = vadd.f32 %v175_v62, %v3602_v48  ;;  %v3665_v22 = vld [vmem:[%s7674_s0 + $0xe8] sm:$0xff]  ;;  %v3670_v23 = vld [vmem:[%s7674_s0 + $0xf0] sm:$0xff]  ;;  %v3672_v24 = vmul.f32 %v45_v0, %v45_v0 }
   0xd   :  { %v149_v6 = vadd.f32 %v148_v55, %v38_v29  ;;  %v157_v19 = vadd.f32 %v156_v1, %v43_v50  ;;  %v192_v21 = vadd.f32 %v191_v3, %v3638_v2  ;;  %v3677_v28 = vld [vmem:[%s7674_s0 + $0x138] sm:$0xff]  ;;  %v3687_v30 = vld [vmem:[%s7674_s0 + $0x110] sm:$0xff]  ;;  %v182_v32 = vadd.f32 %v3665_v22, %v3656_v16  ;;  %v3698_v46 = vld [vmem:[%s7674_s0 + $0x188] sm:$0xff] }
   0xe   :  { %171 = vadd.xlane.f32.xlu1 %v170_v5  ;;  %v3682_v29 = vld [vmem:[%s7674_s0 + $0xf8] sm:$0xff]  ;;  %v303_v37 = vmul.f32 %v46_v57, %v46_v57  ;;  %v177_v41 = vadd.f32 %v176_v18, %v3613_v56  ;;  %v196_v45 = vsel %vm150_vm0, %v3651_v15, 0.0  ;;  %v3703_v49 = vld [vmem:[%s7674_s0 + $0x190] sm:$0xff]  ;;  %v3713_v51 = vld [vmem:[%s7674_s0 + $0x140] sm:$0xff]  ;;  %v187_v55 = vsel %vm150_vm0, %v3687_v30, 0.0 }
   0xf   :  { %v152_v25 = vadd.f32 %v151_v31, %v149_v6  ;;  %v411_v31 = vadd.f32 %v298_v60, %v297_v52  ;;  %v158_v42 = vadd.f32 %v157_v19, %v44_v63  ;;  %v193_v44 = vadd.f32 %v192_v21, %v3646_v10  ;;  %v3708_v50 = vld [vmem:[%s7674_s0 + $0x198] sm:$0xff]  ;;  %v3718_v52 = vld [vmem:[%s7674_s0 + $0x100] sm:$0xff]  ;;  %v3739_v6 = vld [vmem:[%s7674_s0 + $0x150] sm:$0xff] }
  0x10   :  { %v183_v54 = vadd.f32 %v182_v32, %v3670_v23  ;;  %v3726_v57 = vld [vmem:[%s7674_s0 + $0x1a0] sm:$0xff]  ;;  %v209_v60 = vadd.f32 %v3703_v49, %v3698_v46  ;;  %v179_v63 = vadd.f32 %v178_v43, %v177_v41  ;;  %v3734_v5 = vld [vmem:[%s7674_s0 + $0x1b8] sm:$0xff]  ;;  %7731 = vst [vmem:[#allocation6_spill] sm:$0xff] %v3739_v6  ;;  %v403_v43 = vadd.f32 %v3584_v40, %v3552_v26  ;;  %v3757_v19 = vld [vmem:[%s7674_s0 + $0x1a8] sm:$0xff] }
  0x11   :  { %153 = vadd.xlane.f32.xlu0 %v152_v25  ;;  %v412_v62 = vadd.f32 %v411_v31, %v299_v61  ;;  %v159_v1 = vadd.f32 %v158_v42, %v45_v0  ;;  %v194_v3 = vadd.f32 %v193_v44, %v3677_v28  ;;  %7730 = vst [vmem:[#allocation5_spill] sm:$0xff] %v3734_v5  ;;  %v3744_v18 = vld [vmem:[%s7674_s0 + $0x158] sm:$0xff]  ;;  %v3751_v61 = vld [vmem:[%s7674_s0 + $0x108] sm:$0xff]  ;;  %v3763_v25 = vld [vmem:[%s7674_s0 + $0x160] sm:$0xff]  ;;  %v416_v40 = vsel %vm150_vm0, %v303_v37, 0.0 }
  0x12   :  { %7732 = vst [vmem:[#allocation7_spill] sm:$0xff] %v3744_v18  ;;  %v184_v0 = vadd.f32 %v183_v54, %v3682_v29  ;;  %v210_v21 = vadd.f32 %v209_v60, %v3708_v50  ;;  %7733 = vst [vmem:[#allocation8_spill] sm:$0xff] %v3763_v25  ;;  %v200_v26 = vadd.f32 %v3744_v18, %v3739_v6  ;;  %180 = vadd.xlane.f32.xlu1 %v179_v63  ;;  %v3772_v41 = vld [vmem:[%s7674_s0 + $0x168] sm:$0xff]  ;;  %v3777_v42 = vld [vmem:[%s7674_s0 + $0x180] sm:$0xff] }
  0x13   :  { %v161_v32 = vadd.f32 %v160_v9, %v159_v1  ;;  %v195_v31 = vadd.f32 %v194_v3, %v3713_v51  ;;  %7734 = vst [vmem:[#allocation9_spill] sm:$0xff] %v3772_v41  ;;  %7735 = vst [vmem:[#allocation10_spill] sm:$0xff] %v3777_v42  ;;  %v3782_v44 = vld [vmem:[%s7674_s0 + $0x1f8] sm:$0xff]  ;;  %v413_v37 = vadd.f32 %v412_v62, %v300_v4  ;;  %v3789_v60 = vld [vmem:[%s7674_s0 + $0x1b0] sm:$0xff]  ;;  %v214_v1 = vsel %vm150_vm0, %v3734_v5, 0.0 }
  0x14   :  { %7736 = vst [vmem:[#allocation11_spill] sm:$0xff] %v3782_v44  ;;  %v404_v9 = vadd.f32 %v403_v43, %v3554_v27  ;;  %v185_v54 = vadd.f32 %v184_v0, %v3718_v52  ;;  %v211_v63 = vadd.f32 %v210_v21, %v3726_v57  ;;  %v201_v3 = vadd.f32 %v200_v26, %v3763_v25  ;;  %v3798_v4 = vld [vmem:[%s7674_s0 + $0x200] sm:$0xff]  ;;  %v3803_v27 = vld [vmem:[%s7674_s0 + $0x208] sm:$0xff]  ;;  %v3808_v43 = vld [vmem:[%s7674_s0 + $0x170] sm:$0xff] }
  0x15   :  { %7737 = vst [vmem:[#allocation12_spill] sm:$0xff] %v3798_v4  ;;  %7738 = vst [vmem:[#allocation13_spill] sm:$0xff] %v3803_v27  ;;  %162 = vadd.xlane.f32.xlu0 %v161_v32  ;;  %v197_v62 = vadd.f32 %v196_v45, %v195_v31  ;;  %v3813_v0 = vld [vmem:[%s7674_s0 + $0x210] sm:$0xff]  ;;  %v3818_v21 = vld [vmem:[%s7674_s0 + $0x228] sm:$0xff]  ;;  %v227_v26 = vadd.f32 %v3798_v4, %v3782_v44  ;;  %v414_v45 = vadd.f32 %v413_v37, %v3658_v17 }
  0x16   :  { %7739 = vst [vmem:[#allocation14_spill] sm:$0xff] %v3818_v21  ;;  %v405_v32 = vadd.f32 %v404_v9, %v3568_v34  ;;  %v186_v31 = vadd.f32 %v185_v54, %v3751_v61  ;;  %v212_v25 = vadd.f32 %v211_v63, %v3757_v19  ;;  %v202_v18 = vadd.f32 %v201_v3, %v3772_v41  ;;  %v3832_v5 = vld [vmem:[%s7674_s0 + $0x1c0] sm:$0xff]  ;;  %v3837_v17 = vld [vmem:[%s7674_s0 + $0x1c8] sm:$0xff]  ;;  %v3842_v34 = vld [vmem:[%s7674_s0 + $0x1d0] sm:$0xff] }
  0x17   :  { %v205_v6 = vsel %vm150_vm0, %v3777_v42, 0.0  ;;  %7740 = vst [vmem:[#allocation15_spill] sm:$0xff] %v3832_v5  ;;  %7741 = vst [vmem:[#allocation16_spill] sm:$0xff] %v3837_v17  ;;  %198 = vadd.xlane.f32.xlu1 %v197_v62  ;;  %v3847_v37 = vld [vmem:[%s7674_s0 + $0x178] sm:$0xff]  ;;  %v228_v54 = vadd.f32 %v227_v26, %v3803_v27  ;;  %v218_v3 = vadd.f32 %v3837_v17, %v3832_v5  ;;  %v3869_v26 = vld [vmem:[%s7674_s0 + $0x1f0] sm:$0xff] }
  0x18   :  { %7742 = vst [vmem:[#allocation17_spill] sm:$0xff] %v3842_v34  ;;  %v3852_v9 = vld [vmem:[%s7674_s0 + $0x218] sm:$0xff]  ;;  %v415_v62 = vadd.f32 %v414_v45, %v3672_v24  ;;  %v406_v4 = vadd.f32 %v405_v32, %v3580_v38  ;;  %v188_v44 = vadd.f32 %v187_v55, %v186_v31  ;;  %v213_v42 = vadd.f32 %v212_v25, %v3789_v60  ;;  %v3874_v27 = vld [vmem:[%s7674_s0 + $0x268] sm:$0xff]  ;;  %v3879_v24 = vld [vmem:[%s7674_s0 + $0x270] sm:$0xff] }
  0x19   :  { %7743 = vst [vmem:[#allocation18_spill] sm:$0xff] %v3852_v9  ;;  %v3858_v63 = vld [vmem:[%s7674_s0 + $0x1d8] sm:$0xff]  ;;  %v203_v41 = vadd.f32 %v202_v18, %v3808_v43  ;;  %7745 = vst [vmem:[#allocation20_spill] sm:$0xff] %v3869_v26  ;;  %v407_v38 = vsel %vm150_vm0, %v3582_v39, 0.0  ;;  %v3886_v55 = vld [vmem:[%s7674_s0 + $0x220] sm:$0xff]  ;;  %v229_v18 = vadd.f32 %v228_v54, %v3813_v0  ;;  %v232_v25 = vsel %vm150_vm0, %v3818_v21, 0.0 }
  0x1a   :  { %7744 = vst [vmem:[#allocation19_spill] sm:$0xff] %v3858_v63  ;;  %7746 = vst [vmem:[#allocation21_spill] sm:$0xff] %v3874_v27  ;;  %v3894_v45 = vld [vmem:[%s7674_s0 + $0x1e0] sm:$0xff]  ;;  %v219_v32 = vadd.f32 %v218_v3, %v3842_v34  ;;  %v3900_v39 = vld [vmem:[%s7674_s0 + $0x278] sm:$0xff]  ;;  %v245_v31 = vadd.f32 %v3879_v24, %v3874_v27  ;;  %189 = vadd.xlane.f32.xlu0 %v188_v44  ;;  %v215_v54 = vadd.f32 %v214_v1, %v213_v42 }
  0x1b   :  { %7747 = vst [vmem:[#allocation22_spill] sm:$0xff] %v3879_v24  ;;  %7748 = vst [vmem:[#allocation23_spill] sm:$0xff] %v3886_v55  ;;  %v204_v17 = vadd.f32 %v203_v41, %v3847_v37  ;;  %v223_v5 = vsel %vm150_vm0, %v3869_v26, 0.0  ;;  %v3910_v21 = vld [vmem:[%s7674_s0 + $0x280] sm:$0xff]  ;;  %v3915_v3 = vld [vmem:[%s7674_s0 + $0x298] sm:$0xff]  ;;  %v3922_v42 = vadd.f32 %v416_v40, %v415_v62  ;;  %v230_v41 = vadd.f32 %v229_v18, %v3852_v9 }
  0x1c   :  { %7749 = vst [vmem:[#allocation24_spill] sm:$0xff] %v3894_v45  ;;  %7750 = vst [vmem:[#allocation25_spill] sm:$0xff] %v3900_v39  ;;  %v3920_v44 = vld [vmem:[%s7674_s0 + $0x230] sm:$0xff]  ;;  %v3928_v1 = vld [vmem:[%s7674_s0 + $0x1e8] sm:$0xff]  ;;  %v220_v24 = vadd.f32 %v219_v32, %v3858_v63  ;;  %v246_v27 = vadd.f32 %v245_v31, %v3900_v39  ;;  %v3942_v62 = vadd.f32 %v407_v38, %v406_v4  ;;  %216 = vadd.xlane.f32.xlu1 %v215_v54 }
  0x1d   :  { %7751 = vst [vmem:[#allocation26_spill] sm:$0xff] %v3910_v21  ;;  %7752 = vst [vmem:[#allocation27_spill] sm:$0xff] %v3915_v3  ;;  %v3935_v26 = vld [vmem:[%s7674_s0 + $0x238] sm:$0xff]  ;;  %v3940_v40 = vld [vmem:[%s7674_s0 + $0x240] sm:$0xff]  ;;  %v206_v18 = vadd.f32 %v205_v6, %v204_v17  ;;  %v250_v31 = vsel %vm150_vm0, %v3915_v3, 0.0  ;;  %v313_v17 = vmul.f32 %v3566_v33, %v3566_v33  ;;  %v231_v38 = vadd.f32 %v230_v41, %v3886_v55 }
  0x1e   :  { %7753 = vst [vmem:[#allocation28_spill] sm:$0xff] %v3920_v44  ;;  %7754 = vst [vmem:[#allocation29_spill] sm:$0xff] %v3935_v26  ;;  %v3947_v32 = vld [vmem:[%s7674_s0 + $0x288] sm:$0xff]  ;;  %v3959_v4 = vld [vmem:[%s7674_s0 + $0x260] sm:$0xff]  ;;  %v236_v6 = vadd.f32 %v3935_v26, %v3920_v44  ;;  %v221_v54 = vadd.f32 %v220_v24, %v3894_v45  ;;  %v247_v3 = vadd.f32 %v246_v27, %v3910_v21 }
  0x1f   :  { %7755 = vst [vmem:[#allocation30_spill] sm:$0xff] %v3940_v40  ;;  %7756 = vst [vmem:[#allocation31_spill] sm:$0xff] %v3947_v32  ;;  %v3954_v39 = vld [vmem:[%s7674_s0 + $0x248] sm:$0xff]  ;;  %v3971_v63 = vld [vmem:[%s7674_s0 + $0x2d8] sm:$0xff]  ;;  %v314_v24 = vmul.f32 %v3573_v35, %v3573_v35  ;;  %207 = vadd.xlane.f32.xlu0 %v206_v18  ;;  %v241_v44 = vsel %vm150_vm0, %v3959_v4, 0.0  ;;  %v315_v21 = vmul.f32 %v3602_v48, %v3602_v48 }
  0x20   :  { %7757 = vst [vmem:[#allocation32_spill] sm:$0xff] %v3954_v39  ;;  %7758 = vst [vmem:[#allocation33_spill] sm:$0xff] %v3959_v4  ;;  %v3976_v34 = vld [vmem:[%s7674_s0 + $0x2e0] sm:$0xff]  ;;  %v3981_v33 = vld [vmem:[%s7674_s0 + $0x2e8] sm:$0xff]  ;;  %v237_v26 = vadd.f32 %v236_v6, %v3940_v40  ;;  %v233_v45 = vadd.f32 %v232_v25, %v231_v38  ;;  %v222_v55 = vadd.f32 %v221_v54, %v3928_v1 }
  0x21   :  { %7759 = vst [vmem:[#allocation34_spill] sm:$0xff] %v3971_v63  ;;  %7760 = vst [vmem:[#allocation35_spill] sm:$0xff] %v3976_v34  ;;  %v3988_v27 = vld [vmem:[%s7674_s0 + $0x290] sm:$0xff]  ;;  %v263_v18 = vadd.f32 %v3976_v34, %v3971_v63  ;;  %v248_v9 = vadd.f32 %v247_v3, %v3947_v32  ;;  %v4012_v6 = vld [vmem:[%s7674_s0 + $0x308] sm:$0xff]  ;;  %v317_v48 = vmul.f32 %v3578_v36, %v3578_v36 }
  0x22   :  { %7761 = vst [vmem:[#allocation36_spill] sm:$0xff] %v3981_v33  ;;  %7762 = vst [vmem:[#allocation37_spill] sm:$0xff] %v3988_v27  ;;  %v3993_v41 = vld [vmem:[%s7674_s0 + $0x250] sm:$0xff]  ;;  %v4017_v4 = vld [vmem:[%s7674_s0 + $0x2a0] sm:$0xff]  ;;  %v238_v3 = vadd.f32 %v237_v26, %v3954_v39  ;;  %v316_v40 = vmul.f32 %v3613_v56, %v3613_v56  ;;  %234 = vadd.xlane.f32.xlu1 %v233_v45  ;;  %v224_v26 = vadd.f32 %v223_v5, %v222_v55 }
  0x23   :  { %7763 = vst [vmem:[#allocation38_spill] sm:$0xff] %v3993_v41  ;;  %v4001_v35 = vld [vmem:[%s7674_s0 + $0x2f0] sm:$0xff]  ;;  %7765 = vst [vmem:[#allocation40_spill] sm:$0xff] %v4012_v6  ;;  %v4022_v34 = vld [vmem:[%s7674_s0 + $0x2a8] sm:$0xff]  ;;  %v264_v54 = vadd.f32 %v263_v18, %v3981_v33  ;;  %v249_v39 = vadd.f32 %v248_v9, %v3988_v27  ;;  %v268_v32 = vsel %vm150_vm0, %v4012_v6, 0.0  ;;  %v429_v5 = vadd.f32 %v3608_v53, %v3597_v47 }
  0x24   :  { %7764 = vst [vmem:[#allocation39_spill] sm:$0xff] %v4001_v35  ;;  %7766 = vst [vmem:[#allocation41_spill] sm:$0xff] %v4017_v4  ;;  %v4029_v25 = vld [vmem:[%s7674_s0 + $0x258] sm:$0xff]  ;;  %v4041_v63 = vld [vmem:[%s7674_s0 + $0x2b0] sm:$0xff]  ;;  %v254_v36 = vadd.f32 %v4022_v34, %v4017_v4  ;;  %v239_v9 = vadd.f32 %v238_v3, %v3993_v41  ;;  %v434_v53 = vsel %vm150_vm0, %v317_v48, 0.0  ;;  %225 = vadd.xlane.f32.xlu0 %v224_v26 }
  0x25   :  { %7767 = vst [vmem:[#allocation42_spill] sm:$0xff] %v4022_v34  ;;  %v4035_v38 = vld [vmem:[%s7674_s0 + $0x2f8] sm:$0xff]  ;;  %7768 = vst [vmem:[#allocation43_spill] sm:$0xff] %v4041_v63  ;;  %v4058_v33 = vld [vmem:[%s7674_s0 + $0x2d0] sm:$0xff]  ;;  %v265_v45 = vadd.f32 %v264_v54, %v4001_v35  ;;  %v251_v3 = vadd.f32 %v250_v31, %v249_v39  ;;  %v430_v26 = vadd.f32 %v429_v5, %v313_v17 }
  0x26   :  { %v4053_v18 = vld [vmem:[%s7674_s0 + $0x2b8] sm:$0xff]  ;;  %7770 = vst [vmem:[#allocation45_spill] sm:$0xff] %v4058_v33  ;;  %v4063_v56 = vld [vmem:[%s7674_s0 + $0x348] sm:$0xff]  ;;  %v4071_v55 = vld [vmem:[%s7674_s0 + $0x300] sm:$0xff]  ;;  %v255_v34 = vadd.f32 %v254_v36, %v4041_v63  ;;  %v310_v39 = vmul.f32 %v3517_v8, %v3517_v8  ;;  %v240_v31 = vadd.f32 %v239_v9, %v4029_v25  ;;  %v259_v41 = vsel %vm150_vm0, %v4058_v33, 0.0 }
  0x27   :  { %7769 = vst [vmem:[#allocation44_spill] sm:$0xff] %v4053_v18  ;;  %7771 = vst [vmem:[#allocation46_spill] sm:$0xff] %v4063_v56  ;;  %v4078_v4 = vld [vmem:[%s7674_s0 + $0x350] sm:$0xff]  ;;  %v4083_v47 = vld [vmem:[%s7674_s0 + $0x358] sm:$0xff]  ;;  %v266_v6 = vadd.f32 %v265_v45, %v4035_v38  ;;  %252 = vadd.xlane.f32.xlu1 %v251_v3  ;;  %v431_v45 = vadd.f32 %v430_v26, %v314_v24 }
  0x28   :  { %7772 = vst [vmem:[#allocation47_spill] sm:$0xff] %v4078_v4  ;;  %v4089_v54 = vld [vmem:[%s7674_s0 + $0x2c0] sm:$0xff]  ;;  %v4099_v63 = vld [vmem:[%s7674_s0 + $0x378] sm:$0xff]  ;;  %v281_v48 = vadd.f32 %v4078_v4, %v4063_v56  ;;  %v256_v35 = vadd.f32 %v255_v34, %v4053_v18  ;;  %v4113_v27 = vld [vmem:[%s7674_s0 + $0x310] sm:$0xff]  ;;  %v420_v4 = vadd.f32 %v3525_v11, %v3512_v7  ;;  %v242_v56 = vadd.f32 %v241_v44, %v240_v31 }
  0x29   :  { %v4094_v36 = vld [vmem:[%s7674_s0 + $0x360] sm:$0xff]  ;;  %7773 = vst [vmem:[#allocation48_spill] sm:$0xff] %v4113_v27  ;;  %v4118_v17 = vld [vmem:[%s7674_s0 + $0x318] sm:$0xff]  ;;  %v4128_v34 = vld [vmem:[%s7674_s0 + $0x2c8] sm:$0xff]  ;;  %v267_v33 = vadd.f32 %v266_v6, %v4071_v55  ;;  %v425_v6 = vsel %vm150_vm0, %v310_v39, 0.0 }
  0x2a   :  { %7774 = vst [vmem:[#allocation49_spill] sm:$0xff] %v4118_v17  ;;  %v4123_v8 = vld [vmem:[%s7674_s0 + $0x320] sm:$0xff]  ;;  %v282_v5 = vadd.f32 %v281_v48, %v4083_v47  ;;  %v272_v9 = vadd.f32 %v4118_v17, %v4113_v27  ;;  %v257_v18 = vadd.f32 %v256_v35, %v4089_v54  ;;  %v4140_v3 = vld [vmem:[%s7674_s0 + $0x368] sm:$0xff]  ;;  %v286_v48 = vsel %vm150_vm0, %v4099_v63, 0.0  ;;  %243 = vadd.xlane.f32.xlu0 %v242_v56  ;;  %v4161_v17 = vld [vmem:[%s7674_s0 + $0x370] sm:$0xff] }
  0x2b   :  { %v4147_v24 = vld [vmem:[%s7674_s0 + $0x328] sm:$0xff]  ;;  %v4153_v11 = vld [vmem:[%s7674_s0 + $0x340] sm:$0xff]  ;;  %v432_v35 = vadd.f32 %v431_v45, %v315_v21  ;;  %v269_v26 = vadd.f32 %v268_v32, %v267_v33  ;;  %v421_v27 = vadd.f32 %v420_v4, %v3527_v12  ;;  %v325_v21 = vmul.f32 %v3621_v58, %v3621_v58 }
  0x2c   :  { %v283_v7 = vadd.f32 %v282_v5, %v4094_v36  ;;  %v273_v44 = vadd.f32 %v272_v9, %v4123_v8  ;;  %v258_v31 = vadd.f32 %v257_v18, %v4128_v34  ;;  %v4166_v5 = vld [vmem:[%s7674_s0 + $0x330] sm:$0xff]  ;;  %v326_v18 = vmul.f32 %v3626_v59, %v3626_v59  ;;  %v4178_v9 = vld [vmem:[%s7674_s0 + $0x338] sm:$0xff] }
  0x2d   :  { %v433_v33 = vadd.f32 %v432_v35, %v316_v40  ;;  %270 = vadd.xlane.f32.xlu1 %v269_v26  ;;  %v277_v12 = vsel %vm150_vm0, %v4153_v11, 0.0  ;;  %v422_v58 = vadd.f32 %v421_v27, %v3529_v13  ;;  %v327_v4 = vmul.f32 %v3638_v2, %v3638_v2 }
  0x2e   :  { %v284_v56 = vadd.f32 %v283_v7, %v4140_v3  ;;  %v274_v32 = vadd.f32 %v273_v44, %v4147_v24  ;;  %v260_v39 = vadd.f32 %v259_v41, %v258_v31  ;;  %v328_v41 = vmul.f32 %v3646_v10, %v3646_v10 }
  0x2f   :  { %v435_v59 = vadd.f32 %v434_v53, %v433_v33  ;;  %v423_v7 = vadd.f32 %v422_v58, %v3531_v14  ;;  %v329_v44 = vmul.f32 %v3677_v28, %v3677_v28  ;;  %v331_v13 = vmul.f32 %v3651_v15, %v3651_v15 }
  0x30   :  { %v285_v40 = vadd.f32 %v284_v56, %v4161_v17  ;;  %v275_v45 = vadd.f32 %v274_v32, %v4166_v5  ;;  %261 = vadd.xlane.f32.xlu0 %v260_v39  ;;  %v447_v27 = vadd.f32 %v326_v18, %v325_v21  ;;  %v318_v26 = vmul.f32 %v3656_v16, %v3656_v16 }
  0x31   :  { %v319_v53 = vmul.f32 %v3665_v22, %v3665_v22  ;;  %v424_v10 = vadd.f32 %v423_v7, %v3539_v20  ;;  %v330_v14 = vmul.f32 %v3713_v51, %v3713_v51  ;;  %v320_v28 = vmul.f32 %v3670_v23, %v3670_v23 }
  0x32   :  { %v287_v35 = vadd.f32 %v286_v48, %v285_v40  ;;  %v276_v2 = vadd.f32 %v275_v45, %v4178_v9  ;;  %v448_v31 = vadd.f32 %v447_v27, %v327_v4  ;;  %v452_v48 = vsel %vm150_vm0, %v331_v13, 0.0  ;;  %v7777_v45 = vld [vmem:[#allocation7_spill] sm:$0xff] }
  0x33   :  { %v321_v21 = vmul.f32 %v3682_v29, %v3682_v29  ;;  %v322_v16 = vmul.f32 %v3718_v52, %v3718_v52  ;;  %v323_v20 = vmul.f32 %v3751_v61, %v3751_v61  ;;  %v324_v51 = vmul.f32 %v3687_v30, %v3687_v30 }
  0x34   :  { %288 = vadd.xlane.f32.xlu1 %v287_v35  ;;  %v278_v15 = vadd.f32 %v277_v12, %v276_v2  ;;  %v449_v22 = vadd.f32 %v448_v31, %v328_v41  ;;  %v438_v56 = vadd.f32 %v319_v53, %v318_v26  ;;  %v426_v23 = vadd.f32 %v425_v6, %v424_v10  ;;  %v7775_v6 = vld [vmem:[#allocation5_spill] sm:$0xff]  ;;  %v7778_v41 = vld [vmem:[#allocation8_spill] sm:$0xff]  ;;  %v7781_v10 = vld [vmem:[#allocation11_spill] sm:$0xff] }
  0x35   :  { %v339_v32 = vmul.f32 %v3698_v46, %v3698_v46  ;;  %v340_v33 = vmul.f32 %v3703_v49, %v3703_v49  ;;  %v341_v29 = vmul.f32 %v3708_v50, %v3708_v50  ;;  %v443_v39 = vsel %vm150_vm0, %v324_v51, 0.0  ;;  %v7776_v49 = vld [vmem:[#allocation6_spill] sm:$0xff]  ;;  %v7782_v31 = vld [vmem:[#allocation12_spill] sm:$0xff] }
  0x36   :  { %279 = vadd.xlane.f32.xlu0 %v278_v15  ;;  %v450_v52 = vadd.f32 %v449_v22, %v329_v44  ;;  %v439_v18 = vadd.f32 %v438_v56, %v320_v28  ;;  %v342_v61 = vmul.f32 %v3726_v57, %v3726_v57  ;;  %v343_v30 = vmul.f32 %v3757_v19, %v3757_v19  ;;  %v7779_v44 = vld [vmem:[#allocation9_spill] sm:$0xff]  ;;  %v7784_v56 = vld [vmem:[#allocation18_spill] sm:$0xff] }
  0x37   :  { %v345_v46 = vmul.f32 %v7775_v6, %v7775_v6  ;;  %v465_v12 = vadd.f32 %v340_v33, %v339_v32  ;;  %v332_v58 = vmul.f32 %v7776_v49, %v7776_v49  ;;  %v344_v40 = vmul.f32 %v3789_v60, %v3789_v60  ;;  %v7780_v60 = vld [vmem:[#allocation10_spill] sm:$0xff] }
  0x38   :  { %418 = vadd.xlane.f32.xlu1 %v3922_v42  ;;  %v451_v50 = vadd.f32 %v450_v52, %v330_v14  ;;  %v440_v4 = vadd.f32 %v439_v18, %v321_v21  ;;  %v333_v57 = vmul.f32 %v7777_v45, %v7777_v45  ;;  %v334_v7 = vmul.f32 %v7778_v41, %v7778_v41  ;;  %v7792_v41 = vld [vmem:[#allocation20_spill] sm:$0xff] }
  0x39   :  { %v466_v42 = vadd.f32 %v465_v12, %v341_v29  ;;  %v470_v19 = vsel %vm150_vm0, %v345_v46, 0.0  ;;  %v335_v13 = vmul.f32 %v7779_v44, %v7779_v44  ;;  %v336_v2 = vmul.f32 %v3808_v43, %v3808_v43  ;;  %v7785_v29 = vld [vmem:[#allocation14_spill] sm:$0xff]  ;;  %v7788_v46 = vld [vmem:[#allocation16_spill] sm:$0xff] }
  0x3a   :  { %409 = vadd.xlane.f32.xlu0 %v3942_v62  ;;  %v453_v27 = vadd.f32 %v452_v48, %v451_v50  ;;  %v441_v35 = vadd.f32 %v440_v4, %v322_v16  ;;  %v338_v26 = vmul.f32 %v7780_v60, %v7780_v60  ;;  %v456_v62 = vadd.f32 %v333_v57, %v332_v58  ;;  %v7783_v16 = vld [vmem:[#allocation13_spill] sm:$0xff]  ;;  %v7790_v50 = vld [vmem:[#allocation19_spill] sm:$0xff]  ;;  %v7794_v60 = vld [vmem:[#allocation22_spill] sm:$0xff] }
  0x3b   :  { %v467_v53 = vadd.f32 %v466_v42, %v342_v61  ;;  %v353_v14 = vmul.f32 %v7781_v10, %v7781_v10  ;;  %v354_v28 = vmul.f32 %v7782_v31, %v7782_v31  ;;  %v337_v48 = vmul.f32 %v3847_v37, %v3847_v37  ;;  %v7786_v37 = vld [vmem:[#allocation15_spill] sm:$0xff] }
  0x3c   :  { %436 = vadd.xlane.f32.xlu1 %v435_v59  ;;  %v442_v15 = vadd.f32 %v441_v35, %v323_v20  ;;  %v461_v21 = vsel %vm150_vm0, %v338_v26, 0.0  ;;  %v355_v43 = vmul.f32 %v7783_v16, %v7783_v16  ;;  %v457_v59 = vadd.f32 %v456_v62, %v334_v7  ;;  %v7795_v62 = vld [vmem:[#allocation25_spill] sm:$0xff]  ;;  %v7797_v16 = vld [vmem:[#allocation31_spill] sm:$0xff] }
  0x3d   :  { %v468_v22 = vadd.f32 %v467_v53, %v343_v30  ;;  %v356_v51 = vmul.f32 %v3813_v0, %v3813_v0  ;;  %v357_v32 = vmul.f32 %v7784_v56, %v7784_v56  ;;  %v359_v20 = vmul.f32 %v7785_v29, %v7785_v29  ;;  %v7799_v56 = vld [vmem:[#allocation28_spill] sm:$0xff] }
  0x3e   :  { %427 = vadd.xlane.f32.xlu0 %v426_v23  ;;  %v444_v33 = vadd.f32 %v443_v39, %v442_v15  ;;  %v483_v52 = vadd.f32 %v354_v28, %v353_v14  ;;  %v346_v18 = vmul.f32 %v7786_v37, %v7786_v37  ;;  %v458_v6 = vadd.f32 %v457_v59, %v335_v13  ;;  %v7787_v23 = vld [vmem:[#allocation23_spill] sm:$0xff]  ;;  %v7789_v39 = vld [vmem:[#allocation17_spill] sm:$0xff]  ;;  %v7796_v28 = vld [vmem:[#allocation26_spill] sm:$0xff] }
  0x3f   :  { %v469_v61 = vadd.f32 %v468_v22, %v344_v40  ;;  %v358_v30 = vmul.f32 %v7787_v23, %v7787_v23  ;;  %v347_v0 = vmul.f32 %v7788_v46, %v7788_v46  ;;  %v488_v49 = vsel %vm150_vm0, %v359_v20, 0.0  ;;  %v7791_v40 = vld [vmem:[#allocation24_spill] sm:$0xff]  ;;  %v7798_v59 = vld [vmem:[#allocation27_spill] sm:$0xff]  ;;  %v7800_v20 = vld [vmem:[#allocation37_spill] sm:$0xff] }
  0x40   :  { %454 = vadd.xlane.f32.xlu1 %v453_v27  ;;  %v484_v12 = vadd.f32 %v483_v52, %v355_v43  ;;  %v348_v58 = vmul.f32 %v7789_v39, %v7789_v39  ;;  %v349_v4 = vmul.f32 %v7790_v50, %v7790_v50  ;;  %v459_v57 = vadd.f32 %v458_v6, %v336_v2  ;;  %v7793_v27 = vld [vmem:[#allocation21_spill] sm:$0xff]  ;;  %v7803_v23 = vld [vmem:[#allocation32_spill] sm:$0xff] }
  0x41   :  { %v471_v45 = vadd.f32 %v470_v19, %v469_v61  ;;  %v350_v42 = vmul.f32 %v7791_v40, %v7791_v40  ;;  %v352_v7 = vmul.f32 %v7792_v41, %v7792_v41  ;;  %v474_v13 = vadd.f32 %v347_v0, %v346_v18  ;;  %v7801_v52 = vld [vmem:[#allocation29_spill] sm:$0xff]  ;;  %v7807_v41 = vld [vmem:[#allocation35_spill] sm:$0xff] }
  0x42   :  { %445 = vadd.xlane.f32.xlu0 %v444_v33  ;;  %v485_v44 = vadd.f32 %v484_v12, %v356_v51  ;;  %v367_v35 = vmul.f32 %v7793_v27, %v7793_v27  ;;  %v368_v26 = vmul.f32 %v7794_v60, %v7794_v60  ;;  %v460_v53 = vadd.f32 %v459_v57, %v337_v48  ;;  %v7806_v57 = vld [vmem:[#allocation34_spill] sm:$0xff] }
  0x43   :  { %v351_v19 = vmul.f32 %v3928_v1, %v3928_v1  ;;  %v479_v2 = vsel %vm150_vm0, %v352_v7, 0.0  ;;  %v369_v10 = vmul.f32 %v7795_v62, %v7795_v62  ;;  %v475_v31 = vadd.f32 %v474_v13, %v348_v58  ;;  %v7805_v58 = vld [vmem:[#allocation33_spill] sm:$0xff]  ;;  %v7808_v13 = vld [vmem:[#allocation36_spill] sm:$0xff] }
  0x44   :  { %472 = vadd.xlane.f32.xlu1 %v471_v45  ;;  %v486_v14 = vadd.f32 %v485_v44, %v357_v32  ;;  %v370_v15 = vmul.f32 %v7796_v28, %v7796_v28  ;;  %v371_v43 = vmul.f32 %v7797_v16, %v7797_v16  ;;  %v462_v22 = vadd.f32 %v461_v21, %v460_v53  ;;  %v7802_v21 = vld [vmem:[#allocation30_spill] sm:$0xff]  ;;  %v7811_v28 = vld [vmem:[#allocation41_spill] sm:$0xff] }
  0x45   :  { %v373_v48 = vmul.f32 %v7798_v59, %v7798_v59  ;;  %v501_v51 = vadd.f32 %v368_v26, %v367_v35  ;;  %v360_v1 = vmul.f32 %v7799_v56, %v7799_v56  ;;  %v476_v29 = vadd.f32 %v475_v31, %v349_v4  ;;  %v7809_v26 = vld [vmem:[#allocation39_spill] sm:$0xff]  ;;  %v7814_v56 = vld [vmem:[#allocation44_spill] sm:$0xff] }
  0x46   :  { %v487_v33 = vadd.f32 %v486_v14, %v358_v30  ;;  %v372_v32 = vmul.f32 %v7800_v20, %v7800_v20  ;;  %v361_v37 = vmul.f32 %v7801_v52, %v7801_v52  ;;  %463 = vadd.xlane.f32.xlu0 %v462_v22  ;;  %v362_v6 = vmul.f32 %v7802_v21, %v7802_v21  ;;  %v7804_v30 = vld [vmem:[#allocation38_spill] sm:$0xff]  ;;  %v7810_v14 = vld [vmem:[#allocation40_spill] sm:$0xff] }
  0x47   :  { %v502_v18 = vadd.f32 %v501_v51, %v369_v10  ;;  %v506_v61 = vsel %vm150_vm0, %v373_v48, 0.0  ;;  %v363_v46 = vmul.f32 %v7803_v23, %v7803_v23  ;;  %v477_v12 = vadd.f32 %v476_v29, %v350_v42  ;;  %v7812_v22 = vld [vmem:[#allocation42_spill] sm:$0xff] }
  0x48   :  { %v489_v0 = vadd.f32 %v488_v49, %v487_v33  ;;  %v364_v39 = vmul.f32 %v7804_v30, %v7804_v30  ;;  %v366_v50 = vmul.f32 %v7805_v58, %v7805_v58  ;;  %v492_v45 = vadd.f32 %v361_v37, %v360_v1 }
  0x49   :  { %v503_v4 = vadd.f32 %v502_v18, %v370_v15  ;;  %v381_v40 = vmul.f32 %v7806_v57, %v7806_v57  ;;  %v382_v7 = vmul.f32 %v7807_v41, %v7807_v41  ;;  %v478_v44 = vadd.f32 %v477_v12, %v351_v19  ;;  %v7816_v18 = vld [vmem:[#allocation46_spill] sm:$0xff]  ;;  %v7818_v57 = vld [vmem:[#allocation48_spill] sm:$0xff] }
  0x4a   :  { %490 = vadd.xlane.f32.xlu1 %v489_v0  ;;  %v365_v49 = vmul.f32 %v4029_v25, %v4029_v25  ;;  %v497_v42 = vsel %vm150_vm0, %v366_v50, 0.0  ;;  %v383_v27 = vmul.f32 %v7808_v13, %v7808_v13  ;;  %v493_v60 = vadd.f32 %v492_v45, %v362_v6  ;;  %v7817_v6 = vld [vmem:[#allocation47_spill] sm:$0xff] }
  0x4b   :  { %v504_v35 = vadd.f32 %v503_v4, %v371_v43  ;;  %v384_v53 = vmul.f32 %v7809_v26, %v7809_v26  ;;  %v385_v62 = vmul.f32 %v4035_v38, %v4035_v38  ;;  %v480_v10 = vadd.f32 %v479_v2, %v478_v44  ;;  %v7813_v2 = vld [vmem:[#allocation43_spill] sm:$0xff] }
  0x4c   :  { %v387_v19 = vmul.f32 %v7810_v14, %v7810_v14  ;;  %v519_v31 = vadd.f32 %v382_v7, %v381_v40  ;;  %v374_v25 = vmul.f32 %v7811_v28, %v7811_v28  ;;  %v494_v16 = vadd.f32 %v493_v60, %v363_v46  ;;  %v7819_v7 = vld [vmem:[#allocation49_spill] sm:$0xff]  ;;  %v4400_v14 = vld [vmem:[%s7675_s1 + $0xb0] sm:$0xff]  ;;  %v1247_v28 = vld [vmem:[%s7675_s1 + $0x68] sm:$0xff] }
  0x4d   :  { %v505_v15 = vadd.f32 %v504_v35, %v372_v32  ;;  %v386_v43 = vmul.f32 %v4071_v55, %v4071_v55  ;;  %v375_v59 = vmul.f32 %v7812_v22, %v7812_v22  ;;  %481 = vadd.xlane.f32.xlu0 %v480_v10  ;;  %v376_v51 = vmul.f32 %v7813_v2, %v7813_v2  ;;  %v7815_v32 = vld [vmem:[#allocation45_spill] sm:$0xff]  ;;  %v1241_v35 = vld [vmem:[%s7675_s1 + $0x38] sm:$0xff]  ;;  %v4395_v10 = vld [vmem:[%s7675_s1 + $0xa8] sm:$0xff] }
  0x4e   :  { %v520_v48 = vadd.f32 %v519_v31, %v383_v27  ;;  %v524_v38 = vsel %vm150_vm0, %v387_v19, 0.0  ;;  %v377_v1 = vmul.f32 %v7814_v56, %v7814_v56  ;;  %v495_v29 = vadd.f32 %v494_v16, %v364_v39  ;;  %v4377_v27 = vld [vmem:[%s7675_s1 + $0x30] sm:$0xff]  ;;  %v1242_v60 = vld [vmem:[%s7675_s1 + $0x40] sm:$0xff] }
  0x4f   :  { %v507_v33 = vadd.f32 %v506_v61, %v505_v15  ;;  %v378_v20 = vmul.f32 %v4089_v54, %v4089_v54  ;;  %v380_v55 = vmul.f32 %v7815_v32, %v7815_v32  ;;  %v510_v37 = vadd.f32 %v375_v59, %v374_v25  ;;  %v4412_v25 = vld [vmem:[%s7675_s1 + $0x70] sm:$0xff]  ;;  %v4417_v15 = vld [vmem:[%s7675_s1 + $0x78] sm:$0xff] }
  0x50   :  { %v521_v52 = vadd.f32 %v520_v48, %v384_v53  ;;  %v395_v21 = vmul.f32 %v7816_v18, %v7816_v18  ;;  %v396_v23 = vmul.f32 %v7817_v6, %v7817_v6  ;;  %v496_v46 = vadd.f32 %v495_v29, %v365_v49  ;;  %v1244_v59 = vld [vmem:[%s7675_s1 + $0x50] sm:$0xff]  ;;  %v4446_v29 = vld [vmem:[%s7675_s1 + $0x80] sm:$0xff] }
  0x51   :  { %508 = vadd.xlane.f32.xlu1 %v507_v33  ;;  %v379_v61 = vmul.f32 %v4128_v34, %v4128_v34  ;;  %v515_v0 = vsel %vm150_vm0, %v380_v55, 0.0  ;;  %v397_v54 = vmul.f32 %v4083_v47, %v4083_v47  ;;  %v511_v30 = vadd.f32 %v510_v37, %v376_v51  ;;  %v1238_v55 = vld [vmem:[%s7675_s1 + $0x20] sm:$0xff] }
  0x52   :  { %v522_v12 = vadd.f32 %v521_v52, %v385_v62  ;;  %v398_v39 = vmul.f32 %v4094_v36, %v4094_v36  ;;  %v399_v58 = vmul.f32 %v4140_v3, %v4140_v3  ;;  %v498_v50 = vadd.f32 %v497_v42, %v496_v46  ;;  %v4357_v36 = vld [vmem:[%s7675_s1] sm:$0xff]  ;;  %v4367_v3 = vld [vmem:[%s7675_s1 + $0x10] sm:$0xff]  ;;  %v1243_v62 = vld [vmem:[%s7675_s1 + $0x48] sm:$0xff] }
  0x53   :  { %v401_v4 = vmul.f32 %v4099_v63, %v4099_v63  ;;  %v537_v45 = vadd.f32 %v396_v23, %v395_v21  ;;  %v388_v34 = vmul.f32 %v7818_v57, %v7818_v57  ;;  %v512_v41 = vadd.f32 %v511_v30, %v377_v1  ;;  %v4362_v63 = vld [vmem:[%s7675_s1 + $0x8] sm:$0xff]  ;;  %v4439_v1 = vld [vmem:[%s7675_s1 + $0xd8] sm:$0xff]  ;;  %v4460_v18 = vld [vmem:[%s7675_s1 + $0xc0] sm:$0xff] }
  0x54   :  { %v523_v40 = vadd.f32 %v522_v12, %v386_v43  ;;  %v400_v47 = vmul.f32 %v4161_v17, %v4161_v17  ;;  %v389_v44 = vmul.f32 %v7819_v7, %v7819_v7  ;;  %499 = vadd.xlane.f32.xlu0 %v498_v50  ;;  %v390_v42 = vmul.f32 %v4123_v8, %v4123_v8  ;;  %v4423_v43 = vld [vmem:[%s7675_s1 + $0x18] sm:$0xff]  ;;  %v1239_v12 = vld [vmem:[%s7675_s1 + $0x28] sm:$0xff] }
  0x55   :  { %v538_v17 = vadd.f32 %v537_v45, %v397_v54  ;;  %v542_v49 = vsel %vm150_vm0, %v401_v4, 0.0  ;;  %v391_v13 = vmul.f32 %v4147_v24, %v4147_v24  ;;  %v513_v53 = vadd.f32 %v512_v41, %v378_v20  ;;  %v4451_v20 = vld [vmem:[%s7675_s1 + $0xa0] sm:$0xff]  ;;  %v4472_v54 = vld [vmem:[%s7675_s1 + $0x88] sm:$0xff] }
  0x56   :  { %v525_v26 = vadd.f32 %v524_v38, %v523_v40  ;;  %v392_v8 = vmul.f32 %v4166_v5, %v4166_v5  ;;  %v394_v24 = vmul.f32 %v4153_v11, %v4153_v11  ;;  %v393_v5 = vmul.f32 %v4178_v9, %v4178_v9  ;;  %v4433_v38 = vld [vmem:[%s7675_s1 + $0xb8] sm:$0xff]  ;;  %v1246_v40 = vld [vmem:[%s7675_s1 + $0x60] sm:$0xff] }
  0x57   :  { %v539_v19 = vadd.f32 %v538_v17, %v398_v39  ;;  %v528_v31 = vadd.f32 %v389_v44, %v388_v34  ;;  %v1262_v11 = vadd.f32 %v4362_v63, %v4357_v36  ;;  %v514_v9 = vadd.f32 %v513_v53, %v379_v61  ;;  %v1245_v61 = vld [vmem:[%s7675_s1 + $0x58] sm:$0xff]  ;;  %v1259_v39 = vld [vmem:[%s7675_s1 + $0xc8] sm:$0xff]  ;;  %v1260_v44 = vld [vmem:[%s7675_s1 + $0xd0] sm:$0xff] }
  0x58   :  { %526 = vadd.xlane.f32.xlu1 %v525_v26  ;;  %v533_v16 = vsel %vm150_vm0, %v394_v24, 0.0  ;;  %v1267_v22 = vsel %vm150_vm0, %v4377_v27, 0.0  ;;  %v1271_v48 = vadd.f32 %v1242_v60, %v1241_v35  ;;  %v1289_v33 = vadd.f32 %v4400_v14, %v4395_v10 }
  0x59   :  { %v540_v2 = vadd.f32 %v539_v19, %v399_v58  ;;  %v529_v51 = vadd.f32 %v528_v31, %v390_v42  ;;  %v1263_v56 = vadd.f32 %v1262_v11, %v4367_v3  ;;  %v516_v32 = vadd.f32 %v515_v0, %v514_v9 }
  0x5a   :  { %v1272_v52 = vadd.f32 %v1271_v48, %v1243_v62  ;;  %v1276_v37 = vsel %vm150_vm0, %v1247_v28, 0.0  ;;  %v1280_v21 = vadd.f32 %v4417_v15, %v4412_v25  ;;  %v1290_v0 = vadd.f32 %v1289_v33, %v4433_v38 }
  0x5b   :  { %v541_v6 = vadd.f32 %v540_v2, %v400_v47  ;;  %v530_v23 = vadd.f32 %v529_v51, %v391_v13  ;;  %v1264_v46 = vadd.f32 %v1263_v56, %v4423_v43  ;;  %517 = vadd.xlane.f32.xlu0 %v516_v32  ;;  %v1294_v58 = vsel %vm150_vm0, %v4439_v1, 0.0  ;;  %v4492_v47 = vld [vmem:[%s7675_s1 + $0x90] sm:$0xff] }
  0x5c   :  { %v1273_v30 = vadd.f32 %v1272_v52, %v1244_v59  ;;  %v1281_v50 = vadd.f32 %v1280_v21, %v4446_v29  ;;  %v1285_v4 = vsel %vm150_vm0, %v4451_v20, 0.0  ;;  %v1291_v41 = vadd.f32 %v1290_v0, %v4460_v18 }
  0x5d   :  { %v543_v45 = vadd.f32 %v542_v49, %v541_v6  ;;  %v531_v57 = vadd.f32 %v530_v23, %v392_v8  ;;  %v1265_v34 = vadd.f32 %v1264_v46, %v1238_v55  ;;  %v1305_v49 = vmul.f32 %v1241_v35, %v1241_v35  ;;  %v4501_v8 = vld [vmem:[%s7675_s1 + $0x98] sm:$0xff] }
  0x5e   :  { %v1274_v7 = vadd.f32 %v1273_v30, %v1245_v61  ;;  %v1282_v17 = vadd.f32 %v1281_v50, %v4472_v54  ;;  %v1306_v42 = vmul.f32 %v1242_v60, %v1242_v60  ;;  %v1292_v53 = vadd.f32 %v1291_v41, %v1259_v39 }
  0x5f   :  { %544 = vadd.xlane.f32.xlu1 %v543_v45  ;;  %v532_v13 = vadd.f32 %v531_v57, %v393_v5  ;;  %v1266_v26 = vadd.f32 %v1265_v34, %v1239_v12  ;;  %v1307_v24 = vmul.f32 %v1243_v62, %v1243_v62  ;;  %v1308_v11 = vmul.f32 %v1244_v59, %v1244_v59 }
  0x60   :  { %v1275_v19 = vadd.f32 %v1274_v7, %v1246_v40  ;;  %v1283_v31 = vadd.f32 %v1282_v17, %v4492_v47  ;;  %v1309_v9 = vmul.f32 %v1245_v61, %v1245_v61  ;;  %v1293_v51 = vadd.f32 %v1292_v53, %v1260_v44 }
  0x61   :  { %v534_v48 = vadd.f32 %v533_v16, %v532_v13  ;;  %v1268_v2 = vadd.f32 %v1267_v22, %v1266_v26  ;;  %v1311_v35 = vmul.f32 %v1247_v28, %v1247_v28  ;;  %v1335_v56 = vadd.f32 %v1306_v42, %v1305_v49 }
  0x62   :  { %v1277_v60 = vadd.f32 %v1276_v37, %v1275_v19  ;;  %v1284_v5 = vadd.f32 %v1283_v31, %v4501_v8  ;;  %v1298_v33 = vmul.f32 %v4357_v36, %v4357_v36 }
  0x63   :  { %14 = vsyncpa [#allocation3], 0  ;;  %535 = vadd.xlane.f32.xlu0 %v534_v48  ;;  %1269 = vadd.xlane.f32.xlu1 %v1268_v2  ;;  %v1295_v62 = vadd.f32 %v1294_v58, %v1293_v51  ;;  %v1299_v32 = vmul.f32 %v4362_v63, %v4362_v63  ;;  %v1300_v16 = vmul.f32 %v4367_v3, %v4367_v3  ;;  %v1340_v52 = vsel %vm150_vm0, %v1311_v35, 0.0  ;;  %v1542_v57 = vld [vmem:[%s7676_s2 + $0x40] sm:$0xff]  ;;  %v4562_v7 = vld [vmem:[%s7676_s2 + $0x30] sm:$0xff]  ;;  %s3441_s29 = smov [#allocation2]  }
  0x64   :  { %v1286_v22 = vadd.f32 %v1285_v4, %v1284_v5  ;;  %v1310_v59 = vmul.f32 %v1246_v40, %v1246_v40  ;;  %v1336_v28 = vadd.f32 %v1335_v56, %v1307_v24  ;;  %v1301_v37 = vmul.f32 %v4423_v43, %v4423_v43  ;;  %v4572_v17 = vld [vmem:[%s7676_s2 + $0xb0] sm:$0xff]  ;;  %v4579_v13 = vld [vmem:[%s7676_s2 + $0x18] sm:$0xff]  ;;  %v1543_v53 = vld [vmem:[%s7676_s2 + $0x48] sm:$0xff] }
  0x65   :  { %v1304_v36 = vmul.f32 %v4377_v27, %v4377_v27  ;;  %v1326_v21 = vadd.f32 %v1299_v32, %v1298_v33  ;;  %v1319_v6 = vmul.f32 %v4395_v10, %v4395_v10  ;;  %v1302_v63 = vmul.f32 %v1238_v55, %v1238_v55  ;;  %v4601_v48 = vld [vmem:[%s7676_s2 + $0x78] sm:$0xff]  ;;  %v1544_v35 = vld [vmem:[%s7676_s2 + $0x50] sm:$0xff] }
  0x66   :  { %v1337_v23 = vadd.f32 %v1336_v28, %v1308_v11  ;;  %v1320_v3 = vmul.f32 %v4400_v14, %v4400_v14  ;;  %v1321_v46 = vmul.f32 %v4433_v38, %v4433_v38  ;;  %v1303_v61 = vmul.f32 %v1239_v12, %v1239_v12  ;;  %v4615_v5 = vld [vmem:[%s7676_s2 + $0xd8] sm:$0xff]  ;;  %v4631_v28 = vld [vmem:[%s7676_s2 + $0x80] sm:$0xff] }
  0x67   :  { %1278 = vadd.xlane.f32.xlu0 %v1277_v60  ;;  %1296 = vadd.xlane.f32.xlu1 %v1295_v62  ;;  %v1327_v0 = vadd.f32 %v1326_v21, %v1300_v16  ;;  %v1331_v43 = vsel %vm150_vm0, %v1304_v36, 0.0  ;;  %v1322_v27 = vmul.f32 %v4460_v18, %v4460_v18  ;;  %v1325_v10 = vmul.f32 %v4439_v1, %v4439_v1  ;;  %v4536_v18 = vld [vmem:[%s7676_s2] sm:$0xff]  ;;  %v4541_v1 = vld [vmem:[%s7676_s2 + $0x8] sm:$0xff]  ;;  %v1545_v21 = vld [vmem:[%s7676_s2 + $0x58] sm:$0xff] }
  0x68   :  { %v1338_v30 = vadd.f32 %v1337_v23, %v1309_v9  ;;  %v1353_v55 = vadd.f32 %v1320_v3, %v1319_v6  ;;  %v1312_v14 = vmul.f32 %v4412_v25, %v4412_v25  ;;  %v1323_v50 = vmul.f32 %v1259_v39, %v1259_v39  ;;  %v4596_v9 = vld [vmem:[%s7676_s2 + $0x70] sm:$0xff]  ;;  %v1547_v60 = vld [vmem:[%s7676_s2 + $0x68] sm:$0xff]  ;;  %v1538_v16 = vld [vmem:[%s7676_s2 + $0x20] sm:$0xff] }
  0x69   :  { %v1328_v58 = vadd.f32 %v1327_v0, %v1301_v37  ;;  %v1313_v38 = vmul.f32 %v4417_v15, %v4417_v15  ;;  %v1314_v12 = vmul.f32 %v4446_v29, %v4446_v29  ;;  %v1324_v25 = vmul.f32 %v1260_v44, %v1260_v44  ;;  %v4548_v15 = vld [vmem:[%s7676_s2 + $0x10] sm:$0xff]  ;;  %v1541_v29 = vld [vmem:[%s7676_s2 + $0x38] sm:$0xff]  ;;  %v4567_v44 = vld [vmem:[%s7676_s2 + $0xa8] sm:$0xff] }
  0x6a   :  { %v1339_v4 = vadd.f32 %v1338_v30, %v1310_v59  ;;  %v1354_v45 = vadd.f32 %v1353_v55, %v1321_v46  ;;  %v1315_v39 = vmul.f32 %v4472_v54, %v4472_v54  ;;  %v1358_v40 = vsel %vm150_vm0, %v1325_v10, 0.0  ;;  %v4626_v59 = vld [vmem:[%s7676_s2 + $0xc0] sm:$0xff]  ;;  %v1539_v37 = vld [vmem:[%s7676_s2 + $0x28] sm:$0xff] }
  0x6b   :  { %1287 = vadd.xlane.f32.xlu0 %v1286_v22  ;;  %v1329_v34 = vadd.f32 %v1328_v58, %v1302_v63  ;;  %v1318_v54 = vmul.f32 %v4451_v20, %v4451_v20  ;;  %v1344_v41 = vadd.f32 %v1313_v38, %v1312_v14  ;;  %v1316_v20 = vmul.f32 %v4492_v47, %v4492_v47  ;;  %v4591_v47 = vld [vmem:[%s7676_s2 + $0xb8] sm:$0xff]  ;;  %v1546_v55 = vld [vmem:[%s7676_s2 + $0x60] sm:$0xff] }
  0x6c   :  { %v1341_v49 = vadd.f32 %v1340_v52, %v1339_v4  ;;  %v1355_v42 = vadd.f32 %v1354_v45, %v1322_v27  ;;  %v1562_v26 = vadd.f32 %v4541_v1, %v4536_v18  ;;  %v1317_v19 = vmul.f32 %v4501_v8, %v4501_v8  ;;  %v4657_v27 = vld [vmem:[%s7676_s2 + $0xa0] sm:$0xff]  ;;  %v4670_v4 = vld [vmem:[%s7676_s2 + $0x90] sm:$0xff] }
  0x6d   :  { %v1330_v24 = vadd.f32 %v1329_v34, %v1303_v61  ;;  %v1345_v31 = vadd.f32 %v1344_v41, %v1314_v12  ;;  %v1571_v11 = vadd.f32 %v1542_v57, %v1541_v29  ;;  %v1567_v51 = vsel %vm150_vm0, %v4562_v7, 0.0  ;;  %v1559_v61 = vld [vmem:[%s7676_s2 + $0xc8] sm:$0xff]  ;;  %v1560_v12 = vld [vmem:[%s7676_s2 + $0xd0] sm:$0xff] }
  0x6e   :  { %1342 = vadd.xlane.f32.xlu1 %v1341_v49  ;;  %v1356_v2 = vadd.f32 %v1355_v42, %v1323_v50  ;;  %v1563_v8 = vadd.f32 %v1562_v26, %v4548_v15  ;;  %v1589_v56 = vadd.f32 %v4572_v17, %v4567_v44  ;;  %v1349_v32 = vsel %vm150_vm0, %v1318_v54, 0.0  ;;  %v4678_v42 = vld [vmem:[%s7676_s2 + $0x98] sm:$0xff] }
  0x6f   :  { %v1332_v33 = vadd.f32 %v1331_v43, %v1330_v24  ;;  %v1346_v62 = vadd.f32 %v1345_v31, %v1315_v39  ;;  %v1572_v22 = vadd.f32 %v1571_v11, %v1543_v53  ;;  %v1580_v23 = vadd.f32 %v4601_v48, %v4596_v9  ;;  %v4652_v43 = vld [vmem:[%s7676_s2 + $0x88] sm:$0xff] }
  0x70   :  { %v1357_v52 = vadd.f32 %v1356_v2, %v1324_v25  ;;  %v1564_v36 = vadd.f32 %v1563_v8, %v4579_v13  ;;  %v1590_v6 = vadd.f32 %v1589_v56, %v4591_v47  ;;  %v1576_v46 = vsel %vm150_vm0, %v1547_v60, 0.0 }
  0x71   :  { %1333 = vadd.xlane.f32.xlu0 %v1332_v33  ;;  %v1347_v63 = vadd.f32 %v1346_v62, %v1316_v20  ;;  %v1573_v3 = vadd.f32 %v1572_v22, %v1544_v35  ;;  %v1594_v0 = vsel %vm150_vm0, %v4615_v5, 0.0  ;;  %v1581_v58 = vadd.f32 %v1580_v23, %v4631_v28 }
  0x72   :  { %v1359_v30 = vadd.f32 %v1358_v40, %v1357_v52  ;;  %v1565_v10 = vadd.f32 %v1564_v36, %v1538_v16  ;;  %v1591_v14 = vadd.f32 %v1590_v6, %v4626_v59  ;;  %v1605_v25 = vmul.f32 %v1541_v29, %v1541_v29 }
  0x73   :  { %v1348_v50 = vadd.f32 %v1347_v63, %v1317_v19  ;;  %v1574_v38 = vadd.f32 %v1573_v3, %v1545_v21  ;;  %v1606_v45 = vmul.f32 %v1542_v57, %v1542_v57  ;;  %v1582_v40 = vadd.f32 %v1581_v58, %v4652_v43 }
  0x74   :  { %1360 = vadd.xlane.f32.xlu1 %v1359_v30  ;;  %v1566_v39 = vadd.f32 %v1565_v10, %v1539_v37  ;;  %v1592_v34 = vadd.f32 %v1591_v14, %v1559_v61  ;;  %v1585_v54 = vsel %vm150_vm0, %v4657_v27, 0.0  ;;  %v1607_v20 = vmul.f32 %v1543_v53, %v1543_v53  ;;  %v1841_v10 = vld [vmem:[%s7677_s3 + $0x38] sm:$0xff] }
  0x75   :  { %v1350_v41 = vadd.f32 %v1349_v32, %v1348_v50  ;;  %v1575_v49 = vadd.f32 %v1574_v38, %v1546_v55  ;;  %v1608_v26 = vmul.f32 %v1544_v35, %v1544_v35  ;;  %v1583_v57 = vadd.f32 %v1582_v40, %v4670_v4  ;;  %v4739_v38 = vld [vmem:[%s7677_s3 + $0x30] sm:$0xff] }
  0x76   :  { %v1568_v24 = vadd.f32 %v1567_v51, %v1566_v39  ;;  %v1593_v29 = vadd.f32 %v1592_v34, %v1560_v12  ;;  %v1611_v19 = vmul.f32 %v1547_v60, %v1547_v60  ;;  %v1635_v11 = vadd.f32 %v1606_v45, %v1605_v25  ;;  %v4749_v25 = vld [vmem:[%s7677_s3 + $0xb0] sm:$0xff]  ;;  %v4756_v34 = vld [vmem:[%s7677_s3 + $0x18] sm:$0xff] }
  0x77   :  { %1351 = vadd.xlane.f32.xlu0 %v1350_v41  ;;  %v1577_v31 = vadd.f32 %v1576_v46, %v1575_v49  ;;  %v1598_v2 = vmul.f32 %v4536_v18, %v4536_v18  ;;  %v1599_v8 = vmul.f32 %v4541_v1, %v4541_v1  ;;  %v1584_v33 = vadd.f32 %v1583_v57, %v4678_v42 }
  0x78   :  { %1569 = vadd.xlane.f32.xlu1 %v1568_v24  ;;  %v1595_v56 = vadd.f32 %v1594_v0, %v1593_v29  ;;  %v1609_v53 = vmul.f32 %v1545_v21, %v1545_v21  ;;  %v1600_v51 = vmul.f32 %v4548_v15, %v4548_v15  ;;  %v1610_v35 = vmul.f32 %v1546_v55, %v1546_v55  ;;  %v1842_v55 = vld [vmem:[%s7677_s3 + $0x40] sm:$0xff]  ;;  %v4773_v24 = vld [vmem:[%s7677_s3 + $0x70] sm:$0xff]  ;;  %v4778_v29 = vld [vmem:[%s7677_s3 + $0x78] sm:$0xff] }
  0x79   :  { %v1636_v62 = vadd.f32 %v1635_v11, %v1607_v20  ;;  %v1640_v60 = vsel %vm150_vm0, %v1611_v19, 0.0  ;;  %v1601_v32 = vmul.f32 %v4579_v13, %v4579_v13  ;;  %v1602_v22 = vmul.f32 %v1538_v16, %v1538_v16  ;;  %v1847_v11 = vld [vmem:[%s7677_s3 + $0x68] sm:$0xff] }
  0x7a   :  { %v1604_v18 = vmul.f32 %v4562_v7, %v4562_v7  ;;  %v1626_v1 = vadd.f32 %v1599_v8, %v1598_v2  ;;  %v1619_v52 = vmul.f32 %v4567_v44, %v4567_v44  ;;  %v1586_v36 = vadd.f32 %v1585_v54, %v1584_v33  ;;  %v1843_v54 = vld [vmem:[%s7677_s3 + $0x48] sm:$0xff]  ;;  %v4792_v2 = vld [vmem:[%s7677_s3 + $0xd8] sm:$0xff] }
  0x7b   :  { %1578 = vadd.xlane.f32.xlu0 %v1577_v31  ;;  %v1637_v21 = vadd.f32 %v1636_v62, %v1608_v26  ;;  %v1620_v15 = vmul.f32 %v4572_v17, %v4572_v17  ;;  %v1621_v6 = vmul.f32 %v4591_v47, %v4591_v47  ;;  %v1603_v23 = vmul.f32 %v1539_v37, %v1539_v37  ;;  %v1844_v31 = vld [vmem:[%s7677_s3 + $0x50] sm:$0xff]  ;;  %v4803_v62 = vld [vmem:[%s7677_s3 + $0xc0] sm:$0xff] }
  0x7c   :  { %1596 = vadd.xlane.f32.xlu1 %v1595_v56  ;;  %v1627_v13 = vadd.f32 %v1626_v1, %v1600_v51  ;;  %v1631_v16 = vsel %vm150_vm0, %v1604_v18, 0.0  ;;  %v1622_v7 = vmul.f32 %v4626_v59, %v4626_v59  ;;  %v1625_v44 = vmul.f32 %v4615_v5, %v4615_v5  ;;  %v4713_v59 = vld [vmem:[%s7677_s3] sm:$0xff]  ;;  %v4718_v5 = vld [vmem:[%s7677_s3 + $0x8] sm:$0xff]  ;;  %v1845_v1 = vld [vmem:[%s7677_s3 + $0x58] sm:$0xff] }
  0x7d   :  { %v1638_v63 = vadd.f32 %v1637_v21, %v1609_v53  ;;  %v1653_v3 = vadd.f32 %v1620_v15, %v1619_v52  ;;  %v1612_v46 = vmul.f32 %v4596_v9, %v4596_v9  ;;  %v1623_v0 = vmul.f32 %v1559_v61, %v1559_v61  ;;  %v1838_v51 = vld [vmem:[%s7677_s3 + $0x20] sm:$0xff] }
  0x7e   :  { %v1628_v17 = vadd.f32 %v1627_v13, %v1601_v32  ;;  %v1613_v47 = vmul.f32 %v4601_v48, %v4601_v48  ;;  %v1614_v37 = vmul.f32 %v4631_v28, %v4631_v28  ;;  %v1624_v30 = vmul.f32 %v1560_v12, %v1560_v12  ;;  %v4725_v28 = vld [vmem:[%s7677_s3 + $0x10] sm:$0xff]  ;;  %v4744_v12 = vld [vmem:[%s7677_s3 + $0xa8] sm:$0xff] }
  0x7f   :  { %1587 = vadd.xlane.f32.xlu0 %v1586_v36  ;;  %v1639_v9 = vadd.f32 %v1638_v63, %v1610_v35  ;;  %v1654_v61 = vadd.f32 %v1653_v3, %v1621_v6  ;;  %v1615_v48 = vmul.f32 %v4652_v43, %v4652_v43  ;;  %v1658_v58 = vsel %vm150_vm0, %v1625_v44, 0.0  ;;  %v1846_v3 = vld [vmem:[%s7677_s3 + $0x60] sm:$0xff] }
  0x80   :  { %v1629_v14 = vadd.f32 %v1628_v17, %v1602_v22  ;;  %v1618_v50 = vmul.f32 %v4657_v27, %v4657_v27  ;;  %v1644_v43 = vadd.f32 %v1613_v47, %v1612_v46  ;;  %v1616_v27 = vmul.f32 %v4670_v4, %v4670_v4  ;;  %v4768_v4 = vld [vmem:[%s7677_s3 + $0xb8] sm:$0xff]  ;;  %v1839_v22 = vld [vmem:[%s7677_s3 + $0x28] sm:$0xff] }
  0x81   :  { %v1641_v45 = vadd.f32 %v1640_v60, %v1639_v9  ;;  %v1655_v39 = vadd.f32 %v1654_v61, %v1622_v7  ;;  %v1862_v40 = vadd.f32 %v4718_v5, %v4713_v59  ;;  %v1617_v49 = vmul.f32 %v4678_v42, %v4678_v42  ;;  %v4808_v60 = vld [vmem:[%s7677_s3 + $0x80] sm:$0xff]  ;;  %v4847_v9 = vld [vmem:[%s7677_s3 + $0x90] sm:$0xff] }
  0x82   :  { %v1630_v41 = vadd.f32 %v1629_v14, %v1603_v23  ;;  %v1645_v20 = vadd.f32 %v1644_v43, %v1614_v37  ;;  %v1871_v26 = vadd.f32 %v1842_v55, %v1841_v10  ;;  %v1867_v19 = vsel %vm150_vm0, %v4739_v38, 0.0  ;;  %v1859_v23 = vld [vmem:[%s7677_s3 + $0xc8] sm:$0xff]  ;;  %v4834_v7 = vld [vmem:[%s7677_s3 + $0xa0] sm:$0xff]  ;;  %v1860_v37 = vld [vmem:[%s7677_s3 + $0xd0] sm:$0xff] }
  0x83   :  { %1642 = vadd.xlane.f32.xlu1 %v1641_v45  ;;  %v1656_v57 = vadd.f32 %v1655_v39, %v1623_v0  ;;  %v1863_v42 = vadd.f32 %v1862_v40, %v4725_v28  ;;  %v1889_v8 = vadd.f32 %v4749_v25, %v4744_v12  ;;  %v1649_v53 = vsel %vm150_vm0, %v1618_v50, 0.0  ;;  %v4855_v39 = vld [vmem:[%s7677_s3 + $0x98] sm:$0xff] }
  0x84   :  { %v1632_v56 = vadd.f32 %v1631_v16, %v1630_v41  ;;  %v1646_v33 = vadd.f32 %v1645_v20, %v1615_v48  ;;  %v1872_v35 = vadd.f32 %v1871_v26, %v1843_v54  ;;  %v1880_v36 = vadd.f32 %v4778_v29, %v4773_v24  ;;  %v4829_v16 = vld [vmem:[%s7677_s3 + $0x88] sm:$0xff] }
  0x85   :  { %v1657_v32 = vadd.f32 %v1656_v57, %v1624_v30  ;;  %v1864_v18 = vadd.f32 %v1863_v42, %v4756_v34  ;;  %v1890_v52 = vadd.f32 %v1889_v8, %v4768_v4  ;;  %v1876_v6 = vsel %vm150_vm0, %v1847_v11, 0.0 }
  0x86   :  { %1633 = vadd.xlane.f32.xlu0 %v1632_v56  ;;  %v1647_v21 = vadd.f32 %v1646_v33, %v1616_v27  ;;  %v1873_v15 = vadd.f32 %v1872_v35, %v1844_v31  ;;  %v1894_v13 = vsel %vm150_vm0, %v4792_v2, 0.0  ;;  %v1881_v17 = vadd.f32 %v1880_v36, %v4808_v60 }
  0x87   :  { %v1659_v63 = vadd.f32 %v1658_v58, %v1657_v32  ;;  %v1865_v44 = vadd.f32 %v1864_v18, %v1838_v51  ;;  %v1891_v46 = vadd.f32 %v1890_v52, %v4803_v62  ;;  %v1905_v30 = vmul.f32 %v1841_v10, %v1841_v10 }
  0x88   :  { %v1648_v0 = vadd.f32 %v1647_v21, %v1617_v49  ;;  %v1874_v47 = vadd.f32 %v1873_v15, %v1845_v1  ;;  %v1906_v61 = vmul.f32 %v1842_v55, %v1842_v55  ;;  %v1882_v58 = vadd.f32 %v1881_v17, %v4829_v16 }
  0x89   :  { %1660 = vadd.xlane.f32.xlu1 %v1659_v63  ;;  %v1866_v48 = vadd.f32 %v1865_v44, %v1839_v22  ;;  %v1892_v14 = vadd.f32 %v1891_v46, %v1859_v23  ;;  %v1885_v50 = vsel %vm150_vm0, %v4834_v7, 0.0  ;;  %v1907_v27 = vmul.f32 %v1843_v54, %v1843_v54  ;;  %v2141_v44 = vld [vmem:[%s7678_s4 + $0x38] sm:$0xff] }
  0x8a   :  { %v1650_v43 = vadd.f32 %v1649_v53, %v1648_v0  ;;  %v1875_v45 = vadd.f32 %v1874_v47, %v1846_v3  ;;  %v1908_v40 = vmul.f32 %v1844_v31, %v1844_v31  ;;  %v1883_v55 = vadd.f32 %v1882_v58, %v4847_v9  ;;  %v4916_v47 = vld [vmem:[%s7678_s4 + $0x30] sm:$0xff] }
  0x8b   :  { %v1868_v41 = vadd.f32 %v1867_v19, %v1866_v48  ;;  %v1893_v10 = vadd.f32 %v1892_v14, %v1860_v37  ;;  %v1911_v49 = vmul.f32 %v1847_v11, %v1847_v11  ;;  %v1935_v26 = vadd.f32 %v1906_v61, %v1905_v30  ;;  %v4926_v30 = vld [vmem:[%s7678_s4 + $0xb0] sm:$0xff]  ;;  %v4933_v14 = vld [vmem:[%s7678_s4 + $0x18] sm:$0xff] }
  0x8c   :  { %1651 = vadd.xlane.f32.xlu0 %v1650_v43  ;;  %v1877_v20 = vadd.f32 %v1876_v6, %v1875_v45  ;;  %v1898_v57 = vmul.f32 %v4713_v59, %v4713_v59  ;;  %v1899_v42 = vmul.f32 %v4718_v5, %v4718_v5  ;;  %v1884_v56 = vadd.f32 %v1883_v55, %v4855_v39 }
  0x8d   :  { %1869 = vadd.xlane.f32.xlu1 %v1868_v41  ;;  %v1895_v8 = vadd.f32 %v1894_v13, %v1893_v10  ;;  %v1909_v54 = vmul.f32 %v1845_v1, %v1845_v1  ;;  %v1900_v19 = vmul.f32 %v4725_v28, %v4725_v28  ;;  %v1910_v31 = vmul.f32 %v1846_v3, %v1846_v3  ;;  %v2142_v3 = vld [vmem:[%s7678_s4 + $0x40] sm:$0xff]  ;;  %v4950_v41 = vld [vmem:[%s7678_s4 + $0x70] sm:$0xff]  ;;  %v4955_v10 = vld [vmem:[%s7678_s4 + $0x78] sm:$0xff] }
  0x8e   :  { %v1936_v33 = vadd.f32 %v1935_v26, %v1907_v27  ;;  %v1940_v11 = vsel %vm150_vm0, %v1911_v49, 0.0  ;;  %v1901_v53 = vmul.f32 %v4756_v34, %v4756_v34  ;;  %v1902_v35 = vmul.f32 %v1838_v51, %v1838_v51  ;;  %v2147_v26 = vld [vmem:[%s7678_s4 + $0x68] sm:$0xff] }
  0x8f   :  { %v1904_v59 = vmul.f32 %v4739_v38, %v4739_v38  ;;  %v1926_v5 = vadd.f32 %v1899_v42, %v1898_v57  ;;  %v1919_v32 = vmul.f32 %v4744_v12, %v4744_v12  ;;  %v1886_v18 = vadd.f32 %v1885_v50, %v1884_v56  ;;  %v2143_v50 = vld [vmem:[%s7678_s4 + $0x48] sm:$0xff]  ;;  %v4969_v57 = vld [vmem:[%s7678_s4 + $0xd8] sm:$0xff] }
  0x90   :  { %1878 = vadd.xlane.f32.xlu0 %v1877_v20  ;;  %v1937_v1 = vadd.f32 %v1936_v33, %v1908_v40  ;;  %v1920_v28 = vmul.f32 %v4749_v25, %v4749_v25  ;;  %v1921_v52 = vmul.f32 %v4768_v4, %v4768_v4  ;;  %v1903_v36 = vmul.f32 %v1839_v22, %v1839_v22  ;;  %v2144_v20 = vld [vmem:[%s7678_s4 + $0x50] sm:$0xff]  ;;  %v4980_v33 = vld [vmem:[%s7678_s4 + $0xc0] sm:$0xff] }
  0x91   :  { %1896 = vadd.xlane.f32.xlu1 %v1895_v8  ;;  %v1927_v34 = vadd.f32 %v1926_v5, %v1900_v19  ;;  %v1931_v51 = vsel %vm150_vm0, %v1904_v59, 0.0  ;;  %v1922_v38 = vmul.f32 %v4803_v62, %v4803_v62  ;;  %v1925_v12 = vmul.f32 %v4792_v2, %v4792_v2  ;;  %v4890_v62 = vld [vmem:[%s7678_s4] sm:$0xff]  ;;  %v4895_v2 = vld [vmem:[%s7678_s4 + $0x8] sm:$0xff]  ;;  %v2145_v5 = vld [vmem:[%s7678_s4 + $0x58] sm:$0xff] }
  0x92   :  { %v1938_v21 = vadd.f32 %v1937_v1, %v1909_v54  ;;  %v1953_v15 = vadd.f32 %v1920_v28, %v1919_v32  ;;  %v1912_v6 = vmul.f32 %v4773_v24, %v4773_v24  ;;  %v1923_v13 = vmul.f32 %v1859_v23, %v1859_v23  ;;  %v2138_v19 = vld [vmem:[%s7678_s4 + $0x20] sm:$0xff] }
  0x93   :  { %v1928_v25 = vadd.f32 %v1927_v34, %v1901_v53  ;;  %v1913_v4 = vmul.f32 %v4778_v29, %v4778_v29  ;;  %v1914_v22 = vmul.f32 %v4808_v60, %v4808_v60  ;;  %v1924_v63 = vmul.f32 %v1860_v37, %v1860_v37  ;;  %v4902_v60 = vld [vmem:[%s7678_s4 + $0x10] sm:$0xff]  ;;  %v4921_v37 = vld [vmem:[%s7678_s4 + $0xa8] sm:$0xff] }
  0x94   :  { %1887 = vadd.xlane.f32.xlu0 %v1886_v18  ;;  %v1939_v24 = vadd.f32 %v1938_v21, %v1910_v31  ;;  %v1954_v23 = vadd.f32 %v1953_v15, %v1921_v52  ;;  %v1915_v29 = vmul.f32 %v4829_v16, %v4829_v16  ;;  %v1958_v17 = vsel %vm150_vm0, %v1925_v12, 0.0  ;;  %v2146_v15 = vld [vmem:[%s7678_s4 + $0x60] sm:$0xff] }
  0x95   :  { %v1929_v46 = vadd.f32 %v1928_v25, %v1902_v35  ;;  %v1918_v0 = vmul.f32 %v4834_v7, %v4834_v7  ;;  %v1944_v16 = vadd.f32 %v1913_v4, %v1912_v6  ;;  %v1916_v7 = vmul.f32 %v4847_v9, %v4847_v9  ;;  %v4945_v9 = vld [vmem:[%s7678_s4 + $0xb8] sm:$0xff]  ;;  %v4990_v35 = vld [vmem:[%s7678_s4 + $0x28] sm:$0xff] }
  0x96   :  { %v1941_v61 = vadd.f32 %v1940_v11, %v1939_v24  ;;  %v1955_v48 = vadd.f32 %v1954_v23, %v1922_v38  ;;  %v2162_v58 = vadd.f32 %v4895_v2, %v4890_v62  ;;  %v1917_v45 = vmul.f32 %v4855_v39, %v4855_v39  ;;  %v4985_v11 = vld [vmem:[%s7678_s4 + $0x80] sm:$0xff]  ;;  %v5030_v24 = vld [vmem:[%s7678_s4 + $0x90] sm:$0xff] }
  0x97   :  { %v1930_v43 = vadd.f32 %v1929_v46, %v1903_v36  ;;  %v1945_v27 = vadd.f32 %v1944_v16, %v1914_v22  ;;  %v2171_v40 = vadd.f32 %v2142_v3, %v2141_v44  ;;  %v2167_v49 = vsel %vm150_vm0, %v4916_v47, 0.0  ;;  %v5003_v36 = vld [vmem:[%s7678_s4 + $0xc8] sm:$0xff]  ;;  %v5015_v38 = vld [vmem:[%s7678_s4 + $0xa0] sm:$0xff]  ;;  %v5025_v22 = vld [vmem:[%s7678_s4 + $0xd0] sm:$0xff] }
  0x98   :  { %1942 = vadd.xlane.f32.xlu1 %v1941_v61  ;;  %v1956_v55 = vadd.f32 %v1955_v48, %v1923_v13  ;;  %v2163_v39 = vadd.f32 %v2162_v58, %v4902_v60  ;;  %v2189_v42 = vadd.f32 %v4926_v30, %v4921_v37  ;;  %v1949_v54 = vsel %vm150_vm0, %v1918_v0, 0.0  ;;  %v5040_v48 = vld [vmem:[%s7678_s4 + $0x98] sm:$0xff] }
  0x99   :  { %v1932_v8 = vadd.f32 %v1931_v51, %v1930_v43  ;;  %v1946_v56 = vadd.f32 %v1945_v27, %v1915_v29  ;;  %v2172_v31 = vadd.f32 %v2171_v40, %v2143_v50  ;;  %v2180_v18 = vadd.f32 %v4955_v10, %v4950_v41  ;;  %v5010_v51 = vld [vmem:[%s7678_s4 + $0x88] sm:$0xff] }
  0x9a   :  { %v1957_v53 = vadd.f32 %v1956_v55, %v1924_v63  ;;  %v2164_v59 = vadd.f32 %v2163_v39, %v4933_v14  ;;  %v2190_v32 = vadd.f32 %v2189_v42, %v4945_v9  ;;  %v2176_v52 = vsel %vm150_vm0, %v2147_v26, 0.0 }
  0x9b   :  { %1933 = vadd.xlane.f32.xlu0 %v1932_v8  ;;  %v1947_v1 = vadd.f32 %v1946_v56, %v1916_v7  ;;  %v2173_v28 = vadd.f32 %v2172_v31, %v2144_v20  ;;  %v2194_v34 = vsel %vm150_vm0, %v4969_v57, 0.0  ;;  %v2181_v25 = vadd.f32 %v2180_v18, %v4985_v11 }
  0x9c   :  { %v1959_v21 = vadd.f32 %v1958_v17, %v1957_v53  ;;  %v2165_v12 = vadd.f32 %v2164_v59, %v2138_v19  ;;  %v2191_v6 = vadd.f32 %v2190_v32, %v4980_v33  ;;  %v2205_v63 = vmul.f32 %v2141_v44, %v2141_v44 }
  0x9d   :  { %v1948_v13 = vadd.f32 %v1947_v1, %v1917_v45  ;;  %v2174_v4 = vadd.f32 %v2173_v28, %v2145_v5  ;;  %v2206_v23 = vmul.f32 %v2142_v3, %v2142_v3  ;;  %v2182_v17 = vadd.f32 %v2181_v25, %v5010_v51  ;;  %v5042_v3 = vpop.xlane.xlu1 %171 }
  0x9e   :  { %1960 = vadd.xlane.f32.xlu1 %v1959_v21  ;;  %v2166_v29 = vadd.f32 %v2165_v12, %v4990_v35  ;;  %v2192_v46 = vadd.f32 %v2191_v6, %v5003_v36  ;;  %v2185_v0 = vsel %vm150_vm0, %v5015_v38, 0.0  ;;  %v2207_v7 = vmul.f32 %v2143_v50, %v2143_v50  ;;  %v5050_v8 = vpop.xlane.xlu0 %153  ;;  %v5088_v6 = vld [vmem:[%s7679_s5 + $0x38] sm:$0xff] }
  0x9f   :  { %v1950_v16 = vadd.f32 %v1949_v54, %v1948_v13  ;;  %v2175_v61 = vadd.f32 %v2174_v4, %v2146_v15  ;;  %v2208_v44 = vmul.f32 %v2144_v20, %v2144_v20  ;;  %v2183_v45 = vadd.f32 %v2182_v17, %v5030_v24  ;;  %v5104_v13 = vld [vmem:[%s7679_s5 + $0x48] sm:$0xff]  ;;  %v5109_v4 = vld [vmem:[%s7679_s5] sm:$0xff] }
  0xa0   :  { %v2168_v58 = vadd.f32 %v2167_v49, %v2166_v29  ;;  %v2193_v43 = vadd.f32 %v2192_v46, %v5025_v22  ;;  %v2211_v27 = vmul.f32 %v2147_v26, %v2147_v26  ;;  %v2235_v55 = vadd.f32 %v2206_v23, %v2205_v63  ;;  %v5114_v63 = vld [vmem:[%s7679_s5 + $0x8] sm:$0xff]  ;;  %v5127_v17 = vld [vmem:[%s7680_s6] sm:$0xff] }
  0xa1   :  { %1951 = vadd.xlane.f32.xlu0 %v1950_v16  ;;  %v2177_v40 = vadd.f32 %v2176_v52, %v2175_v61  ;;  %v2198_v39 = vmul.f32 %v4890_v62, %v4890_v62  ;;  %v2199_v42 = vmul.f32 %v4895_v2, %v4895_v2  ;;  %v2184_v49 = vadd.f32 %v2183_v45, %v5040_v48  ;;  %v5062_v18 = vpop.xlane.xlu1 %180  ;;  %v5122_v46 = vld [vmem:[%s7679_s5 + $0x68] sm:$0xff] }
  0xa2   :  { %2169 = vadd.xlane.f32.xlu1 %v2168_v58  ;;  %v2195_v50 = vadd.f32 %v2194_v34, %v2193_v43  ;;  %v2209_v20 = vmul.f32 %v2145_v5, %v2145_v5  ;;  %v2200_v56 = vmul.f32 %v4902_v60, %v4902_v60  ;;  %v2210_v26 = vmul.f32 %v2146_v15, %v2146_v15  ;;  %v5073_v52 = vpop.xlane.xlu0 %162  ;;  %v5146_v58 = vld [vmem:[%s7679_s5 + $0x10] sm:$0xff]  ;;  %v5151_v43 = vld [vmem:[%s7679_s5 + $0x18] sm:$0xff] }
  0xa3   :  { %v2236_v54 = vadd.f32 %v2235_v55, %v2207_v7  ;;  %v2240_v31 = vsel %vm150_vm0, %v2211_v27, 0.0  ;;  %v2201_v62 = vmul.f32 %v4933_v14, %v4933_v14  ;;  %v2202_v53 = vmul.f32 %v2138_v19, %v2138_v19  ;;  %v5139_v7 = vld [vmem:[%s7679_s5 + $0x50] sm:$0xff]  ;;  %v5160_v55 = vld [vmem:[%s7679_s5 + $0x58] sm:$0xff] }
  0xa4   :  { %v2204_v2 = vmul.f32 %v4916_v47, %v4916_v47  ;;  %v2226_v59 = vadd.f32 %v2199_v42, %v2198_v39  ;;  %v2219_v32 = vmul.f32 %v4921_v37, %v4921_v37  ;;  %v2186_v5 = vadd.f32 %v2185_v0, %v2184_v49  ;;  %v5132_v0 = vld [vmem:[%s7680_s6 + $0x8] sm:$0xff]  ;;  %v5167_v42 = vld [vmem:[%s7680_s6 + $0x10] sm:$0xff] }
  0xa5   :  { %2178 = vadd.xlane.f32.xlu0 %v2177_v40  ;;  %v2237_v60 = vadd.f32 %v2236_v54, %v2208_v44  ;;  %v2220_v1 = vmul.f32 %v4926_v30, %v4926_v30  ;;  %v2221_v28 = vmul.f32 %v4945_v9, %v4945_v9  ;;  %v2203_v14 = vmul.f32 %v4990_v35, %v4990_v35 }
  0xa6   :  { %2196 = vadd.xlane.f32.xlu1 %v2195_v50  ;;  %v2227_v47 = vadd.f32 %v2226_v59, %v2200_v56  ;;  %v2231_v19 = vsel %vm150_vm0, %v2204_v2, 0.0  ;;  %v2222_v37 = vmul.f32 %v4980_v33, %v4980_v33  ;;  %v2225_v21 = vmul.f32 %v4969_v57, %v4969_v57  ;;  %v5093_v57 = vld [vmem:[%s7679_s5 + $0x40] sm:$0xff]  ;;  %v5172_v50 = vld [vmem:[%s7679_s5 + $0x70] sm:$0xff] }
  0xa7   :  { %v2238_v34 = vadd.f32 %v2237_v60, %v2209_v20  ;;  %v2253_v30 = vadd.f32 %v2220_v1, %v2219_v32  ;;  %v2212_v9 = vmul.f32 %v4950_v41, %v4950_v41  ;;  %v2223_v35 = vmul.f32 %v5003_v36, %v5003_v36  ;;  %v5095_v41 = vpop.xlane.xlu1 %198  ;;  %v5153_v45 = vpop.xlane.xlu0 %189  ;;  %v5210_v60 = vld [vmem:[%s7679_s5 + $0x20] sm:$0xff] }
  0xa8   :  { %v2228_v12 = vadd.f32 %v2227_v47, %v2201_v62  ;;  %v2213_v15 = vmul.f32 %v4955_v10, %v4955_v10  ;;  %v2214_v33 = vmul.f32 %v4985_v11, %v4985_v11  ;;  %7820 = vst [vmem:[#allocation5_spill] sm:$0xff] %v5095_v41  ;;  %v2224_v10 = vmul.f32 %v5025_v22, %v5025_v22  ;;  %v5197_v62 = vld [vmem:[%s7680_s6 + $0x78] sm:$0xff] }
  0xa9   :  { %2187 = vadd.xlane.f32.xlu0 %v2186_v5  ;;  %v2239_v36 = vadd.f32 %v2238_v34, %v2210_v26  ;;  %v2254_v25 = vadd.f32 %v2253_v30, %v2221_v28  ;;  %v2215_v11 = vmul.f32 %v5010_v51, %v5010_v51  ;;  %v2258_v23 = vsel %vm150_vm0, %v2225_v21, 0.0  ;;  %7821 = vst [vmem:[#allocation6_spill] sm:$0xff] %v5153_v45  ;;  %v5185_v26 = vld [vmem:[%s7679_s5 + $0x30] sm:$0xff]  ;;  %v5205_v5 = vld [vmem:[%s7679_s5 + $0x60] sm:$0xff]  ;;  %v5216_v28 = vld [vmem:[%s7680_s6 + $0x18] sm:$0xff] }
  0xaa   :  { %v2229_v22 = vadd.f32 %v2228_v12, %v2202_v53  ;;  %v2218_v51 = vmul.f32 %v5015_v38, %v5015_v38  ;;  %v2244_v29 = vadd.f32 %v2213_v15, %v2212_v9  ;;  %v2216_v38 = vmul.f32 %v5030_v24, %v5030_v24  ;;  %v5232_v34 = vld [vmem:[%s7680_s6 + $0x30] sm:$0xff]  ;;  %v5240_v9 = vld [vmem:[%s7680_s6 + $0x80] sm:$0xff]  ;;  %v5475_v45 = vld [vmem:[%s7680_s6 + $0xc8] sm:$0xff] }
  0xab   :  { %v2241_v16 = vadd.f32 %v2240_v31, %v2239_v36  ;;  %v2255_v61 = vadd.f32 %v2254_v25, %v2222_v37  ;;  %v2471_v44 = vadd.f32 %v5093_v57, %v5088_v6  ;;  %v2217_v27 = vmul.f32 %v5040_v48, %v5040_v48  ;;  %v5177_v48 = vld [vmem:[%s7679_s5 + $0x78] sm:$0xff]  ;;  %v5192_v31 = vld [vmem:[%s7680_s6 + $0x70] sm:$0xff]  ;;  %v5199_v53 = vpop.xlane.xlu1 %216  ;;  %v5227_v37 = vld [vmem:[%s7680_s6 + $0x20] sm:$0xff] }
  0xac   :  { %v2230_v24 = vadd.f32 %v2229_v22, %v2203_v14  ;;  %v2245_v40 = vadd.f32 %v2244_v29, %v2214_v33  ;;  %v2462_v39 = vadd.f32 %v5114_v63, %v5109_v4  ;;  %v2476_v56 = vsel %vm150_vm0, %v5122_v46, 0.0  ;;  %7822 = vst [vmem:[#allocation7_spill] sm:$0xff] %v5199_v53  ;;  %v5221_v14 = vld [vmem:[%s7679_s5 + $0x80] sm:$0xff]  ;;  %v5242_v12 = vpop.xlane.xlu0 %207  ;;  %v5250_v36 = vld [vmem:[%s7679_s5 + $0x88] sm:$0xff] }
  0xad   :  { %2242 = vadd.xlane.f32.xlu1 %v2241_v16  ;;  %v2256_v49 = vadd.f32 %v2255_v61, %v2223_v35  ;;  %v2472_v20 = vadd.f32 %v2471_v44, %v5104_v13  ;;  %v2762_v54 = vadd.f32 %v5132_v0, %v5127_v17  ;;  %v2249_v32 = vsel %vm150_vm0, %v2218_v51, 0.0  ;;  %7823 = vst [vmem:[#allocation8_spill] sm:$0xff] %v5242_v12  ;;  %v5257_v25 = vld [vmem:[%s7679_s5 + $0xa8] sm:$0xff]  ;;  %v5274_v61 = vld [vmem:[%s7679_s5 + $0xa0] sm:$0xff] }
  0xae   :  { %v2232_v2 = vadd.f32 %v2231_v19, %v2230_v24  ;;  %v2246_v59 = vadd.f32 %v2245_v40, %v2215_v11  ;;  %v2463_v1 = vadd.f32 %v2462_v39, %v5146_v58  ;;  %v2480_v30 = vadd.f32 %v5177_v48, %v5172_v50  ;;  %v5262_v11 = vld [vmem:[%s7679_s5 + $0xb0] sm:$0xff]  ;;  %v5268_v29 = vld [vmem:[%s7679_s5 + $0x28] sm:$0xff] }
  0xaf   :  { %v2257_v47 = vadd.f32 %v2256_v49, %v2224_v10  ;;  %v2473_v19 = vadd.f32 %v2472_v20, %v5139_v7  ;;  %v2763_v21 = vadd.f32 %v2762_v54, %v5167_v42  ;;  %v2467_v33 = vsel %vm150_vm0, %v5185_v26, 0.0  ;;  %v5286_v40 = vld [vmem:[%s7680_s6 + $0x28] sm:$0xff]  ;;  %v5293_v49 = vld [vmem:[%s7679_s5 + $0x90] sm:$0xff]  ;;  %v5301_v54 = vpop.xlane.xlu1 %234 }
  0xb0   :  { %2233 = vadd.xlane.f32.xlu0 %v2232_v2  ;;  %v2247_v35 = vadd.f32 %v2246_v59, %v2216_v38  ;;  %v2464_v15 = vadd.f32 %v2463_v1, %v5151_v43  ;;  %v2780_v10 = vadd.f32 %v5197_v62, %v5192_v31  ;;  %v2481_v38 = vadd.f32 %v2480_v30, %v5221_v14 }
  0xb1   :  { %v2259_v22 = vadd.f32 %v2258_v23, %v2257_v47  ;;  %v2474_v51 = vadd.f32 %v2473_v19, %v5160_v55  ;;  %v2764_v16 = vadd.f32 %v2763_v21, %v5216_v28  ;;  %v5280_v23 = vld [vmem:[%s7680_s6 + $0x88] sm:$0xff]  ;;  %v2767_v39 = vsel %vm150_vm0, %v5232_v34, 0.0  ;;  %7824 = vst [vmem:[#allocation9_spill] sm:$0xff] %v5301_v54  ;;  %v5309_v47 = vld [vmem:[%s7680_s6 + $0x90] sm:$0xff] }
  0xb2   :  { %v2248_v44 = vadd.f32 %v2247_v35, %v2217_v27  ;;  %v2465_v24 = vadd.f32 %v2464_v15, %v5210_v60  ;;  %v2781_v20 = vadd.f32 %v2780_v10, %v5240_v9  ;;  %v5299_v27 = vld [vmem:[%s7679_s5 + $0xb8] sm:$0xff]  ;;  %v2482_v1 = vadd.f32 %v2481_v38, %v5250_v36 }
  0xb3   :  { %2260 = vadd.xlane.f32.xlu1 %v2259_v22  ;;  %v2475_v2 = vadd.f32 %v2474_v51, %v5205_v5  ;;  %v2765_v59 = vadd.f32 %v2764_v16, %v5227_v37  ;;  %v2489_v19 = vadd.f32 %v5262_v11, %v5257_v25  ;;  %v5317_v35 = vld [vmem:[%s7679_s5 + $0x98] sm:$0xff]  ;;  %v2485_v15 = vsel %vm150_vm0, %v5274_v61, 0.0  ;;  %v5325_v22 = vld [vmem:[%s7679_s5 + $0xc0] sm:$0xff]  ;;  %v5327_v51 = vpop.xlane.xlu0 %225 }
  0xb4   :  { %v2250_v21 = vadd.f32 %v2249_v32, %v2248_v44  ;;  %v2466_v30 = vadd.f32 %v2465_v24, %v5268_v29  ;;  %v2782_v10 = vadd.f32 %v2781_v20, %v5280_v23  ;;  %7825 = vst [vmem:[#allocation10_spill] sm:$0xff] %v5327_v51  ;;  %v2483_v38 = vadd.f32 %v2482_v1, %v5293_v49  ;;  %v5334_v44 = vld [vmem:[%s7680_s6 + $0x98] sm:$0xff]  ;;  %v5339_v24 = vld [vmem:[%s7680_s6 + $0xa0] sm:$0xff]  ;;  %v5352_v51 = vpop.xlane.xlu1 %252 }
  0xb5   :  { %v2477_v32 = vadd.f32 %v2476_v56, %v2475_v2  ;;  %v2766_v16 = vadd.f32 %v2765_v59, %v5286_v40  ;;  %v2490_v20 = vadd.f32 %v2489_v19, %v5299_v27  ;;  %v5346_v2 = vld [vmem:[%s7679_s5 + $0xc8] sm:$0xff]  ;;  %v2498_v59 = vmul.f32 %v5109_v4, %v5109_v4  ;;  %7826 = vst [vmem:[#allocation11_spill] sm:$0xff] %v5352_v51  ;;  %v5366_v4 = vld [vmem:[%s7680_s6 + $0x38] sm:$0xff] }
  0xb6   :  { %2251 = vadd.xlane.f32.xlu0 %v2250_v21  ;;  %v2468_v54 = vadd.f32 %v2467_v33, %v2466_v30  ;;  %v2783_v56 = vadd.f32 %v2782_v10, %v5309_v47  ;;  %v2499_v1 = vmul.f32 %v5114_v63, %v5114_v63  ;;  %v2484_v19 = vadd.f32 %v2483_v38, %v5317_v35  ;;  %v5358_v33 = vld [vmem:[%s7679_s5 + $0xd8] sm:$0xff]  ;;  %v5371_v63 = vld [vmem:[%s7680_s6 + $0x40] sm:$0xff] }
  0xb7   :  { %2478 = vadd.xlane.f32.xlu1 %v2477_v32  ;;  %v2768_v12 = vadd.f32 %v2767_v39, %v2766_v16  ;;  %v2491_v21 = vadd.f32 %v2490_v20, %v5325_v22  ;;  %v2500_v30 = vmul.f32 %v5146_v58, %v5146_v58  ;;  %v2785_v10 = vsel %vm150_vm0, %v5339_v24, 0.0  ;;  %v5379_v32 = vld [vmem:[%s7679_s5 + $0xd0] sm:$0xff]  ;;  %v5387_v20 = vld [vmem:[%s7680_s6 + $0x48] sm:$0xff] }
  0xb8   :  { %v2784_v39 = vadd.f32 %v2783_v56, %v5334_v44  ;;  %v2501_v16 = vmul.f32 %v5151_v43, %v5151_v43  ;;  %v2526_v38 = vadd.f32 %v2499_v1, %v2498_v59  ;;  %v5389_v56 = vpop.xlane.xlu0 %243  ;;  %v2486_v51 = vadd.f32 %v2485_v15, %v2484_v19 }
  0xb9   :  { %v2492_v58 = vadd.f32 %v2491_v21, %v5346_v2  ;;  %7827 = vst [vmem:[#allocation12_spill] sm:$0xff] %v5389_v56  ;;  %v2494_v53 = vsel %vm150_vm0, %v5358_v33, 0.0  ;;  %v2771_v41 = vadd.f32 %v5371_v63, %v5366_v4  ;;  %v2502_v59 = vmul.f32 %v5210_v60, %v5210_v60  ;;  %v5401_v56 = vld [vmem:[%s7680_s6 + $0x50] sm:$0xff]  ;;  %v5415_v60 = vld [vmem:[%s7680_s6 + $0xa8] sm:$0xff] }
  0xba   :  { %2469 = vadd.xlane.f32.xlu0 %v2468_v54  ;;  %v2786_v21 = vadd.f32 %v2785_v10, %v2784_v39  ;;  %v2527_v1 = vadd.f32 %v2526_v38, %v2500_v30  ;;  %v5403_v54 = vpop.xlane.xlu1 %270  ;;  %v2504_v15 = vmul.f32 %v5185_v26, %v5185_v26  ;;  %v2513_v39 = vmul.f32 %v5177_v48, %v5177_v48  ;;  %v5420_v30 = vld [vmem:[%s7680_s6 + $0xb0] sm:$0xff]  ;;  %v5432_v48 = vld [vmem:[%s7680_s6 + $0x68] sm:$0xff] }
  0xbb   :  { %2769 = vadd.xlane.f32.xlu1 %v2768_v12  ;;  %v2493_v43 = vadd.f32 %v2492_v58, %v5379_v32  ;;  %7828 = vst [vmem:[#allocation13_spill] sm:$0xff] %v5403_v54  ;;  %v2772_v19 = vadd.f32 %v2771_v41, %v5387_v20  ;;  %v2512_v12 = vmul.f32 %v5172_v50, %v5172_v50  ;;  %v5427_v50 = vld [vmem:[%s7680_s6 + $0x58] sm:$0xff]  ;;  %v5447_v54 = vld [vmem:[%s7680_s6 + $0x60] sm:$0xff] }
  0xbc   :  { %v2503_v26 = vmul.f32 %v5268_v29, %v5268_v29  ;;  %v2528_v41 = vadd.f32 %v2527_v1, %v2501_v16  ;;  %v2514_v10 = vmul.f32 %v5221_v14, %v5221_v14  ;;  %v5442_v16 = vld [vmem:[%s7680_s6 + $0xb8] sm:$0xff]  ;;  %7830 = vst [vmem:[#allocation14_spill] sm:$0xff] %v5447_v54  ;;  %v2515_v14 = vmul.f32 %v5250_v36, %v5250_v36 }
  0xbd   :  { %v5436_v58 = vpop.xlane.xlu0 %261  ;;  %v2495_v38 = vadd.f32 %v2494_v53, %v2493_v43  ;;  %v2773_v29 = vadd.f32 %v2772_v19, %v5401_v56  ;;  %v2789_v53 = vadd.f32 %v5420_v30, %v5415_v60  ;;  %v5462_v19 = vld [vmem:[%s7680_s6 + $0xc0] sm:$0xff] }
  0xbe   :  { %7829 = vst [vmem:[#allocation18_spill] sm:$0xff] %v5436_v58  ;;  %2487 = vadd.xlane.f32.xlu0 %v2486_v51  ;;  %v2529_v1 = vadd.f32 %v2528_v41, %v2502_v59  ;;  %v2544_v58 = vadd.f32 %v2513_v39, %v2512_v12  ;;  %v2531_v51 = vsel %vm150_vm0, %v2504_v15, 0.0  ;;  %v2516_v59 = vmul.f32 %v5293_v49, %v5293_v49 }
  0xbf   :  { %2787 = vadd.xlane.f32.xlu1 %v2786_v21  ;;  %v2774_v43 = vadd.f32 %v2773_v29, %v5427_v50  ;;  %v2776_v21 = vsel %vm150_vm0, %v5432_v48, 0.0  ;;  %v2518_v39 = vmul.f32 %v5274_v61, %v5274_v61  ;;  %v2790_v41 = vadd.f32 %v2789_v53, %v5442_v16 }
  0xc0   :  { %v2530_v12 = vadd.f32 %v2529_v1, %v2503_v26  ;;  %v2545_v15 = vadd.f32 %v2544_v58, %v2514_v10  ;;  %v2517_v49 = vmul.f32 %v5317_v35, %v5317_v35  ;;  %v5480_v26 = vld [vmem:[%s7680_s6 + $0xd8] sm:$0xff]  ;;  %v2798_v61 = vmul.f32 %v5127_v17, %v5127_v17 }
  0xc1   :  { %v5464_v36 = vpop.xlane.xlu1 %288  ;;  %v2775_v29 = vadd.f32 %v2774_v43, %v5447_v54  ;;  %v2791_v1 = vadd.f32 %v2790_v41, %v5462_v19  ;;  %v2799_v35 = vmul.f32 %v5132_v0, %v5132_v0  ;;  %v5492_v43 = vld [vmem:[%s7680_s6 + $0xd0] sm:$0xff]  ;;  %v2794_v0 = vsel %vm150_vm0, %v5480_v26, 0.0 }
  0xc2   :  { %7831 = vst [vmem:[#allocation15_spill] sm:$0xff] %v5464_v36  ;;  %2496 = vadd.xlane.f32.xlu0 %v2495_v38  ;;  %v2532_v58 = vadd.f32 %v2531_v51, %v2530_v12  ;;  %v2546_v38 = vadd.f32 %v2545_v15, %v2515_v14  ;;  %v2800_v36 = vmul.f32 %v5167_v42, %v5167_v42  ;;  %v2549_v14 = vsel %vm150_vm0, %v2518_v39, 0.0 }
  0xc3   :  { %v5484_v10 = vpop.xlane.xlu0 %279  ;;  %v2777_v53 = vadd.f32 %v2776_v21, %v2775_v29  ;;  %v2792_v51 = vadd.f32 %v2791_v1, %v5475_v45  ;;  %v2801_v21 = vmul.f32 %v5216_v28, %v5216_v28  ;;  %v2826_v12 = vadd.f32 %v2799_v35, %v2798_v61 }
  0xc4   :  { %2533 = vadd.xlane.f32.xlu1 %v2532_v58  ;;  %v2547_v17 = vadd.f32 %v2546_v38, %v2516_v59  ;;  %v2505_v15 = vmul.f32 %v5088_v6, %v5088_v6  ;;  %v2506_v42 = vmul.f32 %v5093_v57, %v5093_v57  ;;  %v2507_v29 = vmul.f32 %v5104_v13, %v5104_v13 }
  0xc5   :  { %v5496_v54 = vpop.xlane.xlu1 %418  ;;  %v2793_v39 = vadd.f32 %v2792_v51, %v5492_v43  ;;  %v2802_v58 = vmul.f32 %v5227_v37, %v5227_v37  ;;  %v2804_v28 = vmul.f32 %v5232_v34, %v5232_v34  ;;  %v2827_v61 = vadd.f32 %v2826_v12, %v2800_v36 }
  0xc6   :  { %2778 = vadd.xlane.f32.xlu0 %v2777_v53  ;;  %v2548_v59 = vadd.f32 %v2547_v17, %v2517_v49  ;;  %v2508_v57 = vmul.f32 %v5139_v7, %v5139_v7  ;;  %v2535_v49 = vadd.f32 %v2506_v42, %v2505_v15  ;;  %v2803_v35 = vmul.f32 %v5286_v40, %v5286_v40 }
  0xc7   :  { %v5508_v41 = vpop.xlane.xlu0 %409  ;;  %v2795_v1 = vadd.f32 %v2794_v0, %v2793_v39  ;;  %v2828_v53 = vadd.f32 %v2827_v61, %v2801_v21  ;;  %v2509_v13 = vmul.f32 %v5160_v55, %v5160_v55  ;;  %v2812_v37 = vmul.f32 %v5192_v31, %v5192_v31 }
  0xc8   :  { %v2550_v6 = vadd.f32 %v2549_v14, %v2548_v59  ;;  %v2511_v34 = vmul.f32 %v5122_v46, %v5122_v46  ;;  %v2536_v36 = vadd.f32 %v2535_v49, %v2507_v29  ;;  %v2813_v7 = vmul.f32 %v5197_v62, %v5197_v62 }
  0xc9   :  { %v5517_v38 = vpop.xlane.xlu1 %436  ;;  %v2829_v17 = vadd.f32 %v2828_v53, %v2802_v58  ;;  %v2814_v40 = vmul.f32 %v5240_v9, %v5240_v9  ;;  %v2831_v55 = vsel %vm150_vm0, %v2804_v28, 0.0  ;;  %v2510_v31 = vmul.f32 %v5205_v5, %v5205_v5 }
  0xca   :  { %2551 = vadd.xlane.f32.xlu1 %v2550_v6  ;;  %2796 = vadd.xlane.f32.xlu0 %v2795_v1  ;;  %v2537_v51 = vadd.f32 %v2536_v36, %v2508_v57  ;;  %v2815_v0 = vmul.f32 %v5280_v23, %v5280_v23  ;;  %v2844_v21 = vadd.f32 %v2813_v7, %v2812_v37  ;;  %v2540_v42 = vsel %vm150_vm0, %v2511_v34, 0.0 }
  0xcb   :  { %v5533_v14 = vpop.xlane.xlu0 %427  ;;  %v2830_v46 = vadd.f32 %v2829_v17, %v2803_v35  ;;  %v2519_v62 = vmul.f32 %v5257_v25, %v5257_v25  ;;  %v2520_v12 = vmul.f32 %v5262_v11, %v5262_v11  ;;  %v2521_v5 = vmul.f32 %v5299_v27, %v5299_v27 }
  0xcc   :  { %v2538_v15 = vadd.f32 %v2537_v51, %v2509_v13  ;;  %v2816_v23 = vmul.f32 %v5309_v47, %v5309_v47  ;;  %v2818_v39 = vmul.f32 %v5339_v24, %v5339_v24  ;;  %v2845_v29 = vadd.f32 %v2844_v21, %v2814_v40 }
  0xcd   :  { %v5544_v9 = vpop.xlane.xlu1 %454  ;;  %v2832_v59 = vadd.f32 %v2831_v55, %v2830_v46  ;;  %v2522_v11 = vmul.f32 %v5325_v22, %v5325_v22  ;;  %v2553_v58 = vadd.f32 %v2520_v12, %v2519_v62  ;;  %v2817_v28 = vmul.f32 %v5334_v44, %v5334_v44  ;;  %v7833_v12 = vld [vmem:[#allocation6_spill] sm:$0xff] }
  0xce   :  { %v2539_v25 = vadd.f32 %v2538_v15, %v2510_v31  ;;  %v2846_v61 = vadd.f32 %v2845_v29, %v2815_v0  ;;  %v2805_v27 = vmul.f32 %v5366_v4, %v5366_v4  ;;  %v2806_v47 = vmul.f32 %v5371_v63, %v5371_v63 }
  0xcf   :  { %2833 = vadd.xlane.f32.xlu1 %v2832_v59  ;;  %v5561_v6 = vpop.xlane.xlu0 %445  ;;  %v2523_v1 = vmul.f32 %v5346_v2, %v5346_v2  ;;  %v2554_v57 = vadd.f32 %v2553_v58, %v2521_v5  ;;  %v2807_v22 = vmul.f32 %v5387_v20, %v5387_v20  ;;  %v5568_v49 = vmul.f32 0.0012755102, %v5042_v3 }
  0xd0   :  { %v2541_v24 = vadd.f32 %v2540_v42, %v2539_v25  ;;  %v2847_v44 = vadd.f32 %v2846_v61, %v2816_v23  ;;  %v2849_v35 = vsel %vm150_vm0, %v2818_v39, 0.0  ;;  %v2525_v4 = vmul.f32 %v5358_v33, %v5358_v33  ;;  %v7834_v25 = vld [vmem:[#allocation5_spill] sm:$0xff] }
  0xd1   :  { %v5573_v63 = vpop.xlane.xlu1 %472  ;;  %v2524_v53 = vmul.f32 %v5379_v32, %v5379_v32  ;;  %v2555_v2 = vadd.f32 %v2554_v57, %v2522_v11  ;;  %v2808_v13 = vmul.f32 %v5401_v56, %v5401_v56  ;;  %v2835_v20 = vadd.f32 %v2806_v47, %v2805_v27  ;;  %v7835_v27 = vld [vmem:[#allocation7_spill] sm:$0xff] }
  0xd2   :  { %2542 = vadd.xlane.f32.xlu0 %v2541_v24  ;;  %v5580_v3 = vmul.f32 0.0012755102, %v5050_v8  ;;  %v5583_v37 = vmul.f32 0.0012755102, %v5062_v18  ;;  %v2848_v34 = vadd.f32 %v2847_v44, %v2817_v28  ;;  %v2819_v33 = vmul.f32 %v5415_v60, %v5415_v60 }
  0xd3   :  { %v2556_v36 = vadd.f32 %v2555_v2, %v2523_v1  ;;  %v2809_v7 = vmul.f32 %v5427_v50, %v5427_v50  ;;  %v2836_v32 = vadd.f32 %v2835_v20, %v2807_v22  ;;  %v2820_v17 = vmul.f32 %v5420_v30, %v5420_v30  ;;  %v5596_v55 = vpop.xlane.xlu0 %463  ;;  %v7832_v50 = vld [vmem:[#allocation14_spill] sm:$0xff] }
  0xd4   :  { %v2850_v56 = vadd.f32 %v2849_v35, %v2848_v34  ;;  %v2558_v40 = vsel %vm150_vm0, %v2525_v4, 0.0  ;;  %v2811_v8 = vmul.f32 %v5432_v48, %v5432_v48  ;;  %v2821_v18 = vmul.f32 %v5442_v16, %v5442_v16 }
  0xd5   :  { %v5599_v60 = vmul.f32 0.0012755102, %v5073_v52  ;;  %v2557_v31 = vadd.f32 %v2556_v36, %v2524_v53  ;;  %v2810_v51 = vmul.f32 %v7832_v50, %v7832_v50  ;;  %v2837_v0 = vadd.f32 %v2836_v32, %v2808_v13  ;;  %v7836_v13 = vld [vmem:[#allocation8_spill] sm:$0xff] }
  0xd6   :  { %2851 = vadd.xlane.f32.xlu1 %v2850_v56  ;;  %v2822_v30 = vmul.f32 %v5462_v19, %v5462_v19  ;;  %v2853_v46 = vadd.f32 %v2820_v17, %v2819_v33  ;;  %v580_v48 = vmul.f32 %v5568_v49, %v5568_v49  ;;  %v578_v16 = vmul.f32 %v5580_v3, %v5580_v3  ;;  %v7837_v33 = vld [vmem:[#allocation9_spill] sm:$0xff] }
  0xd7   :  { %v491_v21 = vpop.xlane.xlu1 %490  ;;  %v2559_v62 = vadd.f32 %v2558_v40, %v2557_v31  ;;  %v2838_v52 = vadd.f32 %v2837_v0, %v2809_v7  ;;  %v5610_v15 = vmul.f32 0.0012755102, %v7833_v12  ;;  %v2840_v42 = vsel %vm150_vm0, %v2811_v8, 0.0  ;;  %v7838_v31 = vld [vmem:[#allocation11_spill] sm:$0xff]  ;;  %v7839_v0 = vld [vmem:[#allocation13_spill] sm:$0xff] }
  0xd8   :  { %v2823_v5 = vmul.f32 %v5475_v45, %v5475_v45  ;;  %v2854_v59 = vadd.f32 %v2853_v46, %v2821_v18  ;;  %v581_v19 = vmul.f32 %v5583_v37, %v5583_v37  ;;  %v579_v23 = vmul.f32 %v5599_v60, %v5599_v60 }
  0xd9   :  { %2560 = vadd.xlane.f32.xlu0 %v2559_v62  ;;  %v2839_v39 = vadd.f32 %v2838_v52, %v2810_v51  ;;  %v2825_v29 = vmul.f32 %v5480_v26, %v5480_v26  ;;  %v5622_v11 = vmul.f32 0.0012755102, %v7834_v25  ;;  %v2824_v58 = vmul.f32 %v5492_v43, %v5492_v43  ;;  %v7840_v25 = vld [vmem:[#allocation15_spill] sm:$0xff] }
  0xda   :  { %v2855_v28 = vadd.f32 %v2854_v59, %v2822_v30  ;;  %v563_v45 = vmul.f32 0.0012755102, %v5496_v54  ;;  %v5627_v61 = vpop.xlane.xlu0 %481  ;;  %v5630_v47 = vmul.f32 0.0012755102, %v7835_v27  ;;  %v562_v1 = vmul.f32 0.0012755102, %v5508_v41 }
  0xdb   :  { %v2841_v24 = vadd.f32 %v2840_v42, %v2839_v39  ;;  %v565_v57 = vmul.f32 0.0012755102, %v5517_v38  ;;  %v582_v26 = vmul.f32 %v5610_v15, %v5610_v15  ;;  %v564_v43 = vmul.f32 0.0012755102, %v5533_v14 }
  0xdc   :  { %v2856_v22 = vadd.f32 %v2855_v28, %v2823_v5  ;;  %v595_v44 = vsub.f32 %v563_v45, %v579_v23  ;;  %v2858_v54 = vsel %vm150_vm0, %v2825_v29, 0.0  ;;  %v594_v4 = vsub.f32 %v562_v1, %v578_v16 }
  0xdd   :  { %2842 = vadd.xlane.f32.xlu0 %v2841_v24  ;;  %v597_v53 = vsub.f32 %v565_v57, %v581_v19  ;;  %v566_v2 = vmul.f32 0.0012755102, %v5561_v6  ;;  %v5640_v20 = vmul.f32 0.0012755102, %v7836_v13  ;;  %v596_v34 = vsub.f32 %v564_v43, %v580_v48 }
  0xde   :  { %v509_v35 = vpop.xlane.xlu1 %508  ;;  %v2857_v41 = vadd.f32 %v2856_v22, %v2824_v58  ;;  %v611_v38 = vmax.f32 %v595_v44, 0.0  ;;  %v5643_v36 = vmul.f32 0.0012755102, %v7837_v33  ;;  %v610_v7 = vmax.f32 %v594_v4, 0.0  ;;  %v7841_v44 = vld [vmem:[#allocation10_spill] sm:$0xff] }
  0xdf   :  { %v613_v32 = vmax.f32 %v597_v53, 0.0  ;;  %v567_v14 = vmul.f32 0.0012755102, %v5544_v9  ;;  %v612_v40 = vmax.f32 %v596_v34, 0.0  ;;  %v598_v8 = vsub.f32 %v566_v2, %v582_v26  ;;  %v627_v53 = vld [vmem:[%s7681_s7 + $0x8] sm:$0xff] }
  0xe0   :  { %v2859_v17 = vadd.f32 %v2858_v54, %v2857_v41  ;;  %v659_v56 = vadd.f32 1e-05, %v611_v38  ;;  %v583_v6 = vmul.f32 %v5622_v11, %v5622_v11  ;;  %v5649_v50 = vmul.f32 0.0012755102, %v7838_v31  ;;  %v628_v31 = vld [vmem:[%s7681_s7 + $0x10] sm:$0xff] }
  0xe1   :  { %v500_v18 = vpop.xlane.xlu0 %499  ;;  %v585_v51 = vmul.f32 %v5630_v47, %v5630_v47  ;;  %v5654_v30 = vmul.f32 0.0012755102, %v7839_v0  ;;  %v660_v9 = vadd.f32 1e-05, %v612_v40  ;;  %v587_v48 = vmul.f32 %v5643_v36, %v5643_v36  ;;  %v7842_v40 = vld [vmem:[#allocation12_spill] sm:$0xff] }
  0xe2   :  { %2860 = vadd.xlane.f32.xlu0 %v2859_v17  ;;  %3056 = vrsqrt.f32 %v659_v56  ;;  %v658_v16 = vadd.f32 1e-05, %v610_v7  ;;  %v599_v62 = vsub.f32 %v567_v14, %v583_v6  ;;  %v571_v52 = vmul.f32 0.0012755102, %v491_v21 }
  0xe3   :  { %v584_v12 = vmul.f32 %v5640_v20, %v5640_v20  ;;  %v661_v42 = vadd.f32 1e-05, %v613_v32  ;;  %v614_v5 = vmax.f32 %v598_v8, 0.0  ;;  %v568_v59 = vmul.f32 0.0012755102, %v5596_v55 }
  0xe4   :  { %v589_v19 = vmul.f32 %v5649_v50, %v5649_v50  ;;  %3058 = vrsqrt.f32 %v660_v9  ;;  %v603_v23 = vsub.f32 %v571_v52, %v587_v48  ;;  %v573_v39 = vmul.f32 0.0012755102, %v509_v35 }
  0xe5   :  { %v527_v46 = vpop.xlane.xlu1 %526  ;;  %v591_v29 = vmul.f32 %v5654_v30, %v5654_v30  ;;  %v5666_v58 = vmul.f32 0.0012755102, %v7840_v25  ;;  %v569_v21 = vmul.f32 0.0012755102, %v5573_v63  ;;  %3060 = vrsqrt.f32 %v658_v16  ;;  %v629_v25 = vld [vmem:[%s7681_s7 + $0x18] sm:$0xff] }
  0xe6   :  { %v615_v45 = vmax.f32 %v599_v62, 0.0  ;;  %v619_v27 = vmax.f32 %v603_v23, 0.0  ;;  %v605_v55 = vsub.f32 %v573_v39, %v589_v19  ;;  %v3440_v24 = vmov 0   ;;  %v7843_v23 = vld [vmem:[#allocation18_spill] sm:$0xff] }
  0xe7   :  { %3055 = vset.pattern.permute.xlu0 %v3440_v24  ;;  %3054 = vset.pattern.permute.xlu1 %v3440_v24  ;;  %3062 = vrsqrt.f32 %v661_v42  ;;  %v662_v1 = vadd.f32 1e-05, %v614_v5  ;;  %v600_v57 = vsub.f32 %v568_v59, %v584_v12  ;;  %v575_v26 = vmul.f32 0.0012755102, %v527_v46  ;;  %v626_v59 = vld [vmem:[%s7681_s7] sm:$0xff] }
  0xe8   :  { %v5669_v28 = vpop.xlane.xlu0 %517  ;;  %v5672_v43 = vmul.f32 0.0012755102, %v7841_v44  ;;  %v667_v35 = vadd.f32 1e-05, %v619_v27  ;;  %v621_v54 = vmax.f32 %v605_v55, 0.0  ;;  %v593_v63 = vmul.f32 %v5666_v58, %v5666_v58 }
  0xe9   :  { %v601_v4 = vsub.f32 %v569_v21, %v585_v51  ;;  %v607_v2 = vsub.f32 %v575_v26, %v591_v29  ;;  %v663_v41 = vadd.f32 1e-05, %v615_v45  ;;  %v570_v38 = vmul.f32 0.0012755102, %v5627_v61 }
  0xea   :  { %3064 = vrsqrt.f32 %v667_v35  ;;  %v669_v34 = vadd.f32 1e-05, %v621_v54  ;;  %v616_v7 = vmax.f32 %v600_v57, 0.0  ;;  %v5683_v8 = vmul.f32 0.0012755102, %v7842_v40 }
  0xeb   :  { %3066 = vrsqrt.f32 %v662_v1  ;;  %v623_v32 = vmax.f32 %v607_v2, 0.0  ;;  %v586_v61 = vmul.f32 %v5672_v43, %v5672_v43  ;;  %v617_v51 = vmax.f32 %v601_v4, 0.0 }
  0xec   :  { %v545_v22 = vpop.xlane.xlu1 %544  ;;  %v3057_v33 = vpop.eup %3056  ;;  %3068 = vrsqrt.f32 %v669_v34  ;;  %v572_v9 = vmul.f32 0.0012755102, %v500_v18  ;;  %v664_v16 = vadd.f32 1e-05, %v616_v7  ;;  %v588_v5 = vmul.f32 %v5683_v8, %v5683_v8  ;;  %v637_v34 = vld [vmem:[%s7681_s7 + $0x58] sm:$0xff] }
  0xed   :  { %v577_v13 = vmul.f32 0.0012755102, %v545_v22  ;;  %v5685_v6 = vmul.f32 %v3057_v33, %v627_v53  ;;  %v671_v46 = vadd.f32 1e-05, %v623_v32  ;;  %3070 = vrsqrt.f32 %v663_v41  ;;  %v635_v22 = vld [vmem:[%s7681_s7 + $0x48] sm:$0xff] }
  0xee   :  { %v3059_v0 = vpop.eup %3058  ;;  %v602_v62 = vsub.f32 %v570_v38, %v586_v61  ;;  %v5705_v39 = vmul.f32 0.0012755102, %v7843_v23  ;;  %v665_v29 = vadd.f32 1e-05, %v617_v51  ;;  %v604_v21 = vsub.f32 %v572_v9, %v588_v5  ;;  %v631_v32 = vld [vmem:[%s7681_s7 + $0x28] sm:$0xff] }
  0xef   :  { %v609_v14 = vsub.f32 %v577_v13, %v593_v63  ;;  %745 = vperm.xlu1 %3054, %v5685_v6   ;;  %v5693_v52 = vmul.f32 %v3059_v0, %v628_v31  ;;  %v3061_v42 = vpop.eup %3060  ;;  %3072 = vrsqrt.f32 %v671_v46  ;;  %v574_v24 = vmul.f32 0.0012755102, %v5669_v28  ;;  %v630_v28 = vld [vmem:[%s7681_s7 + $0x20] sm:$0xff]  ;;  %v639_v46 = vld [vmem:[%s7681_s7 + $0x68] sm:$0xff] }
  0xf0   :  { %v536_v17 = vpop.xlane.xlu0 %535  ;;  %v5680_v56 = vpop.xlane.xlu1 %1269  ;;  %3074 = vrsqrt.f32 %v664_v16  ;;  %v618_v27 = vmax.f32 %v602_v62, 0.0  ;;  %v5711_v55 = vmul.f32 %v3061_v42, %v626_v59  ;;  %v590_v35 = vmul.f32 %v5705_v39, %v5705_v39  ;;  %v632_v16 = vld [vmem:[%s7681_s7 + $0x30] sm:$0xff] }
  0xf1   :  { %v625_v48 = vmax.f32 %v609_v14, 0.0  ;;  %v3063_v19 = vpop.eup %3062  ;;  %v5724_v54 = vmul.f32 0.0012755102, %v5484_v10  ;;  %3076 = vrsqrt.f32 %v665_v29  ;;  %v620_v63 = vmax.f32 %v604_v21, 0.0  ;;  %v641_v21 = vld [vmem:[%s7681_s7 + $0x78] sm:$0xff] }
  0xf2   :  { %v5716_v26 = vmul.f32 %v3063_v19, %v629_v25  ;;  %v666_v53 = vadd.f32 1e-05, %v618_v27  ;;  %v606_v2 = vsub.f32 %v574_v24, %v590_v35  ;;  %v576_v13 = vmul.f32 0.0012755102, %v536_v17  ;;  %v634_v35 = vld [vmem:[%s7681_s7 + $0x40] sm:$0xff] }
  0xf3   :  { %750 = vperm.xlu1 %3054, %v5693_v52   ;;  %v673_v45 = vadd.f32 1e-05, %v625_v48  ;;  %v592_v7 = vmul.f32 %v5724_v54, %v5724_v54  ;;  %v668_v40 = vadd.f32 1e-05, %v620_v63  ;;  %v707_v63 = vmul.f32 %v5685_v6, %v5599_v60  ;;  %v636_v6 = vld [vmem:[%s7681_s7 + $0x50] sm:$0xff] }
  0xf4   :  { %v5695_v12 = vpop.xlane.xlu0 %1278  ;;  %v5702_v18 = vpop.xlane.xlu1 %1296  ;;  %v622_v17 = vmax.f32 %v606_v2, 0.0  ;;  %v643_v2 = vld [vmem:[%s7682_s8 + $0x8] sm:$0xff] }
  0xf5   :  { %v3065_v57 = vpop.eup %3064  ;;  %3078 = vrsqrt.f32 %v673_v45  ;;  %v608_v31 = vsub.f32 %v576_v13, %v592_v7  ;;  %v633_v45 = vld [vmem:[%s7681_s7 + $0x38] sm:$0xff]  ;;  %v5790_v13 = vmul.f32 0.0012755102, %v5680_v56  ;;  %v723_v60 = vsub.f32 %v643_v2, %v707_v63 }
  0xf6   :  { %v3067_v44 = vpop.eup %3066  ;;  %v5733_v41 = vmul.f32 %v3065_v57, %v635_v22  ;;  %3080 = vrsqrt.f32 %v666_v53  ;;  %v670_v42 = vadd.f32 1e-05, %v622_v17  ;;  %v5784_v53 = vmul.f32 0.0012755102, %v5695_v12 }
  0xf7   :  { %755 = vperm.xlu1 %3054, %v5716_v26   ;;  %v3069_v10 = vpop.eup %3068  ;;  %v5735_v38 = vmul.f32 %v3067_v44, %v630_v28  ;;  %3082 = vrsqrt.f32 %v668_v40  ;;  %v624_v5 = vmax.f32 %v608_v31, 0.0  ;;  %v709_v12 = vmul.f32 %v5716_v26, %v5583_v37 }
  0xf8   :  { %v5714_v1 = vpop.xlane.xlu0 %1287  ;;  %740 = vperm.xlu0 %3055, %v5711_v55   ;;  %v3071_v33 = vpop.eup %3070  ;;  %v5747_v61 = vmul.f32 %v3069_v10, %v637_v34  ;;  %3084 = vrsqrt.f32 %v670_v42  ;;  %v1371_v7 = vmul.f32 %v5784_v53, %v5784_v53  ;;  %v1370_v40 = vmul.f32 %v5790_v13, %v5790_v13 }
  0xf9   :  { %v3073_v51 = vpop.eup %3072  ;;  %v695_v0 = vmul.f32 %v3071_v33, %v631_v32  ;;  %v672_v27 = vadd.f32 1e-05, %v624_v5  ;;  %v645_v32 = vld [vmem:[%s7682_s8 + $0x18] sm:$0xff] }
  0xfa   :  { %v3075_v48 = vpop.eup %3074  ;;  %v5758_v19 = vmul.f32 %v3073_v51, %v639_v46  ;;  %v5812_v51 = vmul.f32 0.0012755102, %v5702_v18  ;;  %v725_v46 = vsub.f32 %v645_v32, %v709_v12  ;;  %v642_v12 = vld [vmem:[%s7682_s8] sm:$0xff] }
  0xfb   :  { %v5730_v4 = vpop.xlane.xlu1 %1342  ;;  %760 = vperm.xlu1 %3054, %v5735_v38   ;;  %v3077_v62 = vpop.eup %3076  ;;  %v5760_v29 = vmul.f32 %v3075_v48, %v632_v16  ;;  %3086 = vrsqrt.f32 %v672_v27  ;;  %v711_v48 = vmul.f32 %v695_v0, %v5622_v11  ;;  %v640_v27 = vld [vmem:[%s7681_s7 + $0x70] sm:$0xff] }
  0xfc   :  { %785 = vperm.xlu0 %3055, %v5733_v41   ;;  %v697_v22 = vmul.f32 %v3077_v62, %v633_v45  ;;  %v1367_v56 = vmul.f32 0.0012755102, %v5730_v4  ;;  %v638_v4 = vld [vmem:[%s7681_s7 + $0x60] sm:$0xff]  ;;  %v1373_v42 = vmul.f32 %v5812_v51, %v5812_v51 }
  0xfe   :  { %v1334_v14 = vpop.xlane.xlu0 %1333  ;;  %v1375_v16 = vsub.f32 %v1367_v56, %v1371_v7  ;;  %v713_v45 = vmul.f32 %v697_v22, %v5630_v47 }
  0xff   :  { %765 = vperm.xlu1 %3054, %v695_v0   ;;  %v3079_v23 = vpop.eup %3078  ;;  %v1366_v17 = vmul.f32 0.0012755102, %v1334_v14  ;;  %v647_v14 = vld [vmem:[%s7682_s8 + $0x28] sm:$0xff] }
 0x100   :  { %795 = vperm.xlu0 %3055, %v5747_v61   ;;  %v5774_v57 = vmul.f32 %v3079_v23, %v641_v21  ;;  %v3081_v44 = vpop.eup %3080  ;;  %v727_v0 = vsub.f32 %v647_v14, %v711_v48 }
 0x101   :  { %v1361_v9 = vpop.xlane.xlu1 %1360  ;;  %v5793_v10 = vmul.f32 %v3081_v44, %v634_v35  ;;  %v3083_v33 = vpop.eup %3082  ;;  %v1374_v18 = vsub.f32 %v1366_v17, %v1370_v40  ;;  %v1379_v44 = vmax.f32 %v1375_v16, 0.0  ;;  %v649_v35 = vld [vmem:[%s7682_s8 + $0x38] sm:$0xff] }
 0x102   :  { %v5814_v37 = vmul.f32 %v3083_v33, %v636_v6  ;;  %v3085_v26 = vpop.eup %3084  ;;  %v1369_v5 = vmul.f32 0.0012755102, %v1361_v9  ;;  %v706_v9 = vmul.f32 %v5711_v55, %v5580_v3  ;;  %v715_v33 = vmul.f32 %v5733_v41, %v5643_v36  ;;  %v651_v3 = vld [vmem:[%s7682_s8 + $0x48] sm:$0xff] }
 0x103   :  { %770 = vperm.xlu1 %3054, %v5760_v29   ;;  %v5826_v23 = vmul.f32 %v3085_v26, %v638_v4  ;;  %v1378_v63 = vmax.f32 %v1374_v18, 0.0  ;;  %v729_v6 = vsub.f32 %v649_v35, %v713_v45  ;;  %v1391_v7 = vadd.f32 1e-05, %v1379_v44  ;;  %v644_v26 = vld [vmem:[%s7682_s8 + $0x10] sm:$0xff]  ;;  %v653_v4 = vld [vmem:[%s7682_s8 + $0x58] sm:$0xff]  ;;  %v655_v45 = vld [vmem:[%s7682_s8 + $0x68] sm:$0xff] }
 0x104   :  { %v5756_v59 = vpop.xlane.xlu0 %1351  ;;  %805 = vperm.xlu0 %3055, %v5758_v19   ;;  %v1377_v2 = vsub.f32 %v1369_v5, %v1373_v42  ;;  %v708_v55 = vmul.f32 %v5693_v52, %v5568_v49  ;;  %v722_v17 = vsub.f32 %v642_v12, %v706_v9  ;;  %v717_v49 = vmul.f32 %v5747_v61, %v5649_v50  ;;  %v646_v50 = vld [vmem:[%s7682_s8 + $0x20] sm:$0xff]  ;;  %v648_v9 = vld [vmem:[%s7682_s8 + $0x30] sm:$0xff] }
 0x105   :  { %v5762_v25 = vpop.xlane.xlu1 %1569  ;;  %v3087_v21 = vpop.eup %3086  ;;  %v1390_v56 = vadd.f32 1e-05, %v1378_v63  ;;  %v731_v52 = vsub.f32 %v651_v3, %v715_v33  ;;  %3088 = vrsqrt.f32 %v1391_v7  ;;  %v1368_v42 = vmul.f32 0.0012755102, %v5756_v59 }
 0x106   :  { %v1381_v41 = vmax.f32 %v1377_v2, 0.0  ;;  %v5859_v32 = vmul.f32 0.0012755102, %v5762_v25  ;;  %v724_v16 = vsub.f32 %v644_v26, %v708_v55  ;;  %v721_v35 = vmul.f32 %v5774_v57, %v5666_v58  ;;  %v650_v55 = vld [vmem:[%s7682_s8 + $0x40] sm:$0xff] }
 0x107   :  { %775 = vperm.xlu1 %3054, %v697_v22   ;;  %v5840_v22 = vmul.f32 %v3087_v21, %v640_v27  ;;  %3090 = vrsqrt.f32 %v1390_v56  ;;  %v733_v21 = vsub.f32 %v653_v4, %v717_v49  ;;  %v716_v49 = vmul.f32 %v5814_v37, %v5683_v8 }
 0x108   :  { %v5772_v24 = vpop.xlane.xlu0 %1578  ;;  %815 = vperm.xlu0 %3055, %v5774_v57  }
 0x109   :  { %v5779_v28 = vpop.xlane.xlu1 %1596  ;;  %v5856_v36 = vmul.f32 0.0012755102, %v5772_v24  ;;  %v710_v24 = vmul.f32 %v5735_v38, %v5610_v15  ;;  %v1393_v15 = vadd.f32 1e-05, %v1381_v41  ;;  %v1670_v38 = vmul.f32 %v5859_v32, %v5859_v32 }
 0x10a   :  { %v5884_v61 = vmul.f32 0.0012755102, %v5779_v28  ;;  %v712_v28 = vmul.f32 %v5760_v29, %v5640_v20  ;;  %v657_v20 = vld [vmem:[%s7682_s8 + $0x78] sm:$0xff] }
 0x10b   :  { %780 = vperm.xlu1 %3054, %v5793_v10   ;;  %3092 = vrsqrt.f32 %v1393_v15  ;;  %v737_v3 = vsub.f32 %v657_v20, %v721_v35  ;;  %v718_v15 = vmul.f32 %v5826_v23, %v5705_v39 }
 0x10c   :  { %v5795_v34 = vpop.xlane.xlu0 %1587  ;;  %937 = vperm.xlu0 %3055, %v723_v60   ;;  %v1673_v59 = vmul.f32 %v5884_v61, %v5884_v61  ;;  %v728_v58 = vsub.f32 %v648_v9, %v712_v28  ;;  %v656_v9 = vld [vmem:[%s7682_s8 + $0x70] sm:$0xff] }
 0x10f   :  { %790 = vperm.xlu1 %3054, %v5814_v37   ;;  %v3089_v33 = vpop.eup %3088 }
 0x110   :  { %v1643_v31 = vpop.xlane.xlu1 %1642  ;;  %947 = vperm.xlu0 %3055, %v725_v46   ;;  %v5865_v46 = vmul.f32 0.0012755102, %v5714_v1  ;;  %v1671_v1 = vmul.f32 %v5856_v36, %v5856_v36 }
 0x111   :  { %v1667_v48 = vmul.f32 0.0012755102, %v1643_v31  ;;  %v719_v31 = vmul.f32 %v5758_v19, %v5654_v30  ;;  %v3091_v57 = vpop.eup %3090 }
 0x112   :  { %v1372_v18 = vmul.f32 %v5865_v46, %v5865_v46 }
 0x113   :  { %v1634_v62 = vpop.xlane.xlu0 %1633  ;;  %800 = vperm.xlu1 %3054, %v5826_v23   ;;  %v735_v63 = vsub.f32 %v655_v45, %v719_v31  ;;  %v654_v45 = vld [vmem:[%s7682_s8 + $0x60] sm:$0xff] }
 0x114   :  { %957 = vperm.xlu0 %3055, %v727_v0   ;;  %v1666_v14 = vmul.f32 0.0012755102, %v1634_v62  ;;  %v1675_v62 = vsub.f32 %v1667_v48, %v1671_v1  ;;  %v726_v0 = vsub.f32 %v646_v50, %v710_v24  ;;  %v1376_v44 = vsub.f32 %v1368_v42, %v1372_v18  ;;  %v652_v48 = vld [vmem:[%s7682_s8 + $0x50] sm:$0xff] }
 0x115   :  { %v5943_v18 = vmul.f32 0.0012755102, %v5795_v34 }
 0x116   :  { %v1661_v11 = vpop.xlane.xlu1 %1660  ;;  %v1674_v27 = vsub.f32 %v1666_v14, %v1670_v38  ;;  %v1679_v29 = vmax.f32 %v1675_v62, 0.0  ;;  %v1380_v7 = vmax.f32 %v1376_v44, 0.0  ;;  %v1385_v14 = vld [vmem:[%s7681_s7 + $0x98] sm:$0xff]  ;;  %v734_v44 = vsub.f32 %v654_v45, %v718_v15 }
 0x117   :  { %810 = vperm.xlu1 %3054, %v5840_v22   ;;  %v1669_v30 = vmul.f32 0.0012755102, %v1661_v11  ;;  %v714_v11 = vmul.f32 %v5793_v10, %v5672_v43  ;;  %v1383_v43 = vld [vmem:[%s7681_s7 + $0x88] sm:$0xff] }
 0x118   :  { %967 = vperm.xlu0 %3055, %v729_v6   ;;  %v1678_v6 = vmax.f32 %v1674_v27, 0.0  ;;  %v1691_v10 = vadd.f32 1e-05, %v1679_v29  ;;  %v1392_v4 = vadd.f32 1e-05, %v1380_v7  ;;  %v5933_v50 = vmul.f32 %v3089_v33, %v1383_v43  ;;  %v1389_v33 = vld [vmem:[%s7682_s8 + $0x98] sm:$0xff] }
 0x119   :  { %v5838_v47 = vpop.xlane.xlu0 %1651  ;;  %v1677_v12 = vsub.f32 %v1669_v30, %v1673_v59  ;;  %v730_v24 = vsub.f32 %v650_v55, %v714_v11  ;;  %v1387_v59 = vld [vmem:[%s7682_s8 + $0x88] sm:$0xff] }
 0x11a   :  { %v5844_v60 = vpop.xlane.xlu1 %1869  ;;  %3094 = vrsqrt.f32 %v1691_v10  ;;  %v1403_v62 = vmul.f32 %v5933_v50, %v5784_v53  ;;  %v1668_v27 = vmul.f32 0.0012755102, %v5838_v47  ;;  %v1683_v55 = vld [vmem:[%s7681_s7 + $0xa8] sm:$0xff] }
 0x11b   :  { %932 = vperm.xlu1 %3054, %v722_v17   ;;  %v1382_v17 = vld [vmem:[%s7681_s7 + $0x80] sm:$0xff]  ;;  %v5922_v26 = vmul.f32 0.0012755102, %v5844_v60  ;;  %v3093_v60 = vpop.eup %3092 }
 0x11c   :  { %977 = vperm.xlu0 %3055, %v731_v52   ;;  %v1681_v52 = vmax.f32 %v1677_v12, 0.0  ;;  %v1401_v28 = vmul.f32 %v3093_v60, %v1385_v14  ;;  %v1407_v20 = vsub.f32 %v1387_v59, %v1403_v62  ;;  %v1687_v59 = vld [vmem:[%s7682_s8 + $0xa8] sm:$0xff] }
 0x11d   :  { %v1879_v40 = vpop.xlane.xlu0 %1878  ;;  %v1970_v42 = vmul.f32 %v5922_v26, %v5922_v26 }
 0x11e   :  { %v5871_v25 = vpop.xlane.xlu1 %1896  ;;  %v5913_v56 = vmul.f32 0.0012755102, %v1879_v40  ;;  %v1690_v40 = vadd.f32 1e-05, %v1678_v6  ;;  %v1693_v39 = vadd.f32 1e-05, %v1681_v52  ;;  %v1405_v29 = vmul.f32 %v1401_v28, %v5812_v51 }
 0x11f   :  { %942 = vperm.xlu1 %3054, %v724_v16   ;;  %v5931_v16 = vmul.f32 %v3091_v57, %v1382_v17  ;;  %v5949_v23 = vmul.f32 0.0012755102, %v5871_v25  ;;  %v1672_v25 = vmul.f32 %v5943_v18, %v5943_v18  ;;  %v1682_v51 = vld [vmem:[%s7681_s7 + $0xa0] sm:$0xff] }
 0x120   :  { %987 = vperm.xlu0 %3055, %v733_v21   ;;  %v1971_v8 = vmul.f32 %v5913_v56, %v5913_v56  ;;  %3096 = vrsqrt.f32 %v1690_v40  ;;  %v732_v21 = vsub.f32 %v652_v48, %v716_v49  ;;  %v1409_v57 = vsub.f32 %v1389_v33, %v1405_v29  ;;  %v1384_v49 = vld [vmem:[%s7681_s7 + $0x90] sm:$0xff] }
 0x121   :  { %v5891_v5 = vpop.xlane.xlu0 %1887  ;;  %3098 = vrsqrt.f32 %v1392_v4  ;;  %v1973_v35 = vmul.f32 %v5949_v23, %v5949_v23  ;;  %v1676_v11 = vsub.f32 %v1668_v27, %v1672_v25 }
 0x122   :  { %3100 = vrsqrt.f32 %v1693_v39  ;;  %v5993_v15 = vmul.f32 0.0012755102, %v5891_v5  ;;  %v1386_v5 = vld [vmem:[%s7682_s8 + $0x80] sm:$0xff] }
 0x123   :  { %952 = vperm.xlu1 %3054, %v726_v0   ;;  %v1680_v17 = vmax.f32 %v1676_v11, 0.0 }
 0x124   :  { %997 = vperm.xlu0 %3055, %v735_v63   ;;  %v720_v63 = vmul.f32 %v5840_v22, %v5724_v54  ;;  %v3095_v22 = vpop.eup %3094 }
 0x125   :  { %v1943_v19 = vpop.xlane.xlu1 %1942  ;;  %v5990_v48 = vmul.f32 %v3095_v22, %v1683_v55  ;;  %v1692_v14 = vadd.f32 1e-05, %v1680_v17 }
 0x126   :  { %v1967_v37 = vmul.f32 0.0012755102, %v1943_v19  ;;  %v736_v54 = vsub.f32 %v656_v9, %v720_v63 }
 0x127   :  { %962 = vperm.xlu1 %3054, %v728_v58  }
 0x128   :  { %v1934_v2 = vpop.xlane.xlu0 %1933  ;;  %1007 = vperm.xlu0 %3055, %v737_v3   ;;  %v1975_v0 = vsub.f32 %v1967_v37, %v1971_v8  ;;  %v1402_v37 = vmul.f32 %v5931_v16, %v5790_v13 }
 0x129   :  { %v1966_v31 = vmul.f32 0.0012755102, %v1934_v2 }
 0x12a   :  { %v1979_v47 = vmax.f32 %v1975_v0, 0.0  ;;  %v3097_v7 = vpop.eup %3096 }
 0x12b   :  { %v1961_v41 = vpop.xlane.xlu1 %1960  ;;  %972 = vperm.xlu1 %3054, %v730_v24   ;;  %v1974_v30 = vsub.f32 %v1966_v31, %v1970_v42  ;;  %v5988_v4 = vmul.f32 %v3097_v7, %v1682_v51  ;;  %v1983_v7 = vld [vmem:[%s7681_s7 + $0xc8] sm:$0xff] }
 0x12c   :  { %1412 = vperm.xlu0 %3055, %v5931_v16   ;;  %v1969_v53 = vmul.f32 0.0012755102, %v1961_v41  ;;  %v1991_v3 = vadd.f32 1e-05, %v1979_v47  ;;  %v3099_v41 = vpop.eup %3098 }
 0x12d   :  { %v1978_v6 = vmax.f32 %v1974_v30, 0.0  ;;  %v3101_v60 = vpop.eup %3100  ;;  %v1400_v8 = vmul.f32 %v3099_v41, %v1384_v49  ;;  %v1406_v30 = vsub.f32 %v1386_v5, %v1402_v37  ;;  %v1684_v49 = vld [vmem:[%s7681_s7 + $0xb0] sm:$0xff]  ;;  %v1985_v37 = vld [vmem:[%s7681_s7 + $0xd8] sm:$0xff]  ;;  %v1686_v5 = vld [vmem:[%s7682_s8 + $0xa0] sm:$0xff] }
 0x12e   :  { %v5926_v1 = vpop.xlane.xlu0 %1951  ;;  %v1977_v12 = vsub.f32 %v1969_v53, %v1973_v35  ;;  %3102 = vrsqrt.f32 %v1991_v3  ;;  %v1388_v35 = vld [vmem:[%s7682_s8 + $0x90] sm:$0xff] }
 0x12f   :  { %v2170_v38 = vpop.xlane.xlu1 %2169  ;;  %982 = vperm.xlu1 %3054, %v732_v21   ;;  %v1990_v43 = vadd.f32 1e-05, %v1978_v6  ;;  %v1968_v62 = vmul.f32 0.0012755102, %v5926_v1 }
 0x130   :  { %1427 = vperm.xlu0 %3055, %v1401_v28   ;;  %v1981_v40 = vmax.f32 %v1977_v12, 0.0  ;;  %v5986_v52 = vmul.f32 0.0012755102, %v2170_v38  ;;  %v1685_v38 = vld [vmem:[%s7681_s7 + $0xb8] sm:$0xff]  ;;  %v1972_v28 = vmul.f32 %v5993_v15, %v5993_v15 }
 0x131   :  { %3104 = vrsqrt.f32 %v1990_v43  ;;  %v1701_v45 = vmul.f32 %v3101_v60, %v1685_v38 }
 0x132   :  { %v2179_v34 = vpop.xlane.xlu0 %2178  ;;  %v2270_v13 = vmul.f32 %v5986_v52, %v5986_v52  ;;  %3106 = vrsqrt.f32 %v1692_v14  ;;  %v1976_v9 = vsub.f32 %v1968_v62, %v1972_v28 }
 0x133   :  { %v2197_v19 = vpop.xlane.xlu1 %2196  ;;  %992 = vperm.xlu1 %3054, %v734_v44   ;;  %v5981_v10 = vmul.f32 0.0012755102, %v2179_v34  ;;  %v1703_v34 = vmul.f32 %v5990_v48, %v5856_v36  ;;  %v1404_v36 = vmul.f32 %v1400_v8, %v5865_v46  ;;  %v1705_v63 = vmul.f32 %v1701_v45, %v5884_v61  ;;  %v1689_v46 = vld [vmem:[%s7682_s8 + $0xb8] sm:$0xff]  ;;  %v1982_v61 = vld [vmem:[%s7681_s7 + $0xc0] sm:$0xff] }
 0x134   :  { %1465 = vperm.xlu0 %3055, %v1407_v20   ;;  %v6009_v16 = vmul.f32 0.0012755102, %v2197_v19 }
 0x135   :  { %v2271_v42 = vmul.f32 %v5981_v10, %v5981_v10  ;;  %v1707_v53 = vsub.f32 %v1687_v59, %v1703_v34  ;;  %v1408_v12 = vsub.f32 %v1388_v35, %v1404_v36  ;;  %v1709_v22 = vsub.f32 %v1689_v46, %v1705_v63 }
 0x136   :  { %v5970_v2 = vpop.xlane.xlu0 %2187  ;;  %v2273_v19 = vmul.f32 %v6009_v16, %v6009_v16 }
 0x137   :  { %1002 = vperm.xlu1 %3054, %v736_v54   ;;  %v6055_v38 = vmul.f32 0.0012755102, %v5970_v2 }
 0x138   :  { %1475 = vperm.xlu0 %3055, %v1409_v57   ;;  %v3103_v33 = vpop.eup %3102 }
 0x13a   :  { %v2243_v58 = vpop.xlane.xlu1 %2242 }
 0x13b   :  { %1417 = vperm.xlu1 %3054, %v5933_v50   ;;  %v2267_v31 = vmul.f32 0.0012755102, %v2243_v58  ;;  %v1993_v50 = vadd.f32 1e-05, %v1981_v40  ;;  %v3105_v54 = vpop.eup %3104  ;;  %v1980_v58 = vmax.f32 %v1976_v9, 0.0 }
 0x13c   :  { %1712 = vperm.xlu0 %3055, %v5988_v4   ;;  %v3107_v43 = vpop.eup %3106  ;;  %v6048_v40 = vmul.f32 %v3105_v54, %v1982_v61 }
 0x13d   :  { %v2234_v24 = vpop.xlane.xlu0 %2233  ;;  %v2275_v25 = vsub.f32 %v2267_v31, %v2271_v42  ;;  %3108 = vrsqrt.f32 %v1993_v50  ;;  %v1702_v42 = vmul.f32 %v5988_v4, %v5859_v32  ;;  %v1987_v32 = vld [vmem:[%s7682_s8 + $0xc8] sm:$0xff]  ;;  %v2272_v4 = vmul.f32 %v6055_v38, %v6055_v38 }
 0x13e   :  { %v2266_v21 = vmul.f32 0.0012755102, %v2234_v24  ;;  %v1999_v24 = vmul.f32 %v3103_v33, %v1983_v7 }
 0x13f   :  { %1422 = vperm.xlu1 %3054, %v1400_v8   ;;  %v2279_v29 = vmax.f32 %v2275_v25, 0.0  ;;  %v1992_v8 = vadd.f32 1e-05, %v1980_v58  ;;  %v1706_v34 = vsub.f32 %v1686_v5, %v1702_v42  ;;  %v1688_v25 = vld [vmem:[%s7682_s8 + $0xb0] sm:$0xff] }
 0x140   :  { %v2261_v39 = vpop.xlane.xlu1 %2260  ;;  %1727 = vperm.xlu0 %3055, %v1701_v45   ;;  %v2274_v1 = vsub.f32 %v2266_v21, %v2270_v13  ;;  %v2003_v13 = vmul.f32 %v1999_v24, %v5913_v56 }
 0x141   :  { %v2269_v44 = vmul.f32 0.0012755102, %v2261_v39  ;;  %v2291_v3 = vadd.f32 1e-05, %v2279_v29  ;;  %v1700_v39 = vmul.f32 %v3107_v43, %v1684_v49  ;;  %v2283_v29 = vld [vmem:[%s7681_s7 + $0xe8] sm:$0xff] }
 0x142   :  { %v2278_v11 = vmax.f32 %v2274_v1, 0.0 }
 0x143   :  { %v6016_v0 = vpop.xlane.xlu0 %2251  ;;  %1460 = vperm.xlu1 %3054, %v1406_v30   ;;  %v2277_v6 = vsub.f32 %v2269_v44, %v2273_v19  ;;  %3110 = vrsqrt.f32 %v2291_v3  ;;  %v1704_v56 = vmul.f32 %v1700_v39, %v5943_v18  ;;  %v2007_v30 = vsub.f32 %v1987_v32, %v2003_v13 }
 0x144   :  { %v6021_v27 = vpop.xlane.xlu1 %2478  ;;  %1765 = vperm.xlu0 %3055, %v1707_v53   ;;  %v2290_v55 = vadd.f32 1e-05, %v2278_v11  ;;  %v2268_v45 = vmul.f32 0.0012755102, %v6016_v0  ;;  %v1989_v0 = vld [vmem:[%s7682_s8 + $0xd8] sm:$0xff] }
 0x145   :  { %v2281_v41 = vmax.f32 %v2277_v6, 0.0  ;;  %v1708_v63 = vsub.f32 %v1688_v25, %v1704_v56 }
 0x146   :  { %3112 = vrsqrt.f32 %v2290_v55  ;;  %v2276_v1 = vsub.f32 %v2268_v45, %v2272_v4  ;;  %v2582_v45 = vld [vmem:[%s7681_s7 + $0x100] sm:$0xff] }
 0x147   :  { %v2470_v20 = vpop.xlane.xlu0 %2469  ;;  %1470 = vperm.xlu1 %3054, %v1408_v12   ;;  %v3109_v60 = vpop.eup %3108  ;;  %v2293_v31 = vadd.f32 1e-05, %v2281_v41  ;;  %3114 = vrsqrt.f32 %v1992_v8  ;;  %v6095_v12 = vmul.f32 0.0012755102, %v6021_v27  ;;  %v2285_v27 = vld [vmem:[%s7681_s7 + $0xf8] sm:$0xff] }
 0x148   :  { %v6033_v47 = vpop.xlane.xlu1 %2769  ;;  %1775 = vperm.xlu0 %3055, %v1709_v22   ;;  %v6043_v17 = vmul.f32 0.0012755102, %v2470_v20  ;;  %v2001_v50 = vmul.f32 %v3109_v60, %v1985_v37  ;;  %v2280_v33 = vmax.f32 %v2276_v1, 0.0  ;;  %v1984_v22 = vld [vmem:[%s7681_s7 + $0xd0] sm:$0xff]  ;;  %v1986_v37 = vld [vmem:[%s7682_s8 + $0xc0] sm:$0xff] }
 0x149   :  { %3116 = vrsqrt.f32 %v2293_v31  ;;  %v6101_v58 = vmul.f32 0.0012755102, %v6033_v47  ;;  %v2571_v43 = vmul.f32 %v6095_v12, %v6095_v12  ;;  %v2002_v47 = vmul.f32 %v6048_v40, %v5922_v26 }
 0x14a   :  { %v2005_v36 = vmul.f32 %v2001_v50, %v5949_v23  ;;  %v2282_v23 = vld [vmem:[%s7681_s7 + $0xe0] sm:$0xff]  ;;  %v2292_v55 = vadd.f32 1e-05, %v2280_v33 }
 0x14b   :  { %v2488_v57 = vpop.xlane.xlu0 %2487  ;;  %1717 = vperm.xlu1 %3054, %v5990_v48   ;;  %v2570_v48 = vmul.f32 %v6043_v17, %v6043_v17  ;;  %v2870_v60 = vmul.f32 %v6101_v58, %v6101_v58 }
 0x14c   :  { %v6041_v51 = vpop.xlane.xlu1 %2787  ;;  %2012 = vperm.xlu0 %3055, %v6048_v40   ;;  %v6074_v28 = vmul.f32 0.0012755102, %v2488_v57  ;;  %v2009_v20 = vsub.f32 %v1989_v0, %v2005_v36 }
 0x14d   :  { %v3111_v9 = vpop.eup %3110 }
 0x14e   :  { %v2572_v18 = vmul.f32 %v6074_v28, %v6074_v28  ;;  %v2299_v61 = vmul.f32 %v3111_v9, %v2283_v29  ;;  %v2284_v9 = vld [vmem:[%s7681_s7 + $0xf0] sm:$0xff] }
 0x14f   :  { %v6057_v14 = vpop.xlane.xlu0 %2496  ;;  %1722 = vperm.xlu1 %3054, %v1700_v39   ;;  %v2287_v39 = vld [vmem:[%s7682_s8 + $0xe8] sm:$0xff] }
 0x150   :  { %2027 = vperm.xlu0 %3055, %v2001_v50   ;;  %v3113_v46 = vpop.eup %3112  ;;  %v2303_v31 = vmul.f32 %v2299_v61, %v5981_v10  ;;  %v6127_v40 = vmul.f32 0.0012755102, %v6057_v14  ;;  %v2006_v50 = vsub.f32 %v1986_v37, %v2002_v47  ;;  %v1988_v10 = vld [vmem:[%s7682_s8 + $0xd0] sm:$0xff] }
 0x151   :  { %v2534_v2 = vpop.xlane.xlu1 %2533  ;;  %v3115_v6 = vpop.eup %3114  ;;  %v6103_v57 = vmul.f32 %v3113_v46, %v2282_v23 }
 0x152   :  { %v2566_v21 = vmul.f32 0.0012755102, %v2534_v2  ;;  %v2000_v41 = vmul.f32 %v3115_v6, %v1984_v22 }
 0x153   :  { %v6077_v59 = vpop.xlane.xlu0 %2778  ;;  %1760 = vperm.xlu1 %3054, %v1706_v34   ;;  %v3117_v7 = vpop.eup %3116  ;;  %v2573_v34 = vmul.f32 %v6127_v40, %v6127_v40 }
 0x154   :  { %v2574_v62 = vsub.f32 %v2566_v21, %v2570_v48  ;;  %2065 = vperm.xlu0 %3055, %v2007_v30   ;;  %v6118_v42 = vmul.f32 %v3117_v7, %v2285_v27  ;;  %v2004_v26 = vmul.f32 %v2000_v41, %v5993_v15  ;;  %v2307_v21 = vsub.f32 %v2287_v39, %v2303_v31  ;;  %v2286_v7 = vld [vmem:[%s7682_s8 + $0xe0] sm:$0xff]  ;;  %v2583_v31 = vld [vmem:[%s7681_s7 + $0x108] sm:$0xff] }
 0x155   :  { %v6136_v15 = vmul.f32 0.0012755102, %v6041_v51 }
 0x156   :  { %v2578_v19 = vmax.f32 %v2574_v62, 0.0  ;;  %v2008_v14 = vsub.f32 %v1988_v10, %v2004_v26  ;;  %v6141_v62 = vmul.f32 0.0012755102, %v6077_v59 }
 0x157   :  { %v2552_v44 = vpop.xlane.xlu1 %2551  ;;  %1770 = vperm.xlu1 %3054, %v1708_v63   ;;  %v2797_v11 = vpop.xlane.xlu0 %2796  ;;  %v2872_v51 = vmul.f32 %v6136_v15, %v6136_v15 }
 0x158   :  { %v2590_v35 = vadd.f32 1e-05, %v2578_v19  ;;  %v2568_v53 = vmul.f32 0.0012755102, %v2552_v44  ;;  %2075 = vperm.xlu0 %3055, %v2009_v20   ;;  %v2871_v44 = vmul.f32 %v6141_v62, %v6141_v62 }
 0x15a   :  { %3118 = vrsqrt.f32 %v2590_v35  ;;  %v2576_v54 = vsub.f32 %v2568_v53, %v2572_v18  ;;  %v6147_v35 = vmul.f32 0.0012755102, %v2797_v11 }
 0x15b   :  { %2017 = vperm.xlu1 %3054, %v1999_v24   ;;  %3120 = vrsqrt.f32 %v2292_v55  ;;  %v2584_v55 = vld [vmem:[%s7681_s7 + $0x110] sm:$0xff] }
 0x15c   :  { %v2834_v3 = vpop.xlane.xlu1 %2833  ;;  %2312 = vperm.xlu0 %3055, %v6103_v57   ;;  %v2580_v49 = vmax.f32 %v2576_v54, 0.0  ;;  %v2302_v54 = vmul.f32 %v6103_v57, %v5986_v52  ;;  %v2873_v11 = vmul.f32 %v6147_v35, %v6147_v35 }
 0x15d   :  { %v2866_v8 = vmul.f32 0.0012755102, %v2834_v3 }
 0x15e   :  { %v2592_v5 = vadd.f32 1e-05, %v2580_v49 }
 0x15f   :  { %v2543_v24 = vpop.xlane.xlu0 %2542  ;;  %2022 = vperm.xlu1 %3054, %v2000_v41   ;;  %v2874_v13 = vsub.f32 %v2866_v8, %v2870_v60  ;;  %v2306_v41 = vsub.f32 %v2286_v7, %v2302_v54  ;;  %v2288_v60 = vld [vmem:[%s7682_s8 + $0xf0] sm:$0xff]  ;;  %v3144_v7 = vld [vmem:[%s7674_s0 + $0x78] sm:$0xff] }
 0x160   :  { %v2567_v48 = vmul.f32 0.0012755102, %v2543_v24  ;;  %2327 = vperm.xlu0 %3055, %v6118_v42   ;;  %3122 = vrsqrt.f32 %v2592_v5  ;;  %v3143_v54 = vld [vmem:[%s7674_s0 + $0x70] sm:$0xff] }
 0x161   :  { %v2878_v30 = vmax.f32 %v2874_v13, 0.0 }
 0x162   :  { %v2575_v2 = vsub.f32 %v2567_v48, %v2571_v43 }
 0x163   :  { %2060 = vperm.xlu1 %3054, %v2006_v50   ;;  %v2852_v25 = vpop.xlane.xlu1 %2851  ;;  %v2890_v53 = vadd.f32 1e-05, %v2878_v30  ;;  %v2289_v50 = vld [vmem:[%s7682_s8 + $0xf8] sm:$0xff] }
 0x164   :  { %v3119_v32 = vpop.eup %3118  ;;  %v2579_v4 = vmax.f32 %v2575_v2, 0.0  ;;  %2365 = vperm.xlu0 %3055, %v2307_v21   ;;  %v2868_v1 = vmul.f32 0.0012755102, %v2852_v25 }
 0x165   :  { %v2598_v19 = vmul.f32 %v3119_v32, %v2582_v45  ;;  %v3121_v59 = vpop.eup %3120 }
 0x166   :  { %v2591_v56 = vadd.f32 1e-05, %v2579_v4  ;;  %v2561_v36 = vpop.xlane.xlu0 %2560  ;;  %v2876_v23 = vsub.f32 %v2868_v1, %v2872_v51  ;;  %v2300_v6 = vmul.f32 %v3121_v59, %v2284_v9  ;;  %v2882_v4 = vld [vmem:[%s7681_s7 + $0x120] sm:$0xff]  ;;  %v3138_v1 = vld [vmem:[%s7674_s0 + $0x48] sm:$0xff] }
 0x167   :  { %v2569_v0 = vmul.f32 0.0012755102, %v2561_v36  ;;  %2070 = vperm.xlu1 %3054, %v2008_v14   ;;  %v6183_v10 = vmul.f32 %v2598_v19, %v6043_v17  ;;  %v6202_v17 = vld [vmem:[%s7682_s8 + $0x110] sm:$0xff]  ;;  %v3137_v51 = vld [vmem:[%s7674_s0 + $0x40] sm:$0xff] }
 0x168   :  { %2612 = vperm.xlu0 %3055, %v2598_v19   ;;  %3124 = vrsqrt.f32 %v2591_v56  ;;  %v2880_v52 = vmax.f32 %v2876_v23, 0.0  ;;  %v2304_v43 = vmul.f32 %v2300_v6, %v6055_v38  ;;  %v2305_v38 = vmul.f32 %v6118_v42, %v6009_v16  ;;  %v2585_v16 = vld [vmem:[%s7681_s7 + $0x118] sm:$0xff]  ;;  %v6197_v42 = vld [vmem:[%s7682_s8 + $0x100] sm:$0xff] }
 0x169   :  { %v2577_v18 = vsub.f32 %v2569_v0, %v2573_v34  ;;  %3126 = vrsqrt.f32 %v2890_v53  ;;  %v3136_v19 = vld [vmem:[%s7674_s0 + $0x38] sm:$0xff]  ;;  %v3141_v23 = vld [vmem:[%s7674_s0 + $0x60] sm:$0xff] }
 0x16a   :  { %v2843_v63 = vpop.xlane.xlu0 %2842  ;;  %v3123_v3 = vpop.eup %3122  ;;  %v2892_v48 = vadd.f32 1e-05, %v2880_v52  ;;  %v2308_v26 = vsub.f32 %v2288_v60, %v2304_v43  ;;  %v2309_v14 = vsub.f32 %v2289_v50, %v2305_v38  ;;  %v3147_v52 = vld [vmem:[%s7674_s0 + $0x90] sm:$0xff]  ;;  %v3152_v50 = vld [vmem:[%s7674_s0] sm:$0xff] }
 0x16b   :  { %v2581_v20 = vmax.f32 %v2577_v18, 0.0  ;;  %v2867_v46 = vmul.f32 0.0012755102, %v2843_v63  ;;  %2317 = vperm.xlu1 %3054, %v2299_v61   ;;  %v6170_v8 = vmul.f32 %v3123_v3, %v2584_v55  ;;  %v2587_v18 = vld [vmem:[%s7682_s8 + $0x108] sm:$0xff]  ;;  %v3139_v63 = vld [vmem:[%s7674_s0 + $0x50] sm:$0xff] }
 0x16d   :  { %v2593_v29 = vadd.f32 1e-05, %v2581_v20  ;;  %v2875_v33 = vsub.f32 %v2867_v46, %v2871_v44  ;;  %v6187_v13 = vmul.f32 %v6170_v8, %v6074_v28  ;;  %v3140_v20 = vld [vmem:[%s7674_s0 + $0x58] sm:$0xff] }
 0x16e   :  { %v6156_v22 = vpop.permute.xlu1 %745 }
 0x16f   :  { %3128 = vrsqrt.f32 %v2593_v29  ;;  %v2879_v61 = vmax.f32 %v2875_v33, 0.0  ;;  %v2861_v27 = vpop.xlane.xlu0 %2860  ;;  %2322 = vperm.xlu1 %3054, %v2300_v6   ;;  %v6220_v0 = vmul.f32 %v3136_v19, %v6156_v22  ;;  %v6232_v44 = vmul.f32 %v3138_v1, %v6156_v22  ;;  %v3142_v33 = vld [vmem:[%s7674_s0 + $0x68] sm:$0xff] }
 0x170   :  { %v2869_v57 = vmul.f32 0.0012755102, %v2861_v27  ;;  %v6245_v9 = vmul.f32 %v3139_v63, %v6156_v22  ;;  %v6251_v46 = vmul.f32 %v3140_v20, %v6156_v22  ;;  %v6257_v29 = vmul.f32 %v3141_v23, %v6156_v22  ;;  %v3146_v27 = vld [vmem:[%s7674_s0 + $0x88] sm:$0xff]  ;;  %v3159_v20 = vld [vmem:[%s7674_s0 + $0x30] sm:$0xff] }
 0x171   :  { %v2891_v37 = vadd.f32 1e-05, %v2879_v61  ;;  %v6264_v6 = vmul.f32 %v3142_v33, %v6156_v22  ;;  %v3145_v61 = vld [vmem:[%s7674_s0 + $0x80] sm:$0xff]  ;;  %v2883_v33 = vld [vmem:[%s7681_s7 + $0x128] sm:$0xff] }
 0x172   :  { %v2877_v49 = vsub.f32 %v2869_v57, %v2873_v11  ;;  %v6165_v47 = vpop.permute.xlu1 %750  ;;  %v3125_v24 = vpop.eup %3124 }
 0x173   :  { %2360 = vperm.xlu1 %3054, %v2306_v41   ;;  %v2599_v5 = vmul.f32 %v3125_v24, %v2583_v31  ;;  %3130 = vrsqrt.f32 %v2891_v37  ;;  %v3127_v28 = vpop.eup %3126  ;;  %v6270_v11 = vmul.f32 %v3143_v54, %v6165_v47  ;;  %v6276_v3 = vmul.f32 %v3144_v7, %v6165_v47  ;;  %v3148_v41 = vld [vmem:[%s7674_s0 + $0x98] sm:$0xff]  ;;  %v3149_v24 = vld [vmem:[%s7674_s0 + $0xa0] sm:$0xff]  ;;  %v3150_v31 = vld [vmem:[%s7674_s0 + $0xa8] sm:$0xff] }
 0x174   :  { %v2881_v39 = vmax.f32 %v2877_v49, 0.0  ;;  %3132 = vrsqrt.f32 %v2892_v48  ;;  %v6237_v59 = vmul.f32 %v3127_v28, %v2882_v4  ;;  %v6288_v55 = vmul.f32 %v3146_v27, %v6165_v47  ;;  %v3153_v28 = vld [vmem:[%s7674_s0 + $0x8] sm:$0xff]  ;;  %v3155_v4 = vld [vmem:[%s7674_s0 + $0xb8] sm:$0xff]  ;;  %v3160_v7 = vld [vmem:[%s7674_s0 + $0xc0] sm:$0xff] }
 0x175   :  { %v2603_v56 = vmul.f32 %v2599_v5, %v6095_v12  ;;  %v6226_v12 = vmul.f32 %v3137_v51, %v6156_v22  ;;  %v6282_v22 = vmul.f32 %v3145_v61, %v6165_v47  ;;  %v6294_v57 = vmul.f32 %v3147_v52, %v6165_v47  ;;  %v3157_v51 = vld [vmem:[%s7674_s0 + $0x20] sm:$0xff]  ;;  %v3161_v27 = vld [vmem:[%s7674_s0 + $0xc8] sm:$0xff] }
 0x176   :  { %v6177_v2 = vpop.permute.xlu1 %755  ;;  %v2893_v32 = vadd.f32 1e-05, %v2881_v39  ;;  %v6300_v43 = vmul.f32 %v3148_v41, %v6165_v47  ;;  %v6308_v37 = vmul.f32 %v3149_v24, %v6165_v47  ;;  %v3151_v39 = vld [vmem:[%s7674_s0 + $0xb0] sm:$0xff]  ;;  %v6326_v47 = vmul.f32 %v6237_v59, %v6101_v58 }
 0x177   :  { %v6189_v21 = vpop.permute.xlu0 %740  ;;  %2370 = vperm.xlu1 %3054, %v2308_v26   ;;  %7844 = vst [vmem:[#allocation23_spill] sm:$0xff] %v6294_v57  ;;  %v2607_v49 = vsub.f32 %v2587_v18, %v2603_v56  ;;  %v6314_v48 = vmul.f32 %v3150_v31, %v6177_v2  ;;  %v6320_v26 = vmul.f32 %v3151_v39, %v6177_v2  ;;  %v3156_v56 = vld [vmem:[%s7674_s0 + $0x18] sm:$0xff]  ;;  %v3158_v18 = vld [vmem:[%s7674_s0 + $0x28] sm:$0xff]  ;;  %v2884_v31 = vld [vmem:[%s7681_s7 + $0x130] sm:$0xff] }
 0x178   :  { %3134 = vrsqrt.f32 %v2893_v32  ;;  %7845 = vst [vmem:[#allocation16_spill] sm:$0xff] %v6300_v43  ;;  %7846 = vst [vmem:[#allocation17_spill] sm:$0xff] %v6308_v37  ;;  %v6338_v32 = vmul.f32 %v3153_v28, %v6189_v21  ;;  %v6356_v19 = vmul.f32 %v3156_v56, %v6189_v21  ;;  %v6362_v1 = vmul.f32 %v3157_v51, %v6189_v21  ;;  %v3167_v51 = vld [vmem:[%s7674_s0 + $0xf8] sm:$0xff]  ;;  %v2887_v43 = vld [vmem:[%s7682_s8 + $0x128] sm:$0xff] }
 0x179   :  { %v3129_v45 = vpop.eup %3128  ;;  %v6368_v63 = vmul.f32 %v3158_v18, %v6189_v21  ;;  %v6374_v23 = vmul.f32 %v3159_v20, %v6189_v21  ;;  %v6383_v61 = vmul.f32 %v3160_v7, %v6177_v2  ;;  %v6389_v52 = vmul.f32 %v3161_v27, %v6177_v2  ;;  %v3168_v7 = vld [vmem:[%s7674_s0 + $0x100] sm:$0xff]  ;;  %v3187_v57 = vld [vmem:[%s7674_s0 + $0x278] sm:$0xff] }
 0x17a   :  { %v6207_v34 = vmul.f32 %v3129_v45, %v2585_v16  ;;  %v6210_v25 = vpop.permute.xlu1 %760  ;;  %v6332_v16 = vmul.f32 %v3152_v50, %v6189_v21  ;;  %v6350_v45 = vmul.f32 %v3155_v4, %v6177_v2  ;;  %v3164_v50 = vld [vmem:[%s7674_s0 + $0xe0] sm:$0xff]  ;;  %v3166_v4 = vld [vmem:[%s7674_s0 + $0xf0] sm:$0xff] }
 0x17b   :  { %2375 = vperm.xlu1 %3054, %v2309_v14   ;;  %v6239_v53 = vpop.permute.xlu0 %785  ;;  %v6412_v28 = vmul.f32 %v3164_v50, %v6210_v25  ;;  %v6424_v56 = vmul.f32 %v3166_v4, %v6210_v25  ;;  %v6430_v18 = vmul.f32 %v3167_v51, %v6210_v25  ;;  %v6440_v27 = vmul.f32 %v3168_v7, %v6210_v25  ;;  %v3171_v4 = vld [vmem:[%s7674_s0 + $0x1f8] sm:$0xff]  ;;  %v3172_v7 = vld [vmem:[%s7674_s0 + $0x200] sm:$0xff] }
 0x17c   :  { %2627 = vperm.xlu0 %3055, %v6207_v34   ;;  %v6462_v51 = vmul.f32 %v3171_v4, %v6239_v53  ;;  %v2605_v36 = vmul.f32 %v6207_v34, %v6127_v40  ;;  %v3179_v40 = vld [vmem:[%s7674_s0 + $0x128] sm:$0xff] }
 0x17d   :  { %v3131_v14 = vpop.eup %3130  ;;  %7847 = vst [vmem:[#allocation19_spill] sm:$0xff] %v6412_v28  ;;  %7849 = vst [vmem:[#allocation20_spill] sm:$0xff] %v6424_v56 }
 0x17e   :  { %v6302_v60 = vpop.permute.xlu1 %765  ;;  %v3133_v54 = vpop.eup %3132  ;;  %7850 = vst [vmem:[#allocation21_spill] sm:$0xff] %v6430_v18  ;;  %7851 = vst [vmem:[#allocation22_spill] sm:$0xff] %v6440_v27  ;;  %v6454_v50 = vmul.f32 %v3131_v14, %v2883_v33  ;;  %v3180_v27 = vld [vmem:[%s7674_s0 + $0x228] sm:$0xff]  ;;  %v2589_v18 = vld [vmem:[%s7682_s8 + $0x118] sm:$0xff] }
 0x17f   :  { %2617 = vperm.xlu1 %3054, %v2599_v5   ;;  %v6322_v38 = vpop.permute.xlu0 %795  ;;  %v3154_v5 = vld [vmem:[%s7674_s0 + $0x10] sm:$0xff]  ;;  %v6517_v34 = vmul.f32 %v3179_v40, %v6302_v60 }
 0x180   :  { %v6344_v58 = vmul.f32 %v3154_v5, %v6189_v21  ;;  %2665 = vperm.xlu0 %3055, %v2607_v49   ;;  %v3162_v21 = vld [vmem:[%s7674_s0 + $0xd0] sm:$0xff]  ;;  %v3163_v49 = vld [vmem:[%s7674_s0 + $0xd8] sm:$0xff]  ;;  %v3165_v5 = vld [vmem:[%s7674_s0 + $0xe8] sm:$0xff] }
 0x181   :  { %v6395_v41 = vmul.f32 %v3162_v21, %v6177_v2  ;;  %v6401_v24 = vmul.f32 %v3163_v49, %v6177_v2  ;;  %v6418_v2 = vmul.f32 %v3165_v5, %v6210_v25  ;;  %v3169_v21 = vld [vmem:[%s7674_s0 + $0x108] sm:$0xff]  ;;  %v6456_v5 = vmul.f32 %v3133_v54, %v2884_v31  ;;  %v3174_v54 = vld [vmem:[%s7674_s0 + $0x210] sm:$0xff] }
 0x182   :  { %v6406_v39 = vpop.permute.xlu1 %770  ;;  %v6446_v49 = vmul.f32 %v3169_v21, %v6210_v25  ;;  %v6468_v21 = vmul.f32 %v3172_v7, %v6239_v53  ;;  %v3135_v33 = vpop.eup %3134  ;;  %v6480_v31 = vmul.f32 %v3174_v54, %v6239_v53  ;;  %v3176_v7 = vld [vmem:[%s7674_s0 + $0x220] sm:$0xff]  ;;  %v2885_v54 = vld [vmem:[%s7681_s7 + $0x138] sm:$0xff]  ;;  %v3181_v40 = vld [vmem:[%s7674_s0 + $0x130] sm:$0xff]  ;;  %s3039_s7 = sshll.u32 %s3441_s29, 4  ;;  %s3040_s7 = int_to_ptr.vmem [resolvable:$true] %s3039_s7 }
 0x183   :  { %7848 = vst [vmem:[#allocation24_spill] sm:$0xff] %v6418_v2  ;;  %2622 = vperm.xlu1 %3054, %v6170_v8   ;;  %v6433_v20 = vpop.permute.xlu0 %805  ;;  %v3170_v8 = vld [vmem:[%s7674_s0 + $0x110] sm:$0xff]  ;;  %v6538_v2 = vmul.f32 %v3181_v40, %v6302_v60  ;;  %v3184_v40 = vld [vmem:[%s7674_s0 + $0x148] sm:$0xff]  ;;  %s3416_s13 = scalar_lea.vmem %s3040_s7, 35840  ;;  %p3421_p1 = scmp.lt.s32.totalorder %s3040_s7, %s3040_s7 }
 0x184   :  { %2912 = vperm.xlu0 %3055, %v6237_v59   ;;  %7852 = vst [vmem:[#allocation25_spill] sm:$0xff] %v6446_v49  ;;  %v6452_v59 = vmul.f32 %v3170_v8, %v6210_v25  ;;  %v3173_v25 = vld [vmem:[%s7674_s0 + $0x208] sm:$0xff]  ;;  %v3175_v8 = vld [vmem:[%s7674_s0 + $0x218] sm:$0xff]  ;;  %v6558_v28 = vmul.f32 %v3184_v40, %v6302_v60  ;;  %v2609_v40 = vsub.f32 %v2589_v18, %v2605_v36  ;;  %p3417_p0 = scmp.ne.s32.totalorder %s3040_s7, %s3416_s13  ;;  %p3422_p2 = scmp.lt.s32.totalorder %s3416_s13, %s3416_s13 }
 0x185   :  { %v6474_v14 = vmul.f32 %v3173_v25, %v6239_v53  ;;  %v6486_v4 = vmul.f32 %v3175_v8, %v6239_v53  ;;  %v6492_v25 = vmul.f32 %v3176_v7, %v6239_v53  ;;  %v3177_v8 = vld [vmem:[%s7674_s0 + $0x118] sm:$0xff]  ;;  %v3178_v7 = vld [vmem:[%s7674_s0 + $0x120] sm:$0xff] }
 0x186   :  { %7853 = vst [vmem:[#allocation26_spill] sm:$0xff] %v6452_v59  ;;  %v6496_v30 = vpop.permute.xlu1 %775  ;;  %v6505_v59 = vmul.f32 %v3177_v8, %v6302_v60  ;;  %v6511_v49 = vmul.f32 %v3178_v7, %v6302_v60  ;;  %v6523_v8 = vmul.f32 %v3180_v27, %v6239_v53  ;;  %v7854_v7 = vsub.f32 %v6197_v42, %v6183_v10  ;;  %v3182_v53 = vld [vmem:[%s7674_s0 + $0x138] sm:$0xff]  ;;  %v3183_v10 = vld [vmem:[%s7674_s0 + $0x140] sm:$0xff]  ;;  %p3423_p3 = por %p3422_p2, %p3421_p1 }
 0x187   :  { %v6531_v56 = vpop.permute.xlu0 %815  ;;  %v6544_v27 = vmul.f32 %v3182_v53, %v6302_v60  ;;  %v6550_v42 = vmul.f32 %v3183_v10, %v6302_v60  ;;  %v3185_v53 = vld [vmem:[%s7674_s0 + $0x268] sm:$0xff]  ;;  %v3186_v10 = vld [vmem:[%s7674_s0 + $0x270] sm:$0xff]  ;;  %v6575_v60 = vmul.f32 %v3135_v33, %v2885_v54 }
 0x188   :  { %2660 = vperm.xlu1 %3054, %v7854_v7   ;;  %2922 = vperm.xlu0 %3055, %v6456_v5   ;;  %v2903_v7 = vmul.f32 %v6454_v50, %v6141_v62  ;;  %v6564_v37 = vmul.f32 %v3185_v53, %v6322_v38  ;;  %v6570_v62 = vmul.f32 %v3186_v10, %v6322_v38  ;;  %v3189_v33 = vld [vmem:[%s7674_s0 + $0x288] sm:$0xff]  ;;  %p3424_p4 = pnand %p3423_p3, %p3417_p0 }
 0x189   :  { %v6581_v53 = vmul.f32 %v3187_v57, %v6322_v38  ;;  %v6593_v36 = vmul.f32 %v3189_v33, %v6322_v38  ;;  %v3190_v57 = vld [vmem:[%s7674_s0 + $0x150] sm:$0xff] }
 0x18a   :  { %7855 = vst [vmem:[#allocation31_spill] sm:$0xff] %v6564_v37  ;;  %v3188_v37 = vld [vmem:[%s7674_s0 + $0x280] sm:$0xff]  ;;  %v6595_v18 = vpop.permute.xlu1 %780  ;;  %v6601_v54 = vmul.f32 %v3190_v57, %v6406_v39  ;;  %v3192_v33 = vld [vmem:[%s7674_s0 + $0x290] sm:$0xff] }
 0x18b   :  { %7856 = vst [vmem:[#allocation27_spill] sm:$0xff] %v6581_v53  ;;  %v6587_v10 = vmul.f32 %v3188_v37, %v6322_v38  ;;  %7858 = vst [vmem:[#allocation37_spill] sm:$0xff] %v6593_v36  ;;  %v3191_v37 = vld [vmem:[%s7674_s0 + $0x158] sm:$0xff]  ;;  %v6613_v36 = vmul.f32 %v3192_v33, %v6322_v38 }
 0x18c   :  { %7859 = vst [vmem:[#allocation29_spill] sm:$0xff] %v6601_v54  ;;  %v3193_v53 = vld [vmem:[%s7674_s0 + $0x298] sm:$0xff]  ;;  %v7863_v54 = vsub.f32 %v6202_v17, %v6187_v13  ;;  %2675 = vperm.xlu0 %3055, %v2609_v40   ;;  %v3196_v13 = vld [vmem:[%s7674_s0 + $0x170] sm:$0xff]  ;;  %v2907_v40 = vsub.f32 %v2887_v43, %v2903_v7 }
 0x18d   :  { %7857 = vst [vmem:[#allocation28_spill] sm:$0xff] %v6587_v10  ;;  %v6607_v10 = vmul.f32 %v3191_v37, %v6406_v39  ;;  %7861 = vst [vmem:[#allocation32_spill] sm:$0xff] %v6613_v36  ;;  %v6619_v57 = vmul.f32 %v3193_v53, %v6322_v38  ;;  %v938_v37 = vpop.permute.xlu0 %937  ;;  %v3195_v36 = vld [vmem:[%s7674_s0 + $0x168] sm:$0xff]  ;;  %v6640_v17 = vmul.f32 %v3196_v13, %v6406_v39  ;;  %v2889_v7 = vld [vmem:[%s7682_s8 + $0x138] sm:$0xff] }
 0x18e   :  { %2670 = vperm.xlu1 %3054, %v7863_v54   ;;  %v6634_v38 = vmul.f32 %v3195_v36, %v6406_v39  ;;  %v6644_v53 = vmul.f32 %v6575_v60, %v6147_v35  ;;  %v1018_v54 = vadd.f32 %v938_v37, %v6226_v12  ;;  %v6649_v36 = vpop.permute.xlu1 %790  ;;  %v1022_v13 = vadd.f32 %v938_v37, %v6257_v29  ;;  %v3197_v35 = vld [vmem:[%s7674_s0 + $0x178] sm:$0xff]  ;;  %v3198_v12 = vld [vmem:[%s7674_s0 + $0x180] sm:$0xff] }
 0x18f   :  { %7860 = vst [vmem:[#allocation30_spill] sm:$0xff] %v6607_v10  ;;  %7862 = vst [vmem:[#allocation38_spill] sm:$0xff] %v6619_v57  ;;  %v3194_v10 = vld [vmem:[%s7674_s0 + $0x160] sm:$0xff]  ;;  %v1021_v57 = vadd.f32 %v938_v37, %v6251_v46  ;;  %v1023_v43 = vadd.f32 %v938_v37, %v6264_v6 }
 0x190   :  { %v6628_v33 = vmul.f32 %v3194_v10, %v6406_v39  ;;  %7865 = vst [vmem:[#allocation34_spill] sm:$0xff] %v6634_v38  ;;  %v1017_v10 = vadd.f32 %v938_v37, %v6220_v0  ;;  %v1020_v38 = vadd.f32 %v938_v37, %v6245_v9  ;;  %v6659_v0 = vmul.f32 %v3197_v35, %v6406_v39  ;;  %v3199_v9 = vld [vmem:[%s7674_s0 + $0x2d8] sm:$0xff]  ;;  %v3200_v29 = vld [vmem:[%s7674_s0 + $0x2e0] sm:$0xff] }
 0x191   :  { %v6671_v46 = vmul.f32 %v3199_v9, %v6433_v20  ;;  %v6677_v6 = vmul.f32 %v3200_v29, %v6433_v20  ;;  %1130 = vst [vmem:[#allocation2 + $0x40] sm:$0xff] %v1018_v54  ;;  %2965 = vperm.xlu0 %3055, %v2907_v40   ;;  %1133 = vst [vmem:[#allocation2 + $0x58] sm:$0xff] %v1021_v57  ;;  %v3204_v57 = vld [vmem:[%s7674_s0 + $0x300] sm:$0xff] }
 0x192   :  { %7864 = vst [vmem:[#allocation33_spill] sm:$0xff] %v6628_v33  ;;  %v1019_v33 = vadd.f32 %v938_v37, %v6232_v44  ;;  %v6665_v44 = vmul.f32 %v3198_v12, %v6406_v39  ;;  %1129 = vst [vmem:[#allocation2 + $0x38] sm:$0xff] %v1017_v10  ;;  %2917 = vperm.xlu1 %3054, %v6454_v50   ;;  %v948_v39 = vpop.permute.xlu0 %947  ;;  %v3201_v37 = vld [vmem:[%s7674_s0 + $0x2e8] sm:$0xff]  ;;  %v3202_v12 = vld [vmem:[%s7674_s0 + $0x2f0] sm:$0xff] }
 0x193   :  { %v6687_v35 = vmul.f32 %v3201_v37, %v6433_v20  ;;  %v6693_v9 = vmul.f32 %v3202_v12, %v6433_v20  ;;  %v3203_v50 = vld [vmem:[%s7674_s0 + $0x2f8] sm:$0xff]  ;;  %1132 = vst [vmem:[#allocation2 + $0x50] sm:$0xff] %v1020_v38  ;;  %1134 = vst [vmem:[#allocation2 + $0x60] sm:$0xff] %v1022_v13  ;;  %v1031_v40 = vadd.f32 %v948_v39, %v6314_v48  ;;  %v2886_v12 = vld [vmem:[%s7682_s8 + $0x120] sm:$0xff] }
 0x194   :  { %1131 = vst [vmem:[#allocation2 + $0x48] sm:$0xff] %v1019_v33  ;;  %v6699_v33 = vmul.f32 %v3203_v50, %v6433_v20  ;;  %1135 = vst.msk [vmem:[#allocation2 + $0x68] sm:$0xff] %vm150_vm0, %v1023_v43  ;;  %v1032_v10 = vadd.f32 %v948_v39, %v6320_v26  ;;  %v1033_v54 = vadd.f32 %v948_v39, %v6350_v45  ;;  %v6717_v26 = vpop.permute.xlu1 %800  ;;  %v3206_v43 = vld [vmem:[%s7674_s0 + $0x190] sm:$0xff] }
 0x195   :  { %v1034_v29 = vadd.f32 %v948_v39, %v6383_v61  ;;  %v1035_v37 = vadd.f32 %v948_v39, %v6389_v52  ;;  %v6714_v38 = vmul.f32 %v3204_v57, %v6433_v20  ;;  %v2909_v48 = vsub.f32 %v2889_v7, %v6644_v53  ;;  %1143 = vst [vmem:[#allocation2 + $0xa8] sm:$0xff] %v1031_v40  ;;  %v3205_v52 = vld [vmem:[%s7674_s0 + $0x188] sm:$0xff]  ;;  %v3207_v53 = vld [vmem:[%s7674_s0 + $0x198] sm:$0xff]  ;;  %v3209_v40 = vld [vmem:[%s7674_s0 + $0x1a0] sm:$0xff] }
 0x196   :  { %v1036_v45 = vadd.f32 %v948_v39, %v6395_v41  ;;  %v1037_v61 = vadd.f32 %v948_v39, %v6401_v24  ;;  %v867_v13 = vmul.f32 %v3205_v52, %v6496_v30  ;;  %v868_v50 = vmul.f32 %v3206_v43, %v6496_v30  ;;  %v3208_v24 = vld [vmem:[%s7674_s0 + $0x308] sm:$0xff]  ;;  %1144 = vst [vmem:[#allocation2 + $0xb0] sm:$0xff] %v1032_v10  ;;  %v958_v39 = vpop.permute.xlu0 %957  ;;  %v3215_v43 = vld [vmem:[%s7674_s0 + $0x358] sm:$0xff] }
 0x197   :  { %v869_v41 = vmul.f32 %v3207_v53, %v6496_v30  ;;  %v6737_v7 = vmul.f32 %v3208_v24, %v6433_v20  ;;  %1145 = vst [vmem:[#allocation2 + $0xb8] sm:$0xff] %v1033_v54  ;;  %1146 = vst [vmem:[#allocation2 + $0xc0] sm:$0xff] %v1034_v29  ;;  %2927 = vperm.xlu1 %3054, %v6575_v60   ;;  %v870_v57 = vmul.f32 %v3209_v40, %v6496_v30  ;;  %v3216_v24 = vld [vmem:[%s7674_s0 + $0x360] sm:$0xff]  ;;  %v3217_v40 = vld [vmem:[%s7674_s0 + $0x368] sm:$0xff] }
 0x198   :  { %1147 = vst [vmem:[#allocation2 + $0xc8] sm:$0xff] %v1035_v37  ;;  %2975 = vperm.xlu0 %3055, %v2909_v48   ;;  %1148 = vst [vmem:[#allocation2 + $0xd0] sm:$0xff] %v1036_v45  ;;  %v1045_v20 = vadd.f32 %v958_v39, %v6505_v59  ;;  %v2906_v10 = vsub.f32 %v2886_v12, %v6326_v47  ;;  %v2904_v54 = vmul.f32 %v6456_v5, %v6136_v15  ;;  %v2888_v48 = vld [vmem:[%s7682_s8 + $0x130] sm:$0xff]  ;;  %v3210_v59 = vld [vmem:[%s7674_s0 + $0x1a8] sm:$0xff]  ;;  %v6764_v5 = vpop.permute.xlu1 %810 }
 0x199   :  { %1149 = vst.msk [vmem:[#allocation2 + $0xd8] sm:$0xff] %vm150_vm0, %v1037_v61  ;;  %v1046_v60 = vadd.f32 %v958_v39, %v6511_v49  ;;  %v1047_v29 = vadd.f32 %v958_v39, %v6517_v34  ;;  %v1048_v37 = vadd.f32 %v958_v39, %v6538_v2  ;;  %v1049_v52 = vadd.f32 %v958_v39, %v6544_v27  ;;  %v3211_v15 = vld [vmem:[%s7674_s0 + $0x1b0] sm:$0xff]  ;;  %v3212_v27 = vld [vmem:[%s7674_s0 + $0x1b8] sm:$0xff]  ;;  %v3213_v45 = vld [vmem:[%s7674_s0 + $0x348] sm:$0xff] }
 0x19a   :  { %v871_v47 = vmul.f32 %v3210_v59, %v6496_v30  ;;  %v872_v49 = vmul.f32 %v3211_v15, %v6496_v30  ;;  %v1050_v2 = vadd.f32 %v958_v39, %v6550_v42  ;;  %v1051_v34 = vadd.f32 %v958_v39, %v6558_v28  ;;  %1157 = vst [vmem:[#allocation2 + $0x118] sm:$0xff] %v1045_v20  ;;  %v3214_v42 = vld [vmem:[%s7674_s0 + $0x350] sm:$0xff]  ;;  %v968_v53 = vpop.permute.xlu0 %967 }
 0x19b   :  { %v873_v12 = vmul.f32 %v3212_v27, %v6496_v30  ;;  %v6776_v61 = vmul.f32 %v3213_v45, %v6531_v56  ;;  %v6782_v28 = vmul.f32 %v3214_v42, %v6531_v56  ;;  %v6788_v30 = vmul.f32 %v3215_v43, %v6531_v56  ;;  %1158 = vst [vmem:[#allocation2 + $0x120] sm:$0xff] %v1046_v60  ;;  %v3218_v15 = vld [vmem:[%s7674_s0 + $0x370] sm:$0xff]  ;;  %v3219_v45 = vld [vmem:[%s7674_s0 + $0x378] sm:$0xff] }
 0x19c   :  { %1159 = vst [vmem:[#allocation2 + $0x128] sm:$0xff] %v1047_v29  ;;  %1160 = vst [vmem:[#allocation2 + $0x130] sm:$0xff] %v1048_v37  ;;  %2960 = vperm.xlu1 %3054, %v2906_v10   ;;  %v6794_v39 = vmul.f32 %v3216_v24, %v6531_v56  ;;  %v6800_v20 = vmul.f32 %v3217_v40, %v6531_v56  ;;  %v1059_v60 = vadd.f32 %v968_v53, %v867_v13  ;;  %v933_v13 = vpop.permute.xlu1 %932 }
 0x19d   :  { %1161 = vst [vmem:[#allocation2 + $0x138] sm:$0xff] %v1049_v52  ;;  %1162 = vst [vmem:[#allocation2 + $0x140] sm:$0xff] %v1050_v2  ;;  %v2908_v10 = vsub.f32 %v2888_v48, %v2904_v54  ;;  %v1060_v29 = vadd.f32 %v968_v53, %v868_v50  ;;  %v1061_v37 = vadd.f32 %v968_v53, %v869_v41 }
 0x19e   :  { %1163 = vst.msk [vmem:[#allocation2 + $0x148] sm:$0xff] %vm150_vm0, %v1051_v34  ;;  %v1062_v52 = vadd.f32 %v968_v53, %v870_v57  ;;  %v1063_v59 = vadd.f32 %v968_v53, %v871_v47  ;;  %v6807_v27 = vmul.f32 %v3218_v15, %v6531_v56  ;;  %v6813_v2 = vmul.f32 %v3219_v45, %v6531_v56  ;;  %v978_v34 = vpop.permute.xlu0 %977  ;;  %v7872_v45 = vld [vmem:[#allocation37_spill] sm:$0xff] }
 0x19f   :  { %v1064_v54 = vadd.f32 %v968_v53, %v872_v49  ;;  %v1065_v50 = vadd.f32 %v968_v53, %v873_v12  ;;  %1171 = vst [vmem:[#allocation2 + $0x188] sm:$0xff] %v1059_v60  ;;  %v1010_v41 = vadd.f32 %v933_v13, %v6332_v16  ;;  %v1011_v57 = vadd.f32 %v933_v13, %v6338_v32  ;;  %v7866_v60 = vld [vmem:[#allocation23_spill] sm:$0xff] }
 0x1a0   :  { %v1012_v48 = vadd.f32 %v933_v13, %v6344_v58  ;;  %v1013_v47 = vadd.f32 %v933_v13, %v6356_v19  ;;  %1172 = vst [vmem:[#allocation2 + $0x190] sm:$0xff] %v1060_v29  ;;  %1173 = vst [vmem:[#allocation2 + $0x198] sm:$0xff] %v1061_v37  ;;  %2970 = vperm.xlu1 %3054, %v2908_v10   ;;  %v1014_v56 = vadd.f32 %v933_v13, %v6362_v1  ;;  %v7867_v29 = vld [vmem:[#allocation16_spill] sm:$0xff]  ;;  %v7868_v37 = vld [vmem:[#allocation17_spill] sm:$0xff] }
 0x1a1   :  { %1174 = vst [vmem:[#allocation2 + $0x1a0] sm:$0xff] %v1062_v52  ;;  %1175 = vst [vmem:[#allocation2 + $0x1a8] sm:$0xff] %v1063_v59  ;;  %v1015_v49 = vadd.f32 %v933_v13, %v6368_v63  ;;  %v1016_v12 = vadd.f32 %v933_v13, %v6374_v23  ;;  %v1073_v16 = vadd.f32 %v978_v34, %v6462_v51  ;;  %v3220_v63 = vld [vmem:[%s7674_s0 + $0x1c0] sm:$0xff]  ;;  %v3221_v51 = vld [vmem:[%s7674_s0 + $0x1c8] sm:$0xff] }
 0x1a2   :  { %1176 = vst [vmem:[#allocation2 + $0x1b0] sm:$0xff] %v1064_v54  ;;  %1177 = vst.msk [vmem:[#allocation2 + $0x1b8] sm:$0xff] %vm150_vm0, %v1065_v50  ;;  %v1074_v32 = vadd.f32 %v978_v34, %v6468_v21  ;;  %v1075_v58 = vadd.f32 %v978_v34, %v6474_v14  ;;  %v1076_v19 = vadd.f32 %v978_v34, %v6480_v31  ;;  %v943_v21 = vpop.permute.xlu1 %942  ;;  %v988_v40 = vpop.permute.xlu0 %987  ;;  %v7871_v59 = vld [vmem:[#allocation28_spill] sm:$0xff]  ;;  %v3222_v54 = vld [vmem:[%s7674_s0 + $0x1d0] sm:$0xff] }
 0x1a3   :  { %1122 = vst [vmem:[#allocation2] sm:$0xff] %v1010_v41  ;;  %1123 = vst [vmem:[#allocation2 + $0x8] sm:$0xff] %v1011_v57  ;;  %v1077_v1 = vadd.f32 %v978_v34, %v6486_v4  ;;  %v6832_v23 = vmul.f32 %v3220_v63, %v6595_v18  ;;  %v6838_v42 = vmul.f32 %v3221_v51, %v6595_v18  ;;  %v3223_v41 = vld [vmem:[%s7674_s0 + $0x1d8] sm:$0xff] }
 0x1a4   :  { %1124 = vst [vmem:[#allocation2 + $0x10] sm:$0xff] %v1012_v48  ;;  %1125 = vst [vmem:[#allocation2 + $0x18] sm:$0xff] %v1013_v47  ;;  %v1078_v14 = vadd.f32 %v978_v34, %v6492_v25  ;;  %v1079_v31 = vadd.f32 %v978_v34, %v6523_v8  ;;  %v1024_v4 = vadd.f32 %v943_v21, %v6270_v11  ;;  %v7869_v11 = vld [vmem:[#allocation31_spill] sm:$0xff]  ;;  %v7873_v48 = vld [vmem:[#allocation32_spill] sm:$0xff] }
 0x1a5   :  { %1126 = vst [vmem:[#allocation2 + $0x20] sm:$0xff] %v1014_v56  ;;  %1127 = vst [vmem:[#allocation2 + $0x28] sm:$0xff] %v1015_v49  ;;  %v1025_v43 = vadd.f32 %v943_v21, %v6276_v3  ;;  %v1026_v53 = vadd.f32 %v943_v21, %v6282_v22  ;;  %v1027_v24 = vadd.f32 %v943_v21, %v6288_v55  ;;  %v7870_v55 = vld [vmem:[#allocation27_spill] sm:$0xff]  ;;  %v7874_v34 = vld [vmem:[#allocation38_spill] sm:$0xff] }
 0x1a6   :  { %1128 = vst.msk [vmem:[#allocation2 + $0x30] sm:$0xff] %vm150_vm0, %v1016_v12  ;;  %1185 = vst [vmem:[#allocation2 + $0x1f8] sm:$0xff] %v1073_v16  ;;  %v1028_v10 = vadd.f32 %v943_v21, %v7866_v60  ;;  %v1029_v25 = vadd.f32 %v943_v21, %v7867_v29  ;;  %v1030_v8 = vadd.f32 %v943_v21, %v7868_v37  ;;  %v7875_v49 = vld [vmem:[#allocation19_spill] sm:$0xff]  ;;  %v7876_v16 = vld [vmem:[#allocation24_spill] sm:$0xff]  ;;  %v998_v51 = vpop.permute.xlu0 %997 }
 0x1a7   :  { %1186 = vst [vmem:[#allocation2 + $0x200] sm:$0xff] %v1074_v32  ;;  %1187 = vst [vmem:[#allocation2 + $0x208] sm:$0xff] %v1075_v58  ;;  %v1087_v3 = vadd.f32 %v988_v40, %v7869_v11  ;;  %v1088_v22 = vadd.f32 %v988_v40, %v6570_v62  ;;  %v1089_v52 = vadd.f32 %v988_v40, %v7870_v55  ;;  %v953_v62 = vpop.permute.xlu1 %952  ;;  %v7877_v58 = vld [vmem:[#allocation20_spill] sm:$0xff]  ;;  %v7879_v21 = vld [vmem:[#allocation22_spill] sm:$0xff] }
 0x1a8   :  { %1188 = vst [vmem:[#allocation2 + $0x210] sm:$0xff] %v1076_v19  ;;  %1189 = vst [vmem:[#allocation2 + $0x218] sm:$0xff] %v1077_v1  ;;  %v1090_v15 = vadd.f32 %v988_v40, %v7871_v59  ;;  %v1091_v13 = vadd.f32 %v988_v40, %v7872_v45  ;;  %v6860_v50 = vmul.f32 %v3222_v54, %v6595_v18  ;;  %v7878_v1 = vld [vmem:[#allocation21_spill] sm:$0xff]  ;;  %v7885_v59 = vld [vmem:[#allocation34_spill] sm:$0xff] }
 0x1a9   :  { %1190 = vst [vmem:[#allocation2 + $0x220] sm:$0xff] %v1078_v14  ;;  %1191 = vst.msk [vmem:[#allocation2 + $0x228] sm:$0xff] %vm150_vm0, %v1079_v31  ;;  %v6866_v57 = vmul.f32 %v3223_v41, %v6595_v18  ;;  %v1092_v47 = vadd.f32 %v988_v40, %v7873_v48  ;;  %v1093_v56 = vadd.f32 %v988_v40, %v7874_v34  ;;  %v7880_v31 = vld [vmem:[#allocation25_spill] sm:$0xff] }
 0x1aa   :  { %1136 = vst [vmem:[#allocation2 + $0x70] sm:$0xff] %v1024_v4  ;;  %1137 = vst [vmem:[#allocation2 + $0x78] sm:$0xff] %v1025_v43  ;;  %v1038_v12 = vadd.f32 %v953_v62, %v7875_v49  ;;  %v1039_v32 = vadd.f32 %v953_v62, %v7876_v16  ;;  %v1040_v19 = vadd.f32 %v953_v62, %v7877_v58  ;;  %v7881_v43 = vld [vmem:[#allocation26_spill] sm:$0xff]  ;;  %v7884_v55 = vld [vmem:[#allocation33_spill] sm:$0xff]  ;;  %v1008_v45 = vpop.permute.xlu0 %1007 }
 0x1ab   :  { %1138 = vst [vmem:[#allocation2 + $0x80] sm:$0xff] %v1026_v53  ;;  %1139 = vst [vmem:[#allocation2 + $0x88] sm:$0xff] %v1027_v24  ;;  %v1041_v63 = vadd.f32 %v953_v62, %v7878_v1  ;;  %v1042_v14 = vadd.f32 %v953_v62, %v7879_v21  ;;  %v1043_v4 = vadd.f32 %v953_v62, %v7880_v31  ;;  %v3231_v58 = vld [vmem:[%s7674_s0 + $0x250] sm:$0xff]  ;;  %v3232_v1 = vld [vmem:[%s7674_s0 + $0x258] sm:$0xff] }
 0x1ac   :  { %1140 = vst [vmem:[#allocation2 + $0x90] sm:$0xff] %v1028_v10  ;;  %1141 = vst [vmem:[#allocation2 + $0x98] sm:$0xff] %v1029_v25  ;;  %v1044_v53 = vadd.f32 %v953_v62, %v7881_v43  ;;  %v1101_v24 = vadd.f32 %v998_v51, %v6671_v46  ;;  %v1102_v40 = vadd.f32 %v998_v51, %v6677_v6  ;;  %v3224_v25 = vld [vmem:[%s7674_s0 + $0x1e0] sm:$0xff]  ;;  %v3225_v46 = vld [vmem:[%s7674_s0 + $0x1e8] sm:$0xff]  ;;  %v963_v6 = vpop.permute.xlu1 %962 }
 0x1ad   :  { %1142 = vst.msk [vmem:[#allocation2 + $0xa0] sm:$0xff] %vm150_vm0, %v1030_v8  ;;  %1199 = vst [vmem:[#allocation2 + $0x268] sm:$0xff] %v1087_v3  ;;  %v1103_v60 = vadd.f32 %v998_v51, %v6687_v35  ;;  %v1104_v10 = vadd.f32 %v998_v51, %v6693_v9  ;;  %v1105_v29 = vadd.f32 %v998_v51, %v6699_v33  ;;  %v7882_v33 = vld [vmem:[#allocation29_spill] sm:$0xff]  ;;  %v7883_v3 = vld [vmem:[#allocation30_spill] sm:$0xff] }
 0x1ae   :  { %1200 = vst [vmem:[#allocation2 + $0x270] sm:$0xff] %v1088_v22  ;;  %1201 = vst [vmem:[#allocation2 + $0x278] sm:$0xff] %v1089_v52  ;;  %v878_v37 = vmul.f32 %v3224_v25, %v6595_v18  ;;  %v879_v8 = vmul.f32 %v3225_v46, %v6595_v18  ;;  %v1106_v35 = vadd.f32 %v998_v51, %v6714_v38  ;;  %v6923_v49 = vpop.permute.xlu0 %1412 }
 0x1af   :  { %1202 = vst [vmem:[#allocation2 + $0x280] sm:$0xff] %v1090_v15  ;;  %1203 = vst [vmem:[#allocation2 + $0x288] sm:$0xff] %v1091_v13  ;;  %v1107_v9 = vadd.f32 %v998_v51, %v6737_v7  ;;  %v1052_v11 = vadd.f32 %v963_v6, %v7882_v33  ;;  %v1053_v22 = vadd.f32 %v963_v6, %v7883_v3  ;;  %v3233_v51 = vld [vmem:[%s7674_s0 + $0x260] sm:$0xff] }
 0x1b0   :  { %1204 = vst [vmem:[#allocation2 + $0x290] sm:$0xff] %v1092_v47  ;;  %1205 = vst.msk [vmem:[#allocation2 + $0x298] sm:$0xff] %vm150_vm0, %v1093_v56  ;;  %v1054_v52 = vadd.f32 %v963_v6, %v7884_v55  ;;  %v1055_v15 = vadd.f32 %v963_v6, %v7885_v59  ;;  %v1056_v13 = vadd.f32 %v963_v6, %v6640_v17 }
 0x1b1   :  { %1150 = vst [vmem:[#allocation2 + $0xe0] sm:$0xff] %v1038_v12  ;;  %1151 = vst [vmem:[#allocation2 + $0xe8] sm:$0xff] %v1039_v32  ;;  %v1057_v38 = vadd.f32 %v963_v6, %v6659_v0  ;;  %v1058_v7 = vadd.f32 %v963_v6, %v6665_v44  ;;  %v1115_v54 = vadd.f32 %v1008_v45, %v6776_v61  ;;  %v3226_v0 = vld [vmem:[%s7674_s0 + $0x1f0] sm:$0xff] }
 0x1b2   :  { %1152 = vst [vmem:[#allocation2 + $0xf0] sm:$0xff] %v1040_v19  ;;  %1153 = vst [vmem:[#allocation2 + $0xf8] sm:$0xff] %v1041_v63  ;;  %v1116_v41 = vadd.f32 %v1008_v45, %v6782_v28  ;;  %v1117_v62 = vadd.f32 %v1008_v45, %v6788_v30  ;;  %v1118_v48 = vadd.f32 %v1008_v45, %v6794_v39  ;;  %v3227_v61 = vld [vmem:[%s7674_s0 + $0x230] sm:$0xff]  ;;  %v973_v28 = vpop.permute.xlu1 %972  ;;  %v1428_v25 = vpop.permute.xlu0 %1427 }
 0x1b3   :  { %1154 = vst [vmem:[#allocation2 + $0x100] sm:$0xff] %v1042_v14  ;;  %1155 = vst [vmem:[#allocation2 + $0x108] sm:$0xff] %v1043_v4  ;;  %v1119_v17 = vadd.f32 %v1008_v45, %v6800_v20  ;;  %v880_v44 = vmul.f32 %v3226_v0, %v6595_v18  ;;  %v888_v47 = vmul.f32 %v3227_v61, %v6649_v36  ;;  %v3234_v14 = vld [vmem:[%s7674_s0 + $0x2a0] sm:$0xff]  ;;  %v3235_v4 = vld [vmem:[%s7674_s0 + $0x2a8] sm:$0xff] }
 0x1b4   :  { %1156 = vst.msk [vmem:[#allocation2 + $0x110] sm:$0xff] %vm150_vm0, %v1044_v53  ;;  %1213 = vst [vmem:[#allocation2 + $0x2d8] sm:$0xff] %v1101_v24  ;;  %v1120_v30 = vadd.f32 %v1008_v45, %v6807_v27  ;;  %v1121_v39 = vadd.f32 %v1008_v45, %v6813_v2  ;;  %v1066_v20 = vadd.f32 %v973_v28, %v6832_v23  ;;  %v3228_v27 = vld [vmem:[%s7674_s0 + $0x238] sm:$0xff]  ;;  %v3236_v53 = vld [vmem:[%s7674_s0 + $0x2b0] sm:$0xff] }
 0x1b5   :  { %1214 = vst [vmem:[#allocation2 + $0x2e0] sm:$0xff] %v1102_v40  ;;  %1215 = vst [vmem:[#allocation2 + $0x2e8] sm:$0xff] %v1103_v60  ;;  %v1067_v18 = vadd.f32 %v973_v28, %v6838_v42  ;;  %v1068_v34 = vadd.f32 %v973_v28, %v6860_v50  ;;  %v1069_v56 = vadd.f32 %v973_v28, %v6866_v57  ;;  %v3229_v42 = vld [vmem:[%s7674_s0 + $0x240] sm:$0xff]  ;;  %v3230_v57 = vld [vmem:[%s7674_s0 + $0x248] sm:$0xff] }
 0x1b6   :  { %1216 = vst [vmem:[#allocation2 + $0x2f0] sm:$0xff] %v1104_v10  ;;  %1217 = vst [vmem:[#allocation2 + $0x2f8] sm:$0xff] %v1105_v29  ;;  %v889_v2 = vmul.f32 %v3228_v27, %v6649_v36  ;;  %v1070_v12 = vadd.f32 %v973_v28, %v878_v37  ;;  %v1071_v23 = vadd.f32 %v973_v28, %v879_v8  ;;  %v3237_v37 = vld [vmem:[%s7674_s0 + $0x2b8] sm:$0xff]  ;;  %v7000_v61 = vpop.permute.xlu0 %1465 }
 0x1b7   :  { %1218 = vst [vmem:[#allocation2 + $0x300] sm:$0xff] %v1106_v35  ;;  %1219 = vst.msk [vmem:[#allocation2 + $0x308] sm:$0xff] %vm150_vm0, %v1107_v9  ;;  %v1072_v16 = vadd.f32 %v973_v28, %v880_v44  ;;  %v890_v50 = vmul.f32 %v3229_v42, %v6649_v36  ;;  %v891_v32 = vmul.f32 %v3230_v57, %v6649_v36  ;;  %v3238_v9 = vld [vmem:[%s7674_s0 + $0x2c0] sm:$0xff] }
 0x1b8   :  { %1164 = vst [vmem:[#allocation2 + $0x150] sm:$0xff] %v1052_v11  ;;  %1165 = vst [vmem:[#allocation2 + $0x158] sm:$0xff] %v1053_v22  ;;  %v892_v19 = vmul.f32 %v3231_v58, %v6649_v36  ;;  %v893_v63 = vmul.f32 %v3232_v1, %v6649_v36  ;;  %v894_v21 = vmul.f32 %v3233_v51, %v6649_v36  ;;  %v983_v36 = vpop.permute.xlu1 %982  ;;  %v3239_v11 = vld [vmem:[%s7674_s0 + $0x2c8] sm:$0xff]  ;;  %v3240_v22 = vld [vmem:[%s7674_s0 + $0x2d0] sm:$0xff] }
 0x1b9   :  { %1166 = vst [vmem:[#allocation2 + $0x160] sm:$0xff] %v1054_v52  ;;  %1167 = vst [vmem:[#allocation2 + $0x168] sm:$0xff] %v1055_v15  ;;  %v902_v31 = vmul.f32 %v3234_v14, %v6717_v26  ;;  %v903_v43 = vmul.f32 %v3235_v4, %v6717_v26  ;;  %v904_v24 = vmul.f32 %v3236_v53, %v6717_v26  ;;  %v3241_v52 = vld [vmem:[%s7674_s0 + $0x310] sm:$0xff]  ;;  %v3242_v15 = vld [vmem:[%s7674_s0 + $0x318] sm:$0xff] }
 0x1ba   :  { %1168 = vst [vmem:[#allocation2 + $0x170] sm:$0xff] %v1056_v13  ;;  %1169 = vst [vmem:[#allocation2 + $0x178] sm:$0xff] %v1057_v38  ;;  %v1080_v40 = vadd.f32 %v983_v36, %v888_v47  ;;  %v1081_v60 = vadd.f32 %v983_v36, %v889_v2  ;;  %v1082_v10 = vadd.f32 %v983_v36, %v890_v50  ;;  %v3244_v38 = vld [vmem:[%s7674_s0 + $0x328] sm:$0xff]  ;;  %v3246_v47 = vld [vmem:[%s7674_s0 + $0x338] sm:$0xff]  ;;  %v1476_v4 = vpop.permute.xlu0 %1475 }
 0x1bb   :  { %1170 = vst.msk [vmem:[#allocation2 + $0x180] sm:$0xff] %vm150_vm0, %v1058_v7  ;;  %1227 = vst [vmem:[#allocation2 + $0x348] sm:$0xff] %v1115_v54  ;;  %v1083_v29 = vadd.f32 %v983_v36, %v891_v32  ;;  %v905_v46 = vmul.f32 %v3237_v37, %v6717_v26  ;;  %v1084_v8 = vadd.f32 %v983_v36, %v892_v19  ;;  %v3245_v54 = vld [vmem:[%s7674_s0 + $0x330] sm:$0xff]  ;;  %v3252_v50 = vld [vmem:[%s7675_s1 + $0xc8] sm:$0xff] }
 0x1bc   :  { %1228 = vst [vmem:[#allocation2 + $0x350] sm:$0xff] %v1116_v41  ;;  %1229 = vst [vmem:[#allocation2 + $0x358] sm:$0xff] %v1117_v62  ;;  %v1085_v6 = vadd.f32 %v983_v36, %v893_v63  ;;  %v1086_v35 = vadd.f32 %v983_v36, %v894_v21  ;;  %v906_v33 = vmul.f32 %v3238_v9, %v6717_v26  ;;  %v993_v62 = vpop.permute.xlu1 %992  ;;  %v3249_v2 = vld [vmem:[%s7675_s1 + $0xb0] sm:$0xff]  ;;  %v3254_v19 = vld [vmem:[%s7675_s1 + $0xd8] sm:$0xff] }
 0x1bd   :  { %1230 = vst [vmem:[#allocation2 + $0x360] sm:$0xff] %v1118_v48  ;;  %1231 = vst [vmem:[#allocation2 + $0x368] sm:$0xff] %v1119_v17  ;;  %v907_v3 = vmul.f32 %v3239_v11, %v6717_v26  ;;  %v908_v55 = vmul.f32 %v3240_v22, %v6717_v26  ;;  %v916_v59 = vmul.f32 %v3241_v52, %v6764_v5  ;;  %v3243_v26 = vld [vmem:[%s7674_s0 + $0x320] sm:$0xff]  ;;  %v3253_v32 = vld [vmem:[%s7675_s1 + $0xd0] sm:$0xff] }
 0x1be   :  { %1232 = vst [vmem:[#allocation2 + $0x370] sm:$0xff] %v1120_v30  ;;  %1233 = vst.msk [vmem:[#allocation2 + $0x378] sm:$0xff] %vm150_vm0, %v1121_v39  ;;  %v917_v45 = vmul.f32 %v3242_v15, %v6764_v5  ;;  %v918_v13 = vmul.f32 %v3243_v26, %v6764_v5  ;;  %v919_v7 = vmul.f32 %v3244_v38, %v6764_v5  ;;  %v3259_v52 = vld [vmem:[%s7675_s1 + $0x58] sm:$0xff]  ;;  %v3260_v15 = vld [vmem:[%s7675_s1 + $0x60] sm:$0xff] }
 0x1bf   :  { %1178 = vst [vmem:[#allocation2 + $0x1c0] sm:$0xff] %v1066_v20  ;;  %1179 = vst [vmem:[#allocation2 + $0x1c8] sm:$0xff] %v1067_v18  ;;  %v920_v41 = vmul.f32 %v3245_v54, %v6764_v5  ;;  %v1094_v48 = vadd.f32 %v993_v62, %v902_v31  ;;  %v1095_v17 = vadd.f32 %v993_v62, %v903_v43  ;;  %v3247_v18 = vld [vmem:[%s7674_s0 + $0x340] sm:$0xff]  ;;  %v3261_v26 = vld [vmem:[%s7675_s1 + $0x68] sm:$0xff] }
 0x1c0   :  { %1180 = vst [vmem:[#allocation2 + $0x1d0] sm:$0xff] %v1068_v34  ;;  %1181 = vst [vmem:[#allocation2 + $0x1d8] sm:$0xff] %v1069_v56  ;;  %v1096_v0 = vadd.f32 %v993_v62, %v904_v24  ;;  %v1097_v44 = vadd.f32 %v993_v62, %v905_v46  ;;  %v921_v28 = vmul.f32 %v3246_v47, %v6764_v5  ;;  %v3248_v56 = vld [vmem:[%s7675_s1 + $0xa8] sm:$0xff]  ;;  %v1003_v63 = vpop.permute.xlu1 %1002  ;;  %v3262_v47 = vld [vmem:[%s7675_s1] sm:$0xff] }
 0x1c1   :  { %1182 = vst [vmem:[#allocation2 + $0x1e0] sm:$0xff] %v1070_v12  ;;  %1183 = vst [vmem:[#allocation2 + $0x1e8] sm:$0xff] %v1071_v23  ;;  %v1098_v30 = vadd.f32 %v993_v62, %v906_v33  ;;  %v1099_v39 = vadd.f32 %v993_v62, %v907_v3  ;;  %v1100_v20 = vadd.f32 %v993_v62, %v908_v55  ;;  %v3250_v23 = vld [vmem:[%s7675_s1 + $0xb8] sm:$0xff]  ;;  %v3257_v33 = vld [vmem:[%s7675_s1 + $0x48] sm:$0xff]  ;;  %v7045_v55 = vpop.permute.xlu0 %1712 }
 0x1c2   :  { %1184 = vst.msk [vmem:[#allocation2 + $0x1f0] sm:$0xff] %vm150_vm0, %v1072_v16  ;;  %1192 = vst [vmem:[#allocation2 + $0x230] sm:$0xff] %v1080_v40  ;;  %v922_v34 = vmul.f32 %v3247_v18, %v6764_v5  ;;  %v1451_v27 = vmul.f32 %v3248_v56, %v1428_v25  ;;  %v1452_v12 = vmul.f32 %v3249_v2, %v1428_v25  ;;  %v3251_v5 = vld [vmem:[%s7675_s1 + $0xc0] sm:$0xff]  ;;  %v3258_v3 = vld [vmem:[%s7675_s1 + $0x50] sm:$0xff] }
 0x1c3   :  { %1193 = vst [vmem:[#allocation2 + $0x238] sm:$0xff] %v1081_v60  ;;  %1194 = vst [vmem:[#allocation2 + $0x240] sm:$0xff] %v1082_v10  ;;  %v1453_v16 = vmul.f32 %v3250_v23, %v1428_v25  ;;  %v1454_v42 = vmul.f32 %v3251_v5, %v1428_v25  ;;  %v1455_v57 = vmul.f32 %v3252_v50, %v1428_v25  ;;  %v3265_v18 = vld [vmem:[%s7675_s1 + $0x18] sm:$0xff]  ;;  %v3266_v56 = vld [vmem:[%s7675_s1 + $0x20] sm:$0xff] }
 0x1c4   :  { %1195 = vst [vmem:[#allocation2 + $0x248] sm:$0xff] %v1083_v29  ;;  %1196 = vst [vmem:[#allocation2 + $0x250] sm:$0xff] %v1084_v8  ;;  %v1456_v58 = vmul.f32 %v3253_v32, %v1428_v25  ;;  %v1457_v1 = vmul.f32 %v3254_v19, %v1428_v25  ;;  %v1108_v51 = vadd.f32 %v1003_v63, %v916_v59  ;;  %v1418_v25 = vpop.permute.xlu1 %1417  ;;  %v3255_v8 = vld [vmem:[%s7675_s1 + $0x38] sm:$0xff]  ;;  %v3267_v2 = vld [vmem:[%s7675_s1 + $0x28] sm:$0xff] }
 0x1c5   :  { %1197 = vst [vmem:[#allocation2 + $0x258] sm:$0xff] %v1085_v6  ;;  %1198 = vst.msk [vmem:[#allocation2 + $0x260] sm:$0xff] %vm150_vm0, %v1086_v35  ;;  %v1109_v21 = vadd.f32 %v1003_v63, %v917_v45  ;;  %v1110_v14 = vadd.f32 %v1003_v63, %v918_v13  ;;  %v1111_v31 = vadd.f32 %v1003_v63, %v919_v7  ;;  %v3256_v35 = vld [vmem:[%s7675_s1 + $0x40] sm:$0xff]  ;;  %v3268_v23 = vld [vmem:[%s7675_s1 + $0x30] sm:$0xff] }
 0x1c6   :  { %1206 = vst [vmem:[#allocation2 + $0x2a0] sm:$0xff] %v1094_v48  ;;  %1207 = vst [vmem:[#allocation2 + $0x2a8] sm:$0xff] %v1095_v17  ;;  %v1112_v43 = vadd.f32 %v1003_v63, %v920_v41  ;;  %v1113_v53 = vadd.f32 %v1003_v63, %v921_v28  ;;  %v1114_v24 = vadd.f32 %v1003_v63, %v922_v34  ;;  %v3269_v5 = vld [vmem:[%s7675_s1 + $0x70] sm:$0xff]  ;;  %v3270_v50 = vld [vmem:[%s7675_s1 + $0x78] sm:$0xff] }
 0x1c7   :  { %1208 = vst [vmem:[#allocation2 + $0x2b0] sm:$0xff] %v1096_v0  ;;  %1209 = vst [vmem:[#allocation2 + $0x2b8] sm:$0xff] %v1097_v44  ;;  %v1499_v36 = vadd.f32 %v1476_v4, %v1451_v27  ;;  %v1500_v40 = vadd.f32 %v1476_v4, %v1452_v12  ;;  %v1501_v60 = vadd.f32 %v1476_v4, %v1453_v16  ;;  %v1728_v44 = vpop.permute.xlu0 %1727  ;;  %v3271_v32 = vld [vmem:[%s7675_s1 + $0x80] sm:$0xff]  ;;  %v3272_v19 = vld [vmem:[%s7675_s1 + $0x88] sm:$0xff] }
 0x1c8   :  { %1210 = vst [vmem:[#allocation2 + $0x2c0] sm:$0xff] %v1098_v30  ;;  %1211 = vst [vmem:[#allocation2 + $0x2c8] sm:$0xff] %v1099_v39  ;;  %v1502_v10 = vadd.f32 %v1476_v4, %v1454_v42  ;;  %v1503_v29 = vadd.f32 %v1476_v4, %v1455_v57  ;;  %v1504_v37 = vadd.f32 %v1476_v4, %v1456_v58  ;;  %v1423_v0 = vpop.permute.xlu1 %1422  ;;  %v3263_v30 = vld [vmem:[%s7675_s1 + $0x8] sm:$0xff] }
 0x1c9   :  { %1212 = vst.msk [vmem:[#allocation2 + $0x2d0] sm:$0xff] %vm150_vm0, %v1100_v20  ;;  %1220 = vst [vmem:[#allocation2 + $0x310] sm:$0xff] %v1108_v51  ;;  %v1505_v46 = vadd.f32 %v1476_v4, %v1457_v1  ;;  %v1437_v6 = vmul.f32 %v3255_v8, %v1418_v25  ;;  %v1438_v9 = vmul.f32 %v3256_v35, %v1418_v25  ;;  %v3273_v1 = vld [vmem:[%s7675_s1 + $0x90] sm:$0xff] }
 0x1ca   :  { %1221 = vst [vmem:[#allocation2 + $0x318] sm:$0xff] %v1109_v21  ;;  %1222 = vst [vmem:[#allocation2 + $0x320] sm:$0xff] %v1110_v14  ;;  %v1439_v11 = vmul.f32 %v3257_v33, %v1418_v25  ;;  %v1440_v22 = vmul.f32 %v3258_v3, %v1418_v25  ;;  %v1441_v59 = vmul.f32 %v3259_v52, %v1418_v25 }
 0x1cb   :  { %1223 = vst [vmem:[#allocation2 + $0x328] sm:$0xff] %v1111_v31  ;;  %1224 = vst [vmem:[#allocation2 + $0x330] sm:$0xff] %v1112_v43  ;;  %v1442_v45 = vmul.f32 %v3260_v15, %v1418_v25  ;;  %v1443_v13 = vmul.f32 %v3261_v26, %v1418_v25  ;;  %v1485_v38 = vadd.f32 %v7000_v61, %v1437_v6  ;;  %v7108_v43 = vpop.permute.xlu0 %1765  ;;  %v3276_v25 = vld [vmem:[%s7676_s2 + $0xa8] sm:$0xff]  ;;  %v3278_v6 = vld [vmem:[%s7676_s2 + $0xb8] sm:$0xff] }
 0x1cc   :  { %1225 = vst [vmem:[#allocation2 + $0x338] sm:$0xff] %v1113_v53  ;;  %1226 = vst.msk [vmem:[#allocation2 + $0x340] sm:$0xff] %vm150_vm0, %v1114_v24  ;;  %v1486_v7 = vadd.f32 %v7000_v61, %v1438_v9  ;;  %v1487_v54 = vadd.f32 %v7000_v61, %v1439_v11  ;;  %v1488_v41 = vadd.f32 %v7000_v61, %v1440_v22  ;;  %v1461_v51 = vpop.permute.xlu1 %1460  ;;  %v3274_v53 = vld [vmem:[%s7675_s1 + $0x98] sm:$0xff]  ;;  %v3279_v9 = vld [vmem:[%s7676_s2 + $0xc0] sm:$0xff] }
 0x1cd   :  { %1527 = vst [vmem:[#allocation2 + $0x428] sm:$0xff] %v1499_v36  ;;  %1528 = vst [vmem:[#allocation2 + $0x430] sm:$0xff] %v1500_v40  ;;  %v1489_v62 = vadd.f32 %v7000_v61, %v1441_v59  ;;  %v1490_v48 = vadd.f32 %v7000_v61, %v1442_v45  ;;  %v1491_v17 = vadd.f32 %v7000_v61, %v1443_v13  ;;  %v3264_v61 = vld [vmem:[%s7675_s1 + $0x10] sm:$0xff]  ;;  %v3280_v11 = vld [vmem:[%s7676_s2 + $0xc8] sm:$0xff] }
 0x1ce   :  { %1529 = vst [vmem:[#allocation2 + $0x438] sm:$0xff] %v1501_v60  ;;  %1530 = vst [vmem:[#allocation2 + $0x440] sm:$0xff] %v1502_v10  ;;  %v1430_v28 = vmul.f32 %v3262_v47, %v6923_v49  ;;  %v1431_v39 = vmul.f32 %v3263_v30, %v6923_v49  ;;  %v1432_v20 = vmul.f32 %v3264_v61, %v6923_v49  ;;  %v3275_v10 = vld [vmem:[%s7675_s1 + $0xa0] sm:$0xff]  ;;  %v3281_v22 = vld [vmem:[%s7676_s2 + $0xd0] sm:$0xff] }
 0x1cf   :  { %1531 = vst [vmem:[#allocation2 + $0x448] sm:$0xff] %v1503_v29  ;;  %1532 = vst [vmem:[#allocation2 + $0x450] sm:$0xff] %v1504_v37  ;;  %v1433_v34 = vmul.f32 %v3265_v18, %v6923_v49  ;;  %v1434_v27 = vmul.f32 %v3266_v56, %v6923_v49  ;;  %v1435_v12 = vmul.f32 %v3267_v2, %v6923_v49  ;;  %v3282_v59 = vld [vmem:[%s7676_s2 + $0xd8] sm:$0xff] }
 0x1d0   :  { %1533 = vst.msk [vmem:[#allocation2 + $0x458] sm:$0xff] %vm150_vm0, %v1505_v46  ;;  %1513 = vst [vmem:[#allocation2 + $0x3b8] sm:$0xff] %v1485_v38  ;;  %v1436_v16 = vmul.f32 %v3268_v23, %v6923_v49  ;;  %v1444_v42 = vmul.f32 %v3269_v5, %v1423_v0  ;;  %v1445_v57 = vmul.f32 %v3270_v50, %v1423_v0  ;;  %v3277_v46 = vld [vmem:[%s7676_s2 + $0xb0] sm:$0xff]  ;;  %v1471_v45 = vpop.permute.xlu1 %1470  ;;  %v3287_v5 = vld [vmem:[%s7676_s2 + $0x58] sm:$0xff] }
 0x1d1   :  { %1514 = vst [vmem:[#allocation2 + $0x3c0] sm:$0xff] %v1486_v7  ;;  %1515 = vst [vmem:[#allocation2 + $0x3c8] sm:$0xff] %v1487_v54  ;;  %v1446_v58 = vmul.f32 %v3271_v32, %v1423_v0  ;;  %v1447_v49 = vmul.f32 %v3272_v19, %v1423_v0  ;;  %v1448_v63 = vmul.f32 %v3273_v1, %v1423_v0  ;;  %v1776_v54 = vpop.permute.xlu0 %1775  ;;  %v3288_v50 = vld [vmem:[%s7676_s2 + $0x60] sm:$0xff]  ;;  %v3289_v32 = vld [vmem:[%s7676_s2 + $0x68] sm:$0xff] }
 0x1d2   :  { %1516 = vst [vmem:[#allocation2 + $0x3d0] sm:$0xff] %v1488_v41  ;;  %1517 = vst [vmem:[#allocation2 + $0x3d8] sm:$0xff] %v1489_v62  ;;  %v1478_v21 = vadd.f32 %v1461_v51, %v1430_v28  ;;  %v1479_v14 = vadd.f32 %v1461_v51, %v1431_v39  ;;  %v1480_v31 = vadd.f32 %v1461_v51, %v1432_v20  ;;  %v3283_v20 = vld [vmem:[%s7676_s2 + $0x38] sm:$0xff] }
 0x1d3   :  { %1518 = vst [vmem:[#allocation2 + $0x3e0] sm:$0xff] %v1490_v48  ;;  %1519 = vst.msk [vmem:[#allocation2 + $0x3e8] sm:$0xff] %vm150_vm0, %v1491_v17  ;;  %v1481_v4 = vadd.f32 %v1461_v51, %v1433_v34  ;;  %v1449_v24 = vmul.f32 %v3274_v53, %v1423_v0  ;;  %v1482_v36 = vadd.f32 %v1461_v51, %v1434_v27  ;;  %v3284_v34 = vld [vmem:[%s7676_s2 + $0x40] sm:$0xff]  ;;  %v3285_v27 = vld [vmem:[%s7676_s2 + $0x48] sm:$0xff] }
 0x1d4   :  { %v1483_v40 = vadd.f32 %v1461_v51, %v1435_v12  ;;  %v1484_v60 = vadd.f32 %v1461_v51, %v1436_v16  ;;  %v1450_v29 = vmul.f32 %v3275_v10, %v1423_v0  ;;  %1506 = vst [vmem:[#allocation2 + $0x380] sm:$0xff] %v1478_v21  ;;  %1507 = vst [vmem:[#allocation2 + $0x388] sm:$0xff] %v1479_v14  ;;  %v3286_v12 = vld [vmem:[%s7676_s2 + $0x50] sm:$0xff]  ;;  %v3290_v53 = vld [vmem:[%s7676_s2] sm:$0xff] }
 0x1d5   :  { %1508 = vst [vmem:[#allocation2 + $0x390] sm:$0xff] %v1480_v31  ;;  %1509 = vst [vmem:[#allocation2 + $0x398] sm:$0xff] %v1481_v4  ;;  %v1751_v37 = vmul.f32 %v3276_v25, %v1728_v44  ;;  %v1752_v8 = vmul.f32 %v3277_v46, %v1728_v44  ;;  %v1753_v35 = vmul.f32 %v3278_v6, %v1728_v44  ;;  %v7151_v16 = vpop.permute.xlu0 %2012  ;;  %v3293_v10 = vld [vmem:[%s7676_s2 + $0x18] sm:$0xff]  ;;  %v3294_v25 = vld [vmem:[%s7676_s2 + $0x20] sm:$0xff] }
 0x1d6   :  { %1510 = vst [vmem:[#allocation2 + $0x3a0] sm:$0xff] %v1482_v36  ;;  %1511 = vst [vmem:[#allocation2 + $0x3a8] sm:$0xff] %v1483_v40  ;;  %v1754_v33 = vmul.f32 %v3279_v9, %v1728_v44  ;;  %v1755_v3 = vmul.f32 %v3280_v11, %v1728_v44  ;;  %v1756_v52 = vmul.f32 %v3281_v22, %v1728_v44  ;;  %v3291_v36 = vld [vmem:[%s7676_s2 + $0x8] sm:$0xff]  ;;  %v3296_v6 = vld [vmem:[%s7676_s2 + $0x30] sm:$0xff] }
 0x1d7   :  { %1512 = vst.msk [vmem:[#allocation2 + $0x3b0] sm:$0xff] %vm150_vm0, %v1484_v60  ;;  %v1757_v15 = vmul.f32 %v3282_v59, %v1728_v44  ;;  %v1492_v26 = vadd.f32 %v1471_v45, %v1444_v42  ;;  %v1493_v13 = vadd.f32 %v1471_v45, %v1445_v57  ;;  %v1494_v38 = vadd.f32 %v1471_v45, %v1446_v58  ;;  %v1718_v44 = vpop.permute.xlu1 %1717  ;;  %v3295_v46 = vld [vmem:[%s7676_s2 + $0x28] sm:$0xff]  ;;  %v3297_v9 = vld [vmem:[%s7676_s2 + $0x70] sm:$0xff]  ;;  %v3298_v11 = vld [vmem:[%s7676_s2 + $0x78] sm:$0xff] }
 0x1d8   :  { %v1495_v7 = vadd.f32 %v1471_v45, %v1447_v49  ;;  %v1496_v41 = vadd.f32 %v1471_v45, %v1448_v63  ;;  %v1497_v62 = vadd.f32 %v1471_v45, %v1449_v24  ;;  %v1498_v48 = vadd.f32 %v1471_v45, %v1450_v29  ;;  %v3299_v22 = vld [vmem:[%s7676_s2 + $0x80] sm:$0xff]  ;;  %v3300_v59 = vld [vmem:[%s7676_s2 + $0x88] sm:$0xff] }
 0x1d9   :  { %v1799_v17 = vadd.f32 %v1776_v54, %v1751_v37  ;;  %1520 = vst [vmem:[#allocation2 + $0x3f0] sm:$0xff] %v1492_v26  ;;  %1521 = vst [vmem:[#allocation2 + $0x3f8] sm:$0xff] %v1493_v13  ;;  %v1800_v0 = vadd.f32 %v1776_v54, %v1752_v8  ;;  %v1801_v47 = vadd.f32 %v1776_v54, %v1753_v35  ;;  %v2028_v4 = vpop.permute.xlu0 %2027 }
 0x1da   :  { %1522 = vst [vmem:[#allocation2 + $0x400] sm:$0xff] %v1494_v38  ;;  %1523 = vst [vmem:[#allocation2 + $0x408] sm:$0xff] %v1495_v7  ;;  %v1802_v28 = vadd.f32 %v1776_v54, %v1754_v33  ;;  %v1803_v30 = vadd.f32 %v1776_v54, %v1755_v3  ;;  %v1804_v39 = vadd.f32 %v1776_v54, %v1756_v52 }
 0x1db   :  { %1524 = vst [vmem:[#allocation2 + $0x410] sm:$0xff] %v1496_v41  ;;  %1525 = vst [vmem:[#allocation2 + $0x418] sm:$0xff] %v1497_v62  ;;  %v1805_v61 = vadd.f32 %v1776_v54, %v1757_v15  ;;  %v1737_v18 = vmul.f32 %v3283_v20, %v1718_v44  ;;  %v1738_v56 = vmul.f32 %v3284_v34, %v1718_v44  ;;  %v1723_v31 = vpop.permute.xlu1 %1722  ;;  %v3301_v15 = vld [vmem:[%s7676_s2 + $0x90] sm:$0xff]  ;;  %v3302_v62 = vld [vmem:[%s7676_s2 + $0x98] sm:$0xff] }
 0x1dc   :  { %1526 = vst.msk [vmem:[#allocation2 + $0x420] sm:$0xff] %vm150_vm0, %v1498_v48  ;;  %1827 = vst [vmem:[#allocation2 + $0x508] sm:$0xff] %v1799_v17  ;;  %v1739_v2 = vmul.f32 %v3285_v27, %v1718_v44  ;;  %v1740_v23 = vmul.f32 %v3286_v12, %v1718_v44  ;;  %v1741_v42 = vmul.f32 %v3287_v5, %v1718_v44 }
 0x1dd   :  { %1828 = vst [vmem:[#allocation2 + $0x510] sm:$0xff] %v1800_v0  ;;  %1829 = vst [vmem:[#allocation2 + $0x518] sm:$0xff] %v1801_v47  ;;  %v1742_v57 = vmul.f32 %v3288_v50, %v1718_v44  ;;  %v1743_v58 = vmul.f32 %v3289_v32, %v1718_v44  ;;  %v1785_v19 = vadd.f32 %v7108_v43, %v1737_v18  ;;  %v7214_v41 = vpop.permute.xlu0 %2065  ;;  %v3304_v44 = vld [vmem:[%s7677_s3 + $0xa8] sm:$0xff]  ;;  %v3306_v18 = vld [vmem:[%s7677_s3 + $0xb8] sm:$0xff] }
 0x1de   :  { %1830 = vst [vmem:[#allocation2 + $0x520] sm:$0xff] %v1802_v28  ;;  %1831 = vst [vmem:[#allocation2 + $0x528] sm:$0xff] %v1803_v30  ;;  %v1786_v49 = vadd.f32 %v7108_v43, %v1738_v56  ;;  %v1787_v1 = vadd.f32 %v7108_v43, %v1739_v2  ;;  %v1788_v63 = vadd.f32 %v7108_v43, %v1740_v23  ;;  %v3303_v28 = vld [vmem:[%s7676_s2 + $0xa0] sm:$0xff]  ;;  %v3308_v2 = vld [vmem:[%s7677_s3 + $0xc8] sm:$0xff] }
 0x1df   :  { %1832 = vst [vmem:[#allocation2 + $0x530] sm:$0xff] %v1804_v39  ;;  %1833 = vst.msk [vmem:[#allocation2 + $0x538] sm:$0xff] %vm150_vm0, %v1805_v61  ;;  %v1789_v51 = vadd.f32 %v7108_v43, %v1741_v42  ;;  %v1790_v21 = vadd.f32 %v7108_v43, %v1742_v57  ;;  %v1791_v14 = vadd.f32 %v7108_v43, %v1743_v58  ;;  %v3292_v43 = vld [vmem:[%s7676_s2 + $0x10] sm:$0xff]  ;;  %v1761_v26 = vpop.permute.xlu1 %1760  ;;  %v3307_v56 = vld [vmem:[%s7677_s3 + $0xc0] sm:$0xff] }
 0x1e0   :  { %1813 = vst [vmem:[#allocation2 + $0x498] sm:$0xff] %v1785_v19  ;;  %1814 = vst [vmem:[#allocation2 + $0x4a0] sm:$0xff] %v1786_v49  ;;  %v1730_v24 = vmul.f32 %v3290_v53, %v7045_v55  ;;  %v1731_v40 = vmul.f32 %v3291_v36, %v7045_v55  ;;  %v1732_v60 = vmul.f32 %v3292_v43, %v7045_v55  ;;  %v3305_v61 = vld [vmem:[%s7677_s3 + $0xb0] sm:$0xff]  ;;  %v3310_v42 = vld [vmem:[%s7677_s3 + $0xd8] sm:$0xff] }
 0x1e1   :  { %1815 = vst [vmem:[#allocation2 + $0x4a8] sm:$0xff] %v1787_v1  ;;  %1816 = vst [vmem:[#allocation2 + $0x4b0] sm:$0xff] %v1788_v63  ;;  %v1733_v29 = vmul.f32 %v3293_v10, %v7045_v55  ;;  %v1734_v37 = vmul.f32 %v3294_v25, %v7045_v55  ;;  %v1735_v8 = vmul.f32 %v3295_v46, %v7045_v55  ;;  %v3309_v23 = vld [vmem:[%s7677_s3 + $0xd0] sm:$0xff]  ;;  %v2076_v1 = vpop.permute.xlu0 %2075 }
 0x1e2   :  { %1817 = vst [vmem:[#allocation2 + $0x4b8] sm:$0xff] %v1789_v51  ;;  %1818 = vst [vmem:[#allocation2 + $0x4c0] sm:$0xff] %v1790_v21  ;;  %v1736_v35 = vmul.f32 %v3296_v6, %v7045_v55  ;;  %v1744_v33 = vmul.f32 %v3297_v9, %v1723_v31  ;;  %v1745_v3 = vmul.f32 %v3298_v11, %v1723_v31 }
 0x1e3   :  { %1819 = vst.msk [vmem:[#allocation2 + $0x4c8] sm:$0xff] %vm150_vm0, %v1791_v14  ;;  %v1746_v52 = vmul.f32 %v3299_v22, %v1723_v31  ;;  %v1747_v55 = vmul.f32 %v3300_v59, %v1723_v31  ;;  %v1748_v45 = vmul.f32 %v3301_v15, %v1723_v31  ;;  %v1778_v13 = vadd.f32 %v1761_v26, %v1730_v24  ;;  %v1771_v57 = vpop.permute.xlu1 %1770 }
 0x1e4   :  { %v1779_v38 = vadd.f32 %v1761_v26, %v1731_v40  ;;  %v1780_v7 = vadd.f32 %v1761_v26, %v1732_v60  ;;  %v1781_v54 = vadd.f32 %v1761_v26, %v1733_v29  ;;  %v1749_v48 = vmul.f32 %v3302_v62, %v1723_v31  ;;  %v3311_v60 = vld [vmem:[%s7677_s3 + $0x38] sm:$0xff]  ;;  %v3312_v29 = vld [vmem:[%s7677_s3 + $0x40] sm:$0xff] }
 0x1e5   :  { %v1782_v17 = vadd.f32 %v1761_v26, %v1734_v37  ;;  %v1783_v0 = vadd.f32 %v1761_v26, %v1735_v8  ;;  %v1784_v47 = vadd.f32 %v1761_v26, %v1736_v35  ;;  %v1750_v30 = vmul.f32 %v3303_v28, %v1723_v31  ;;  %1806 = vst [vmem:[#allocation2 + $0x460] sm:$0xff] %v1778_v13  ;;  %v3313_v37 = vld [vmem:[%s7677_s3 + $0x48] sm:$0xff]  ;;  %v3314_v8 = vld [vmem:[%s7677_s3 + $0x50] sm:$0xff]  ;;  %v3315_v35 = vld [vmem:[%s7677_s3 + $0x58] sm:$0xff] }
 0x1e6   :  { %1807 = vst [vmem:[#allocation2 + $0x468] sm:$0xff] %v1779_v38  ;;  %1808 = vst [vmem:[#allocation2 + $0x470] sm:$0xff] %v1780_v7  ;;  %v2051_v39 = vmul.f32 %v3304_v44, %v2028_v4  ;;  %v2052_v20 = vmul.f32 %v3305_v61, %v2028_v4  ;;  %v2053_v34 = vmul.f32 %v3306_v18, %v2028_v4  ;;  %v7275_v7 = vpop.permute.xlu0 %2312 }
 0x1e7   :  { %1809 = vst [vmem:[#allocation2 + $0x478] sm:$0xff] %v1781_v54  ;;  %1810 = vst [vmem:[#allocation2 + $0x480] sm:$0xff] %v1782_v17  ;;  %v2054_v27 = vmul.f32 %v3307_v56, %v2028_v4  ;;  %v2055_v12 = vmul.f32 %v3308_v2, %v2028_v4  ;;  %v2056_v5 = vmul.f32 %v3309_v23, %v2028_v4  ;;  %v3318_v54 = vld [vmem:[%s7677_s3] sm:$0xff]  ;;  %v3320_v17 = vld [vmem:[%s7677_s3 + $0x10] sm:$0xff] }
 0x1e8   :  { %1811 = vst [vmem:[#allocation2 + $0x488] sm:$0xff] %v1783_v0  ;;  %1812 = vst.msk [vmem:[#allocation2 + $0x490] sm:$0xff] %vm150_vm0, %v1784_v47  ;;  %v2057_v50 = vmul.f32 %v3310_v42, %v2028_v4  ;;  %v1792_v32 = vadd.f32 %v1771_v57, %v1744_v33  ;;  %v1793_v58 = vadd.f32 %v1771_v57, %v1745_v3  ;;  %v2018_v4 = vpop.permute.xlu1 %2017  ;;  %v3316_v33 = vld [vmem:[%s7677_s3 + $0x60] sm:$0xff]  ;;  %v3317_v3 = vld [vmem:[%s7677_s3 + $0x68] sm:$0xff] }
 0x1e9   :  { %v1794_v19 = vadd.f32 %v1771_v57, %v1746_v52  ;;  %v1795_v49 = vadd.f32 %v1771_v57, %v1747_v55  ;;  %v1796_v63 = vadd.f32 %v1771_v57, %v1748_v45  ;;  %v1797_v51 = vadd.f32 %v1771_v57, %v1749_v48  ;;  %v3321_v47 = vld [vmem:[%s7677_s3 + $0x18] sm:$0xff] }
 0x1ea   :  { %v1798_v21 = vadd.f32 %v1771_v57, %v1750_v30  ;;  %v2099_v14 = vadd.f32 %v2076_v1, %v2051_v39  ;;  %1820 = vst [vmem:[#allocation2 + $0x4d0] sm:$0xff] %v1792_v32  ;;  %1821 = vst [vmem:[#allocation2 + $0x4d8] sm:$0xff] %v1793_v58  ;;  %v2100_v31 = vadd.f32 %v2076_v1, %v2052_v20  ;;  %v3322_v30 = vld [vmem:[%s7677_s3 + $0x20] sm:$0xff]  ;;  %v3323_v39 = vld [vmem:[%s7677_s3 + $0x28] sm:$0xff] }
 0x1eb   :  { %1822 = vst [vmem:[#allocation2 + $0x4e0] sm:$0xff] %v1794_v19  ;;  %1823 = vst [vmem:[#allocation2 + $0x4e8] sm:$0xff] %v1795_v49  ;;  %v2101_v53 = vadd.f32 %v2076_v1, %v2053_v34  ;;  %v2102_v24 = vadd.f32 %v2076_v1, %v2054_v27  ;;  %v2103_v36 = vadd.f32 %v2076_v1, %v2055_v12  ;;  %v3324_v20 = vld [vmem:[%s7677_s3 + $0x30] sm:$0xff]  ;;  %v3326_v32 = vld [vmem:[%s7677_s3 + $0x78] sm:$0xff] }
 0x1ec   :  { %1824 = vst [vmem:[#allocation2 + $0x4f0] sm:$0xff] %v1796_v63  ;;  %1825 = vst [vmem:[#allocation2 + $0x4f8] sm:$0xff] %v1797_v51  ;;  %v2104_v40 = vadd.f32 %v2076_v1, %v2056_v5  ;;  %v2105_v43 = vadd.f32 %v2076_v1, %v2057_v50  ;;  %v2037_v10 = vmul.f32 %v3311_v60, %v2018_v4  ;;  %v2023_v38 = vpop.permute.xlu1 %2022  ;;  %v3325_v50 = vld [vmem:[%s7677_s3 + $0x70] sm:$0xff]  ;;  %v3328_v49 = vld [vmem:[%s7677_s3 + $0x88] sm:$0xff] }
 0x1ed   :  { %1826 = vst.msk [vmem:[#allocation2 + $0x500] sm:$0xff] %vm150_vm0, %v1798_v21  ;;  %2127 = vst [vmem:[#allocation2 + $0x5e8] sm:$0xff] %v2099_v14  ;;  %v2038_v25 = vmul.f32 %v3312_v29, %v2018_v4  ;;  %v2039_v46 = vmul.f32 %v3313_v37, %v2018_v4  ;;  %v2040_v6 = vmul.f32 %v3314_v8, %v2018_v4  ;;  %v3329_v63 = vld [vmem:[%s7677_s3 + $0x90] sm:$0xff]  ;;  %v3330_v21 = vld [vmem:[%s7677_s3 + $0x98] sm:$0xff] }
 0x1ee   :  { %2128 = vst [vmem:[#allocation2 + $0x5f0] sm:$0xff] %v2100_v31  ;;  %2129 = vst [vmem:[#allocation2 + $0x5f8] sm:$0xff] %v2101_v53  ;;  %v2041_v9 = vmul.f32 %v3315_v35, %v2018_v4  ;;  %v2042_v11 = vmul.f32 %v3316_v33, %v2018_v4  ;;  %v2043_v22 = vmul.f32 %v3317_v3, %v2018_v4  ;;  %v3331_v31 = vld [vmem:[%s7677_s3 + $0xa0] sm:$0xff] }
 0x1ef   :  { %2130 = vst [vmem:[#allocation2 + $0x600] sm:$0xff] %v2102_v24  ;;  %2131 = vst [vmem:[#allocation2 + $0x608] sm:$0xff] %v2103_v36  ;;  %v2085_v52 = vadd.f32 %v7214_v41, %v2037_v10  ;;  %v2086_v59 = vadd.f32 %v7214_v41, %v2038_v25  ;;  %v2087_v55 = vadd.f32 %v7214_v41, %v2039_v46  ;;  %v7327_v24 = vpop.permute.xlu0 %2327  ;;  %v3332_v46 = vld [vmem:[%s7678_s4 + $0x38] sm:$0xff] }
 0x1f0   :  { %2132 = vst [vmem:[#allocation2 + $0x610] sm:$0xff] %v2104_v40  ;;  %2133 = vst.msk [vmem:[#allocation2 + $0x618] sm:$0xff] %vm150_vm0, %v2105_v43  ;;  %v2088_v15 = vadd.f32 %v7214_v41, %v2040_v6  ;;  %v2089_v45 = vadd.f32 %v7214_v41, %v2041_v9  ;;  %v2090_v26 = vadd.f32 %v7214_v41, %v2042_v11  ;;  %v2061_v34 = vpop.permute.xlu1 %2060  ;;  %v3333_v6 = vld [vmem:[%s7678_s4 + $0x40] sm:$0xff]  ;;  %v3334_v9 = vld [vmem:[%s7678_s4 + $0x48] sm:$0xff] }
 0x1f1   :  { %v2091_v13 = vadd.f32 %v7214_v41, %v2043_v22  ;;  %2113 = vst [vmem:[#allocation2 + $0x578] sm:$0xff] %v2085_v52  ;;  %2114 = vst [vmem:[#allocation2 + $0x580] sm:$0xff] %v2086_v59  ;;  %v2030_v62 = vmul.f32 %v3318_v54, %v7151_v16  ;;  %v3319_v41 = vld [vmem:[%s7677_s3 + $0x8] sm:$0xff]  ;;  %v2032_v0 = vmul.f32 %v3320_v17, %v7151_v16  ;;  %v3335_v11 = vld [vmem:[%s7678_s4 + $0x50] sm:$0xff] }
 0x1f2   :  { %2115 = vst [vmem:[#allocation2 + $0x588] sm:$0xff] %v2087_v55  ;;  %2116 = vst [vmem:[#allocation2 + $0x590] sm:$0xff] %v2088_v15  ;;  %v2031_v48 = vmul.f32 %v3319_v41, %v7151_v16  ;;  %v2033_v28 = vmul.f32 %v3321_v47, %v7151_v16  ;;  %v2034_v44 = vmul.f32 %v3322_v30, %v7151_v16  ;;  %v3336_v52 = vld [vmem:[%s7678_s4 + $0x58] sm:$0xff]  ;;  %v3337_v55 = vld [vmem:[%s7678_s4 + $0x60] sm:$0xff] }
 0x1f3   :  { %2117 = vst [vmem:[#allocation2 + $0x598] sm:$0xff] %v2089_v45  ;;  %2118 = vst [vmem:[#allocation2 + $0x5a0] sm:$0xff] %v2090_v26  ;;  %v2035_v61 = vmul.f32 %v3323_v39, %v7151_v16  ;;  %v2036_v18 = vmul.f32 %v3324_v20, %v7151_v16  ;;  %v2078_v56 = vadd.f32 %v2061_v34, %v2030_v62  ;;  %v3327_v16 = vld [vmem:[%s7677_s3 + $0x80] sm:$0xff]  ;;  %v2366_v22 = vpop.permute.xlu0 %2365  ;;  %v3338_v45 = vld [vmem:[%s7678_s4 + $0x68] sm:$0xff] }
 0x1f4   :  { %2119 = vst.msk [vmem:[#allocation2 + $0x5a8] sm:$0xff] %vm150_vm0, %v2091_v13  ;;  %v2079_v27 = vadd.f32 %v2061_v34, %v2031_v48  ;;  %v2080_v2 = vadd.f32 %v2061_v34, %v2032_v0  ;;  %v2081_v12 = vadd.f32 %v2061_v34, %v2033_v28  ;;  %v2082_v23 = vadd.f32 %v2061_v34, %v2034_v44  ;;  %v2071_v36 = vpop.permute.xlu1 %2070  ;;  %v3339_v47 = vld [vmem:[%s7678_s4] sm:$0xff]  ;;  %v3340_v30 = vld [vmem:[%s7678_s4 + $0x8] sm:$0xff]  ;;  %v3341_v39 = vld [vmem:[%s7678_s4 + $0x10] sm:$0xff] }
 0x1f5   :  { %v2083_v5 = vadd.f32 %v2061_v34, %v2035_v61  ;;  %v2084_v42 = vadd.f32 %v2061_v34, %v2036_v18  ;;  %v2044_v57 = vmul.f32 %v3325_v50, %v2023_v38  ;;  %v2045_v58 = vmul.f32 %v3326_v32, %v2023_v38  ;;  %2106 = vst [vmem:[#allocation2 + $0x540] sm:$0xff] %v2078_v56  ;;  %v3342_v20 = vld [vmem:[%s7678_s4 + $0x18] sm:$0xff]  ;;  %v3343_v34 = vld [vmem:[%s7678_s4 + $0x20] sm:$0xff] }
 0x1f6   :  { %v2046_v19 = vmul.f32 %v3327_v16, %v2023_v38  ;;  %v2047_v1 = vmul.f32 %v3328_v49, %v2023_v38  ;;  %2107 = vst [vmem:[#allocation2 + $0x548] sm:$0xff] %v2079_v27  ;;  %2108 = vst [vmem:[#allocation2 + $0x550] sm:$0xff] %v2080_v2  ;;  %v2048_v51 = vmul.f32 %v3329_v63, %v2023_v38  ;;  %v3344_v27 = vld [vmem:[%s7678_s4 + $0x28] sm:$0xff] }
 0x1f7   :  { %2109 = vst [vmem:[#allocation2 + $0x558] sm:$0xff] %v2081_v12  ;;  %v2049_v14 = vmul.f32 %v3330_v21, %v2023_v38  ;;  %v2050_v53 = vmul.f32 %v3331_v31, %v2023_v38  ;;  %2110 = vst [vmem:[#allocation2 + $0x560] sm:$0xff] %v2082_v23  ;;  %v2092_v4 = vadd.f32 %v2071_v36, %v2044_v57  ;;  %v3345_v12 = vld [vmem:[%s7678_s4 + $0x30] sm:$0xff]  ;;  %v7380_v49 = vpop.permute.xlu0 %2612  ;;  %v3348_v21 = vld [vmem:[%s7678_s4 + $0x80] sm:$0xff] }
 0x1f8   :  { %2111 = vst [vmem:[#allocation2 + $0x568] sm:$0xff] %v2083_v5  ;;  %2112 = vst.msk [vmem:[#allocation2 + $0x570] sm:$0xff] %vm150_vm0, %v2084_v42  ;;  %v2093_v40 = vadd.f32 %v2071_v36, %v2045_v58  ;;  %v2094_v43 = vadd.f32 %v2071_v36, %v2046_v19  ;;  %v2095_v60 = vadd.f32 %v2071_v36, %v2047_v1  ;;  %v2318_v37 = vpop.permute.xlu1 %2317  ;;  %v3346_v1 = vld [vmem:[%s7678_s4 + $0x70] sm:$0xff]  ;;  %v3349_v31 = vld [vmem:[%s7678_s4 + $0x88] sm:$0xff] }
 0x1f9   :  { %v2096_v10 = vadd.f32 %v2071_v36, %v2048_v51  ;;  %v2097_v29 = vadd.f32 %v2071_v36, %v2049_v14  ;;  %v2098_v25 = vadd.f32 %v2071_v36, %v2050_v53  ;;  %2120 = vst [vmem:[#allocation2 + $0x5b0] sm:$0xff] %v2092_v4  ;;  %v2337_v8 = vmul.f32 %v3332_v46, %v2318_v37  ;;  %v3347_v51 = vld [vmem:[%s7678_s4 + $0x78] sm:$0xff]  ;;  %v3350_v36 = vld [vmem:[%s7678_s4 + $0x90] sm:$0xff] }
 0x1fa   :  { %2121 = vst [vmem:[#allocation2 + $0x5b8] sm:$0xff] %v2093_v40  ;;  %2122 = vst [vmem:[#allocation2 + $0x5c0] sm:$0xff] %v2094_v43  ;;  %v2338_v35 = vmul.f32 %v3333_v6, %v2318_v37  ;;  %v2339_v33 = vmul.f32 %v3334_v9, %v2318_v37  ;;  %v2340_v3 = vmul.f32 %v3335_v11, %v2318_v37  ;;  %v3351_v40 = vld [vmem:[%s7678_s4 + $0x98] sm:$0xff] }
 0x1fb   :  { %2123 = vst [vmem:[#allocation2 + $0x5c8] sm:$0xff] %v2095_v60  ;;  %2124 = vst [vmem:[#allocation2 + $0x5d0] sm:$0xff] %v2096_v10  ;;  %v2341_v59 = vmul.f32 %v3336_v52, %v2318_v37  ;;  %v2342_v15 = vmul.f32 %v3337_v55, %v2318_v37  ;;  %v2343_v26 = vmul.f32 %v3338_v45, %v2318_v37  ;;  %v3352_v60 = vld [vmem:[%s7678_s4 + $0xa0] sm:$0xff]  ;;  %v3355_v52 = vld [vmem:[%s7678_s4 + $0xb8] sm:$0xff] }
 0x1fc   :  { %2125 = vst [vmem:[#allocation2 + $0x5d8] sm:$0xff] %v2097_v29  ;;  %2126 = vst.msk [vmem:[#allocation2 + $0x5e0] sm:$0xff] %vm150_vm0, %v2098_v25  ;;  %v2385_v13 = vadd.f32 %v2366_v22, %v2337_v8  ;;  %v2386_v38 = vadd.f32 %v2366_v22, %v2338_v35  ;;  %v2387_v54 = vadd.f32 %v2366_v22, %v2339_v33  ;;  %v2323_v0 = vpop.permute.xlu1 %2322  ;;  %v3353_v33 = vld [vmem:[%s7678_s4 + $0xa8] sm:$0xff]  ;;  %v3356_v55 = vld [vmem:[%s7678_s4 + $0xc0] sm:$0xff] }
 0x1fd   :  { %v2388_v62 = vadd.f32 %v2366_v22, %v2340_v3  ;;  %v2389_v41 = vadd.f32 %v2366_v22, %v2341_v59  ;;  %v2390_v48 = vadd.f32 %v2366_v22, %v2342_v15  ;;  %v2391_v17 = vadd.f32 %v2366_v22, %v2343_v26  ;;  %v3354_v3 = vld [vmem:[%s7678_s4 + $0xb0] sm:$0xff]  ;;  %v3357_v45 = vld [vmem:[%s7678_s4 + $0xc8] sm:$0xff] }
 0x1fe   :  { %2413 = vst [vmem:[#allocation2 + $0x658] sm:$0xff] %v2385_v13  ;;  %2414 = vst [vmem:[#allocation2 + $0x660] sm:$0xff] %v2386_v38  ;;  %v2330_v28 = vmul.f32 %v3339_v47, %v7275_v7  ;;  %v2331_v44 = vmul.f32 %v3340_v30, %v7275_v7  ;;  %v2332_v61 = vmul.f32 %v3341_v39, %v7275_v7  ;;  %v7425_v38 = vpop.permute.xlu0 %2627  ;;  %v3359_v47 = vld [vmem:[%s7678_s4 + $0xd8] sm:$0xff] }
 0x1ff   :  { %2415 = vst [vmem:[#allocation2 + $0x668] sm:$0xff] %v2387_v54  ;;  %2416 = vst [vmem:[#allocation2 + $0x670] sm:$0xff] %v2388_v62  ;;  %v2333_v18 = vmul.f32 %v3342_v20, %v7275_v7  ;;  %v2334_v56 = vmul.f32 %v3343_v34, %v7275_v7  ;;  %v2335_v2 = vmul.f32 %v3344_v27, %v7275_v7  ;;  %v3362_v27 = vld [vmem:[%s7679_s5 + $0x48] sm:$0xff] }
 0x200   :  { %2417 = vst [vmem:[#allocation2 + $0x678] sm:$0xff] %v2389_v41  ;;  %2418 = vst [vmem:[#allocation2 + $0x680] sm:$0xff] %v2390_v48  ;;  %v2336_v23 = vmul.f32 %v3345_v12, %v7275_v7  ;;  %v2361_v5 = vpop.permute.xlu1 %2360  ;;  %v2344_v63 = vmul.f32 %v3346_v1, %v2323_v0  ;;  %v2345_v7 = vmul.f32 %v3347_v51, %v2323_v0  ;;  %v3363_v12 = vld [vmem:[%s7679_s5 + $0x50] sm:$0xff] }
 0x201   :  { %2419 = vst.msk [vmem:[#allocation2 + $0x688] sm:$0xff] %vm150_vm0, %v2391_v17  ;;  %v2378_v42 = vadd.f32 %v2361_v5, %v2330_v28  ;;  %v2379_v50 = vadd.f32 %v2361_v5, %v2331_v44  ;;  %v2380_v57 = vadd.f32 %v2361_v5, %v2332_v61  ;;  %v2381_v32 = vadd.f32 %v2361_v5, %v2333_v18  ;;  %v3358_v17 = vld [vmem:[%s7678_s4 + $0xd0] sm:$0xff]  ;;  %v3360_v18 = vld [vmem:[%s7679_s5 + $0x38] sm:$0xff] }
 0x202   :  { %v2382_v58 = vadd.f32 %v2361_v5, %v2334_v56  ;;  %v2383_v16 = vadd.f32 %v2361_v5, %v2335_v2  ;;  %v2384_v19 = vadd.f32 %v2361_v5, %v2336_v23  ;;  %v2346_v14 = vmul.f32 %v3348_v21, %v2323_v0  ;;  %v2666_v20 = vpop.permute.xlu0 %2665  ;;  %v3361_v56 = vld [vmem:[%s7679_s5 + $0x40] sm:$0xff]  ;;  %v3364_v5 = vld [vmem:[%s7679_s5 + $0x58] sm:$0xff] }
 0x203   :  { %v2347_v53 = vmul.f32 %v3349_v31, %v2323_v0  ;;  %2406 = vst [vmem:[#allocation2 + $0x620] sm:$0xff] %v2378_v42  ;;  %2407 = vst [vmem:[#allocation2 + $0x628] sm:$0xff] %v2379_v50  ;;  %v2348_v4 = vmul.f32 %v3350_v36, %v2323_v0  ;;  %v2349_v43 = vmul.f32 %v3351_v40, %v2323_v0  ;;  %v3365_v50 = vld [vmem:[%s7679_s5 + $0x60] sm:$0xff] }
 0x204   :  { %2408 = vst [vmem:[#allocation2 + $0x630] sm:$0xff] %v2380_v57  ;;  %2409 = vst [vmem:[#allocation2 + $0x638] sm:$0xff] %v2381_v32  ;;  %v2350_v10 = vmul.f32 %v3352_v60, %v2323_v0  ;;  %v2371_v29 = vpop.permute.xlu1 %2370  ;;  %v2351_v11 = vmul.f32 %v3353_v33, %v7327_v24  ;;  %v2352_v22 = vmul.f32 %v3354_v3, %v7327_v24  ;;  %v3366_v32 = vld [vmem:[%s7679_s5 + $0x68] sm:$0xff]  ;;  %v3367_v31 = vld [vmem:[%s7679_s5] sm:$0xff] }
 0x205   :  { %2410 = vst [vmem:[#allocation2 + $0x640] sm:$0xff] %v2382_v58  ;;  %2411 = vst [vmem:[#allocation2 + $0x648] sm:$0xff] %v2383_v16  ;;  %v2392_v25 = vadd.f32 %v2371_v29, %v2344_v63  ;;  %v2393_v37 = vadd.f32 %v2371_v29, %v2345_v7  ;;  %v2394_v46 = vadd.f32 %v2371_v29, %v2346_v14 }
 0x206   :  { %2412 = vst.msk [vmem:[#allocation2 + $0x650] sm:$0xff] %vm150_vm0, %v2384_v19  ;;  %v2395_v8 = vadd.f32 %v2371_v29, %v2347_v53  ;;  %v2396_v6 = vadd.f32 %v2371_v29, %v2348_v4  ;;  %v2397_v35 = vadd.f32 %v2371_v29, %v2349_v43  ;;  %v2398_v9 = vadd.f32 %v2371_v29, %v2350_v10  ;;  %v7463_v36 = vpop.permute.xlu0 %2912  ;;  %v3368_v4 = vld [vmem:[%s7679_s5 + $0x8] sm:$0xff]  ;;  %v3369_v43 = vld [vmem:[%s7679_s5 + $0x10] sm:$0xff]  ;;  %v3370_v10 = vld [vmem:[%s7679_s5 + $0x18] sm:$0xff] }
 0x207   :  { %v2353_v59 = vmul.f32 %v3355_v52, %v7327_v24  ;;  %v2354_v15 = vmul.f32 %v3356_v55, %v7327_v24  ;;  %2420 = vst [vmem:[#allocation2 + $0x690] sm:$0xff] %v2392_v25  ;;  %2421 = vst [vmem:[#allocation2 + $0x698] sm:$0xff] %v2393_v37  ;;  %v2355_v26 = vmul.f32 %v3357_v45, %v7327_v24  ;;  %v3371_v25 = vld [vmem:[%s7679_s5 + $0x20] sm:$0xff]  ;;  %v3378_v55 = vld [vmem:[%s7679_s5 + $0xc8] sm:$0xff] }
 0x208   :  { %2422 = vst [vmem:[#allocation2 + $0x6a0] sm:$0xff] %v2394_v46  ;;  %2423 = vst [vmem:[#allocation2 + $0x6a8] sm:$0xff] %v2395_v8  ;;  %v2376_v13 = vpop.permute.xlu1 %2375  ;;  %v2356_v0 = vmul.f32 %v3358_v17, %v7327_v24  ;;  %v2357_v28 = vmul.f32 %v3359_v47, %v7327_v24  ;;  %v2630_v53 = vmul.f32 %v3367_v31, %v7380_v49  ;;  %v3372_v46 = vld [vmem:[%s7679_s5 + $0x28] sm:$0xff]  ;;  %v3379_v45 = vld [vmem:[%s7679_s5 + $0xd0] sm:$0xff] }
 0x209   :  { %2424 = vst [vmem:[#allocation2 + $0x6b0] sm:$0xff] %v2396_v6  ;;  %2425 = vst [vmem:[#allocation2 + $0x6b8] sm:$0xff] %v2397_v35  ;;  %v2399_v54 = vadd.f32 %v2376_v13, %v2351_v11  ;;  %v2400_v62 = vadd.f32 %v2376_v13, %v2352_v22  ;;  %v2401_v41 = vadd.f32 %v2376_v13, %v2353_v59  ;;  %v3373_v6 = vld [vmem:[%s7679_s5 + $0x30] sm:$0xff]  ;;  %v3376_v22 = vld [vmem:[%s7679_s5 + $0xb8] sm:$0xff] }
 0x20a   :  { %2426 = vst.msk [vmem:[#allocation2 + $0x6c0] sm:$0xff] %vm150_vm0, %v2398_v9  ;;  %v2402_v48 = vadd.f32 %v2376_v13, %v2354_v15  ;;  %v2403_v30 = vadd.f32 %v2376_v13, %v2355_v26  ;;  %v2404_v44 = vadd.f32 %v2376_v13, %v2356_v0  ;;  %v2405_v39 = vadd.f32 %v2376_v13, %v2357_v28  ;;  %v3374_v9 = vld [vmem:[%s7679_s5 + $0xa8] sm:$0xff]  ;;  %v3375_v11 = vld [vmem:[%s7679_s5 + $0xb0] sm:$0xff]  ;;  %v3380_v0 = vld [vmem:[%s7679_s5 + $0xd8] sm:$0xff] }
 0x20b   :  { %2427 = vst [vmem:[#allocation2 + $0x6c8] sm:$0xff] %v2399_v54  ;;  %2428 = vst [vmem:[#allocation2 + $0x6d0] sm:$0xff] %v2400_v62  ;;  %v2631_v40 = vmul.f32 %v3368_v4, %v7380_v49  ;;  %v2632_v60 = vmul.f32 %v3369_v43, %v7380_v49  ;;  %v2633_v29 = vmul.f32 %v3370_v10, %v7380_v49  ;;  %v7514_v54 = vpop.permute.xlu0 %2922  ;;  %v3390_v10 = vld [vmem:[%s7680_s6 + $0x10] sm:$0xff] }
 0x20c   :  { %2429 = vst [vmem:[#allocation2 + $0x6d8] sm:$0xff] %v2401_v41  ;;  %2430 = vst [vmem:[#allocation2 + $0x6e0] sm:$0xff] %v2402_v48  ;;  %v2618_v61 = vpop.permute.xlu1 %2617  ;;  %v2634_v37 = vmul.f32 %v3371_v25, %v7380_v49  ;;  %v2635_v8 = vmul.f32 %v3372_v46, %v7380_v49  ;;  %v2636_v35 = vmul.f32 %v3373_v6, %v7380_v49  ;;  %v3377_v49 = vld [vmem:[%s7679_s5 + $0xc0] sm:$0xff]  ;;  %v3391_v6 = vld [vmem:[%s7680_s6 + $0x38] sm:$0xff] }
 0x20d   :  { %2431 = vst [vmem:[#allocation2 + $0x6e8] sm:$0xff] %v2403_v30  ;;  %v2637_v34 = vmul.f32 %v3360_v18, %v2618_v61  ;;  %v2638_v24 = vmul.f32 %v3361_v56, %v2618_v61  ;;  %v2639_v2 = vmul.f32 %v3362_v27, %v2618_v61  ;;  %v2640_v23 = vmul.f32 %v3363_v12, %v2618_v61  ;;  %v3384_v56 = vld [vmem:[%s7679_s5 + $0x88] sm:$0xff]  ;;  %v3385_v27 = vld [vmem:[%s7680_s6] sm:$0xff]  ;;  %v3386_v12 = vld [vmem:[%s7679_s5 + $0x90] sm:$0xff] }
 0x20e   :  { %2432 = vst [vmem:[#allocation2 + $0x6f0] sm:$0xff] %v2404_v44  ;;  %2433 = vst.msk [vmem:[#allocation2 + $0x6f8] sm:$0xff] %vm150_vm0, %v2405_v39  ;;  %v2641_v42 = vmul.f32 %v3364_v5, %v2618_v61  ;;  %v2642_v57 = vmul.f32 %v3365_v50, %v2618_v61  ;;  %v2643_v58 = vmul.f32 %v3366_v32, %v2618_v61  ;;  %v3381_v39 = vld [vmem:[%s7679_s5 + $0x70] sm:$0xff]  ;;  %v3387_v5 = vld [vmem:[%s7679_s5 + $0x98] sm:$0xff] }
 0x20f   :  { %v2685_v16 = vadd.f32 %v2666_v20, %v2637_v34  ;;  %v2686_v19 = vadd.f32 %v2666_v20, %v2638_v24  ;;  %v2687_v1 = vadd.f32 %v2666_v20, %v2639_v2  ;;  %v2688_v63 = vadd.f32 %v2666_v20, %v2640_v23  ;;  %v3383_v34 = vld [vmem:[%s7679_s5 + $0x80] sm:$0xff] }
 0x210   :  { %v2689_v51 = vadd.f32 %v2666_v20, %v2641_v42  ;;  %v2690_v7 = vadd.f32 %v2666_v20, %v2642_v57  ;;  %v2691_v21 = vadd.f32 %v2666_v20, %v2643_v58  ;;  %v7457_v14 = vpop.permute.xlu1 %2622  ;;  %v2651_v33 = vmul.f32 %v3374_v9, %v7425_v38  ;;  %v3382_v20 = vld [vmem:[%s7679_s5 + $0x78] sm:$0xff]  ;;  %v3388_v50 = vld [vmem:[%s7679_s5 + $0xa0] sm:$0xff]  ;;  %v2676_v58 = vpop.permute.xlu0 %2675 }
 0x211   :  { %2713 = vst [vmem:[#allocation2 + $0x738] sm:$0xff] %v2685_v16  ;;  %2714 = vst [vmem:[#allocation2 + $0x740] sm:$0xff] %v2686_v19  ;;  %v2652_v3 = vmul.f32 %v3375_v11, %v7425_v38  ;;  %v2653_v52 = vmul.f32 %v3376_v22, %v7425_v38  ;;  %v2654_v59 = vmul.f32 %v3377_v49, %v7425_v38  ;;  %v3392_v9 = vld [vmem:[%s7680_s6 + $0x40] sm:$0xff]  ;;  %v3393_v11 = vld [vmem:[%s7680_s6 + $0x48] sm:$0xff] }
 0x212   :  { %2715 = vst [vmem:[#allocation2 + $0x748] sm:$0xff] %v2687_v1  ;;  %2716 = vst [vmem:[#allocation2 + $0x750] sm:$0xff] %v2688_v63  ;;  %v2655_v15 = vmul.f32 %v3378_v55, %v7425_v38  ;;  %v2656_v26 = vmul.f32 %v3379_v45, %v7425_v38  ;;  %v2657_v47 = vmul.f32 %v3380_v0, %v7425_v38  ;;  %v3394_v22 = vld [vmem:[%s7680_s6 + $0x50] sm:$0xff]  ;;  %v3395_v49 = vld [vmem:[%s7680_s6 + $0x18] sm:$0xff] }
 0x213   :  { %2717 = vst [vmem:[#allocation2 + $0x758] sm:$0xff] %v2689_v51  ;;  %2718 = vst [vmem:[#allocation2 + $0x760] sm:$0xff] %v2690_v7  ;;  %v2644_v61 = vmul.f32 %v3381_v39, %v7457_v14  ;;  %v2645_v18 = vmul.f32 %v3382_v20, %v7457_v14  ;;  %v2646_v38 = vmul.f32 %v3383_v34, %v7457_v14  ;;  %v3396_v55 = vld [vmem:[%s7680_s6 + $0x58] sm:$0xff]  ;;  %v3397_v45 = vld [vmem:[%s7680_s6 + $0x60] sm:$0xff] }
 0x214   :  { %2719 = vst.msk [vmem:[#allocation2 + $0x768] sm:$0xff] %vm150_vm0, %v2691_v21  ;;  %v2661_v13 = vpop.permute.xlu1 %2660  ;;  %v2647_v24 = vmul.f32 %v3384_v56, %v7457_v14  ;;  %v7540_v2 = vmul.f32 %v3385_v27, %v7463_v36  ;;  %v2648_v23 = vmul.f32 %v3386_v12, %v7457_v14  ;;  %v2649_v42 = vmul.f32 %v3387_v5, %v7457_v14  ;;  %v3400_v20 = vld [vmem:[%s7680_s6 + $0xa8] sm:$0xff]  ;;  %v3401_v34 = vld [vmem:[%s7680_s6 + $0xb0] sm:$0xff]  ;;  %v3402_v56 = vld [vmem:[%s7680_s6 + $0xb8] sm:$0xff] }
 0x215   :  { %v2678_v62 = vadd.f32 %v2661_v13, %v2630_v53  ;;  %v2679_v41 = vadd.f32 %v2661_v13, %v2631_v40  ;;  %v2680_v48 = vadd.f32 %v2661_v13, %v2632_v60  ;;  %v2681_v17 = vadd.f32 %v2661_v13, %v2633_v29  ;;  %v3403_v27 = vld [vmem:[%s7680_s6 + $0xc0] sm:$0xff] }
 0x216   :  { %v2682_v28 = vadd.f32 %v2661_v13, %v2634_v37  ;;  %v2683_v30 = vadd.f32 %v2661_v13, %v2635_v8  ;;  %v2684_v44 = vadd.f32 %v2661_v13, %v2636_v35  ;;  %v2650_v57 = vmul.f32 %v3388_v50, %v7457_v14  ;;  %v3389_v14 = vld [vmem:[%s7680_s6 + $0x8] sm:$0xff]  ;;  %v2966_v8 = vpop.permute.xlu0 %2965 }
 0x217   :  { %2706 = vst [vmem:[#allocation2 + $0x700] sm:$0xff] %v2678_v62  ;;  %2707 = vst [vmem:[#allocation2 + $0x708] sm:$0xff] %v2679_v41  ;;  %v2699_v51 = vadd.f32 %v2676_v58, %v2651_v33  ;;  %v2700_v7 = vadd.f32 %v2676_v58, %v2652_v3  ;;  %v2701_v21 = vadd.f32 %v2676_v58, %v2653_v52  ;;  %v3398_v13 = vld [vmem:[%s7680_s6 + $0x68] sm:$0xff] }
 0x218   :  { %2708 = vst [vmem:[#allocation2 + $0x710] sm:$0xff] %v2680_v48  ;;  %2709 = vst [vmem:[#allocation2 + $0x718] sm:$0xff] %v2681_v17  ;;  %v2671_v32 = vpop.permute.xlu1 %2670  ;;  %v2702_v31 = vadd.f32 %v2676_v58, %v2654_v59  ;;  %v2703_v53 = vadd.f32 %v2676_v58, %v2655_v15  ;;  %v2704_v4 = vadd.f32 %v2676_v58, %v2656_v26  ;;  %v3405_v50 = vld [vmem:[%s7680_s6 + $0xc8] sm:$0xff] }
 0x219   :  { %2710 = vst [vmem:[#allocation2 + $0x720] sm:$0xff] %v2682_v28  ;;  %2711 = vst [vmem:[#allocation2 + $0x728] sm:$0xff] %v2683_v30  ;;  %v2692_v16 = vadd.f32 %v2671_v32, %v2644_v61  ;;  %v2693_v19 = vadd.f32 %v2671_v32, %v2645_v18  ;;  %v2694_v1 = vadd.f32 %v2671_v32, %v2646_v38 }
 0x21a   :  { %2712 = vst.msk [vmem:[#allocation2 + $0x730] sm:$0xff] %vm150_vm0, %v2684_v44  ;;  %v2695_v63 = vadd.f32 %v2671_v32, %v2647_v24  ;;  %v2705_v40 = vadd.f32 %v2676_v58, %v2657_v47  ;;  %v2696_v43 = vadd.f32 %v2671_v32, %v2648_v23  ;;  %v7559_v60 = vmul.f32 %v3389_v14, %v7463_v36  ;;  %v3399_v47 = vld [vmem:[%s7680_s6 + $0x20] sm:$0xff]  ;;  %v3404_v23 = vld [vmem:[%s7680_s6 + $0x28] sm:$0xff] }
 0x21b   :  { %2720 = vst [vmem:[#allocation2 + $0x770] sm:$0xff] %v2692_v16  ;;  %2721 = vst [vmem:[#allocation2 + $0x778] sm:$0xff] %v2693_v19  ;;  %v7565_v29 = vmul.f32 %v3390_v10, %v7463_v36  ;;  %v2697_v25 = vadd.f32 %v2671_v32, %v2649_v42  ;;  %v2698_v37 = vadd.f32 %v2671_v32, %v2650_v57  ;;  %v2976_v42 = vpop.permute.xlu0 %2975  ;;  %v3406_v32 = vld [vmem:[%s7680_s6 + $0xd0] sm:$0xff]  ;;  %v3407_v16 = vld [vmem:[%s7680_s6 + $0xd8] sm:$0xff] }
 0x21c   :  { %2722 = vst [vmem:[#allocation2 + $0x780] sm:$0xff] %v2694_v1  ;;  %2723 = vst [vmem:[#allocation2 + $0x788] sm:$0xff] %v2695_v63  ;;  %v2918_v46 = vpop.permute.xlu1 %2917  ;;  %v2933_v59 = vmul.f32 %v3395_v49, %v7463_v36  ;;  %v2934_v28 = vmul.f32 %v3399_v47, %v7463_v36  ;;  %v2935_v5 = vmul.f32 %v3404_v23, %v7463_v36  ;;  %v3414_v49 = vld [vmem:[%s7680_s6 + $0x98] sm:$0xff] }
 0x21d   :  { %2727 = vst [vmem:[#allocation2 + $0x7a8] sm:$0xff] %v2699_v51  ;;  %2728 = vst [vmem:[#allocation2 + $0x7b0] sm:$0xff] %v2700_v7  ;;  %v2937_v35 = vmul.f32 %v3391_v6, %v2918_v46  ;;  %v2938_v33 = vmul.f32 %v3392_v9, %v2918_v46  ;;  %v2939_v3 = vmul.f32 %v3393_v11, %v2918_v46 }
 0x21e   :  { %2729 = vst [vmem:[#allocation2 + $0x7b8] sm:$0xff] %v2701_v21  ;;  %2730 = vst [vmem:[#allocation2 + $0x7c0] sm:$0xff] %v2702_v31  ;;  %v2940_v52 = vmul.f32 %v3394_v22, %v2918_v46  ;;  %v2941_v15 = vmul.f32 %v3396_v55, %v2918_v46  ;;  %v2942_v26 = vmul.f32 %v3397_v45, %v2918_v46  ;;  %v3408_v21 = vld [vmem:[%s7680_s6 + $0x30] sm:$0xff]  ;;  %v3415_v55 = vld [vmem:[%s7680_s6 + $0xa0] sm:$0xff] }
 0x21f   :  { %2731 = vst [vmem:[#allocation2 + $0x7c8] sm:$0xff] %v2703_v53  ;;  %2732 = vst [vmem:[#allocation2 + $0x7d0] sm:$0xff] %v2704_v4  ;;  %v2943_v62 = vmul.f32 %v3398_v13, %v2918_v46  ;;  %v2985_v41 = vadd.f32 %v2966_v8, %v2937_v35  ;;  %v2986_v48 = vadd.f32 %v2966_v8, %v2938_v33  ;;  %v3411_v35 = vld [vmem:[%s7680_s6 + $0x80] sm:$0xff]  ;;  %v3412_v33 = vld [vmem:[%s7680_s6 + $0x88] sm:$0xff] }
 0x220   :  { %2733 = vst.msk [vmem:[#allocation2 + $0x7d8] sm:$0xff] %vm150_vm0, %v2705_v40  ;;  %2724 = vst [vmem:[#allocation2 + $0x790] sm:$0xff] %v2696_v43  ;;  %v2987_v17 = vadd.f32 %v2966_v8, %v2939_v3  ;;  %v2988_v0 = vadd.f32 %v2966_v8, %v2940_v52  ;;  %v2989_v30 = vadd.f32 %v2966_v8, %v2941_v15  ;;  %v2928_v61 = vpop.permute.xlu1 %2927  ;;  %v3413_v22 = vld [vmem:[%s7680_s6 + $0x90] sm:$0xff] }
 0x221   :  { %2725 = vst [vmem:[#allocation2 + $0x798] sm:$0xff] %v2697_v25  ;;  %2726 = vst.msk [vmem:[#allocation2 + $0x7a0] sm:$0xff] %vm150_vm0, %v2698_v37  ;;  %v2990_v44 = vadd.f32 %v2966_v8, %v2942_v26  ;;  %v2991_v39 = vadd.f32 %v2966_v8, %v2943_v62  ;;  %v2951_v18 = vmul.f32 %v3400_v20, %v2928_v61 }
 0x222   :  { %3013 = vst [vmem:[#allocation2 + $0x818] sm:$0xff] %v2985_v41  ;;  %3014 = vst [vmem:[#allocation2 + $0x820] sm:$0xff] %v2986_v48  ;;  %v2952_v38 = vmul.f32 %v3401_v34, %v2928_v61  ;;  %v2953_v24 = vmul.f32 %v3402_v56, %v2928_v61  ;;  %v2954_v12 = vmul.f32 %v3403_v27, %v2928_v61 }
 0x223   :  { %3015 = vst [vmem:[#allocation2 + $0x828] sm:$0xff] %v2987_v17  ;;  %3016 = vst [vmem:[#allocation2 + $0x830] sm:$0xff] %v2988_v0  ;;  %v2955_v57 = vmul.f32 %v3405_v50, %v2928_v61  ;;  %v2956_v58 = vmul.f32 %v3406_v32, %v2928_v61  ;;  %v2957_v19 = vmul.f32 %v3407_v16, %v2928_v61 }
 0x224   :  { %3017 = vst [vmem:[#allocation2 + $0x838] sm:$0xff] %v2989_v30  ;;  %3018 = vst [vmem:[#allocation2 + $0x840] sm:$0xff] %v2990_v44  ;;  %v2999_v1 = vadd.f32 %v2976_v42, %v2951_v18  ;;  %v3000_v63 = vadd.f32 %v2976_v42, %v2952_v38  ;;  %v3001_v51 = vadd.f32 %v2976_v42, %v2953_v24  ;;  %v2961_v43 = vpop.permute.xlu1 %2960 }
 0x225   :  { %3019 = vst.msk [vmem:[#allocation2 + $0x848] sm:$0xff] %vm150_vm0, %v2991_v39  ;;  %v3002_v7 = vadd.f32 %v2976_v42, %v2954_v12  ;;  %v2936_v31 = vmul.f32 %v3408_v21, %v7463_v36  ;;  %v3003_v53 = vadd.f32 %v2976_v42, %v2955_v57  ;;  %v3004_v4 = vadd.f32 %v2976_v42, %v2956_v58 }
 0x226   :  { %v3005_v40 = vadd.f32 %v2976_v42, %v2957_v19  ;;  %3027 = vst [vmem:[#allocation2 + $0x888] sm:$0xff] %v2999_v1  ;;  %3028 = vst [vmem:[#allocation2 + $0x890] sm:$0xff] %v3000_v63  ;;  %v2978_v14 = vadd.f32 %v2961_v43, %v7540_v2  ;;  %v2979_v10 = vadd.f32 %v2961_v43, %v7559_v60  ;;  %v3409_v2 = vld [vmem:[%s7680_s6 + $0x70] sm:$0xff] }
 0x227   :  { %3029 = vst [vmem:[#allocation2 + $0x898] sm:$0xff] %v3001_v51  ;;  %3030 = vst [vmem:[#allocation2 + $0x8a0] sm:$0xff] %v3002_v7  ;;  %v2980_v25 = vadd.f32 %v2961_v43, %v7565_v29  ;;  %v2981_v37 = vadd.f32 %v2961_v43, %v2933_v59  ;;  %v2982_v36 = vadd.f32 %v2961_v43, %v2934_v28  ;;  %v3410_v29 = vld [vmem:[%s7680_s6 + $0x78] sm:$0xff] }
 0x228   :  { %3031 = vst [vmem:[#allocation2 + $0x8a8] sm:$0xff] %v3003_v53  ;;  %3032 = vst [vmem:[#allocation2 + $0x8b0] sm:$0xff] %v3004_v4  ;;  %v2983_v46 = vadd.f32 %v2961_v43, %v2935_v5  ;;  %v2984_v8 = vadd.f32 %v2961_v43, %v2936_v31  ;;  %v2944_v60 = vmul.f32 %v3409_v2, %v7514_v54  ;;  %v2971_v3 = vpop.permute.xlu1 %2970 }
 0x229   :  { %3033 = vst.msk [vmem:[#allocation2 + $0x8b8] sm:$0xff] %vm150_vm0, %v3005_v40  ;;  %3006 = vst [vmem:[#allocation2 + $0x7e0] sm:$0xff] %v2978_v14  ;;  %v2945_v6 = vmul.f32 %v3410_v29, %v7514_v54  ;;  %v2946_v9 = vmul.f32 %v3411_v35, %v7514_v54  ;;  %v2947_v11 = vmul.f32 %v3412_v33, %v7514_v54 }
 0x22a   :  { %3007 = vst [vmem:[#allocation2 + $0x7e8] sm:$0xff] %v2979_v10  ;;  %3008 = vst [vmem:[#allocation2 + $0x7f0] sm:$0xff] %v2980_v25  ;;  %v2948_v52 = vmul.f32 %v3413_v22, %v7514_v54  ;;  %v2949_v59 = vmul.f32 %v3414_v49, %v7514_v54  ;;  %v2950_v15 = vmul.f32 %v3415_v55, %v7514_v54 }
 0x22b   :  { %3009 = vst [vmem:[#allocation2 + $0x7f8] sm:$0xff] %v2981_v37  ;;  %3010 = vst [vmem:[#allocation2 + $0x800] sm:$0xff] %v2982_v36  ;;  %v2992_v45 = vadd.f32 %v2971_v3, %v2944_v60  ;;  %v2993_v26 = vadd.f32 %v2971_v3, %v2945_v6  ;;  %v2994_v13 = vadd.f32 %v2971_v3, %v2946_v9 }
 0x22c   :  { %3011 = vst [vmem:[#allocation2 + $0x808] sm:$0xff] %v2983_v46  ;;  %3012 = vst.msk [vmem:[#allocation2 + $0x810] sm:$0xff] %vm150_vm0, %v2984_v8  ;;  %v2995_v62 = vadd.f32 %v2971_v3, %v2947_v11  ;;  %v2996_v41 = vadd.f32 %v2971_v3, %v2948_v52  ;;  %v2997_v48 = vadd.f32 %v2971_v3, %v2949_v59 }
 0x22d   :  { %v2998_v17 = vadd.f32 %v2971_v3, %v2950_v15  ;;  %3020 = vst [vmem:[#allocation2 + $0x850] sm:$0xff] %v2992_v45  ;;  %3021 = vst [vmem:[#allocation2 + $0x858] sm:$0xff] %v2993_v26 }
 0x22e   :  { %3022 = vst [vmem:[#allocation2 + $0x860] sm:$0xff] %v2994_v13  ;;  %3023 = vst [vmem:[#allocation2 + $0x868] sm:$0xff] %v2995_v62 }
 0x22f   :  { %3024 = vst [vmem:[#allocation2 + $0x870] sm:$0xff] %v2996_v41  ;;  %3025 = vst [vmem:[#allocation2 + $0x878] sm:$0xff] %v2997_v48 }
 0x230   :  { %3026 = vst.msk [vmem:[#allocation2 + $0x880] sm:$0xff] %vm150_vm0, %v2998_v17 }
 0x231   :  { %3427 = shalt.err (!%p3424_p4)
}
 0x232   :  { %s3428_s5 = scalar_lea.hbm %s7683_s9, 35840 }
 0x233   :  { %p3429_p5 = scmp.ne.s32.totalorder %s7683_s9, %s3428_s5  ;;  %p3432_p6 = scmp.lt.u32.totalorder %s3428_s5, %s7683_s9 }
 0x235   :  { %p3434_p7 = pnand %p3432_p6, %p3429_p5 }
 0x237   :  { %3437 = shalt.err (!%p3434_p7)
}
 0x238   :  { %s3442_s16 = smov 896   ;;  %s3443_s17 = smov 56  }
 0x239   :  { %3045 = dma.vmem_to_hbm [thread:$0]  %s3040_s7, 35840, %s7683_s9, [#allocation3], %s3442_s16, %s3442_s16, %s3443_s17  }
 0x23a   :  { %3438 = dma.done.wait [#allocation3], 35840  }
 0x23b   :  { %3439 = vsyncadd [#allocation3], 4294931456 }
 0x23c   :  { %3049 = vsyncpa [#allocation3], 1 }

</bundles_post_ra>
